<compile_context>
chip_gen: v5e
topology: v5e:2x2
jax: 0.10.0
libtpu: 0.0.40
codegen_flags: <defaults>
</compile_context>

<pallas_src>
import jax
import jax.numpy as jnp
import numpy as np
from jax.experimental import pallas as pl
from jax.experimental.pallas import tpu as pltpu


# ----------------------------------------------------------------------------
# In-kernel helpers
# ----------------------------------------------------------------------------
def _softmax_last(x):
    m = jnp.max(x, axis=-1, keepdims=True)
    e = jnp.exp(x - m)
    # EUP approximate reciprocal: frees the VALU divide slot (review item).
    return e * pl.reciprocal(jnp.sum(e, axis=-1, keepdims=True), approx=True)


# ----------------------------------------------------------------------------
# Fused multi-layer kernel: one (tm, c) token block per grid step, all layers inside.
# ----------------------------------------------------------------------------
def _make_fuse_kernel(num_layers, nhead, head_dim, w, tm):
    c = nhead * head_dim
    n_rows = tm // w  # BH rows (independent attention groups) in this block

    def kernel(fl_ref, fr_ref,
               wlkv_ref, blkv_ref, wrkv_ref, brkv_ref,
               wlo_ref, blo_ref, wro_ref, bro_ref,
               gamma_ref, beta_ref,
               out_l_ref, out_r_ref):
        fl = fl_ref[...]  # (tm, c) f32 -- stays resident across all layers
        fr = fr_ref[...]

        def to_heads(x):  # (tm, c) -> (nhead*n_rows, w, head_dim), head-major batch
            x3 = x.reshape(n_rows, w, c)
            parts = [x3[:, :, h * head_dim:(h + 1) * head_dim] for h in range(nhead)]
            return jnp.concatenate(parts, axis=0)

        def from_heads(xb):  # (nhead*n_rows, w, head_dim) -> (tm, c)
            parts = [xb[h * n_rows:(h + 1) * n_rows] for h in range(nhead)]
            return jnp.concatenate(parts, axis=-1).reshape(tm, c)

        # Statically unrolled layer loop (small fixed layer count).
        for li in range(num_layers):
            gamma = gamma_ref[li]   # (1, c)
            beta = beta_ref[li]     # (1, c)
            wlkv = wlkv_ref[li]     # (c, 2c)  pre-transposed, K|V fused
            blkv = blkv_ref[li]     # (1, 2c)
            wrkv = wrkv_ref[li]
            brkv = brkv_ref[li]
            wlo = wlo_ref[li]       # (c, c)   pre-transposed
            blo = blo_ref[li]       # (1, c)
            wro = wro_ref[li]
            bro = bro_ref[li]

            def layernorm(x):
                mu = jnp.mean(x, axis=-1, keepdims=True)
                xc = x - mu
                var = jnp.mean(xc * xc, axis=-1, keepdims=True)
                return xc * jax.lax.rsqrt(var + 1e-5) * gamma + beta

            ln_l = layernorm(fl)
            ln_r = layernorm(fr)

            # Fused K/V projections: one (tm,c)@(c,2c) matmul per side.
            kv_l = jnp.dot(ln_l, wlkv, preferred_element_type=jnp.float32) + blkv
            kv_r = jnp.dot(ln_r, wrkv, preferred_element_type=jnp.float32) + brkv
            l_k, l_v = kv_l[:, :c], kv_l[:, c:]
            r_k, r_v = kv_r[:, :c], kv_r[:, c:]

            # Head-batched bidirectional attention (batch = nhead * n_rows).
            lk_b = to_heads(l_k)
            rk_b = to_heads(r_k)
            lv_b = to_heads(l_v)
            rv_b = to_heads(r_v)

            # scores (left->right) and (right->left); second matmul instead of s.T
            s = jnp.einsum('bqd,bkd->bqk', lk_b, rk_b,
                           preferred_element_type=jnp.float32) * 0.1
            s_t = jnp.einsum('bkd,bqd->bkq', rk_b, lk_b,
                             preferred_element_type=jnp.float32) * 0.1

            sm_l = _softmax_last(s)    # softmax over right positions
            sm_r = _softmax_last(s_t)  # softmax over left positions

            r_att_b = jnp.einsum('bqk,bkd->bqd', sm_l, rv_b,
                                 preferred_element_type=jnp.float32)
            l_att_b = jnp.einsum('bkq,bqd->bkd', sm_r, lv_b,
                                 preferred_element_type=jnp.float32)

            r_att = from_heads(r_att_b)   # (tm, c) -> added to feat_left
            l_att = from_heads(l_att_b)   # (tm, c) -> added to feat_right

            fl = fl + jnp.dot(r_att, wlo, preferred_element_type=jnp.float32) + blo
            fr = fr + jnp.dot(l_att, wro, preferred_element_type=jnp.float32) + bro

        out_l_ref[...] = fl
        out_r_ref[...] = fr

    return kernel


# ----------------------------------------------------------------------------
# Host-side weight prep: fuse K|V, pre-transpose, stack across layers.
# ----------------------------------------------------------------------------
def _prepare_fused_weights(layer_params):
    def stack(fn):
        return jnp.stack([fn(p) for p in layer_params], axis=0)

    return [
        stack(lambda p: jnp.concatenate([p["lkw"], p["lvw"]], axis=0).T),  # (L, c, 2c)
        stack(lambda p: jnp.concatenate([p["lkb"], p["lvb"]], axis=-1)),   # (L, 1, 2c)
        stack(lambda p: jnp.concatenate([p["rkw"], p["rvw"]], axis=0).T),  # (L, c, 2c)
        stack(lambda p: jnp.concatenate([p["rkb"], p["rvb"]], axis=-1)),   # (L, 1, 2c)
        stack(lambda p: p["low"].T),                                       # (L, c, c)
        stack(lambda p: p["lob"]),                                         # (L, 1, c)
        stack(lambda p: p["row"].T),                                       # (L, c, c)
        stack(lambda p: p["rob"]),                                         # (L, 1, c)
        stack(lambda p: p["gamma"]),                                       # (L, 1, c)
        stack(lambda p: p["beta"]),                                        # (L, 1, c)
    ]


def _pick_tbh(bh, w, target_tokens):
    """Largest divisor of bh (in BH rows) with ~target tokens per block, grid>=2 if possible."""
    target_rows = max(1, target_tokens // max(w, 1))
    divisors = [d for d in range(1, bh + 1) if bh % d == 0]
    cand = [d for d in divisors if d <= target_rows and bh // d >= 2]
    if not cand:
        cand = [d for d in divisors if d <= target_rows]
    if not cand:
        cand = [bh]
    tbh = max(cand)
    return tbh, bh // tbh


def attn_fuse_pallas(fl3, fr3, layer_params, nhead, *, target_tokens=1024):
    bh, w, c = fl3.shape
    head_dim = c // nhead
    num_layers = len(layer_params)

    M = bh * w
    fl = fl3.reshape(M, c)
    fr = fr3.reshape(M, c)

    tbh, grid_n = _pick_tbh(bh, w, target_tokens)
    tm = tbh * w  # tokens per block (multiple of w -> attention groups never split)

    weights = _prepare_fused_weights(layer_params)
    kernel = _make_fuse_kernel(num_layers, nhead, head_dim, w, tm)

    tok_spec = pl.BlockSpec((tm, c), lambda n: (n, 0))
    # Full-array, constant-index blocks: weights are DMA'd once and stay in VMEM.
    weight_specs = [pl.BlockSpec(wt.shape, lambda n: (0, 0, 0)) for wt in weights]

    out_shape = (jax.ShapeDtypeStruct((M, c), jnp.float32),
                 jax.ShapeDtypeStruct((M, c), jnp.float32))

    fn = pl.pallas_call(
        kernel,
        out_shape=out_shape,
        grid=(grid_n,),
        in_specs=[tok_spec, tok_spec] + weight_specs,
        out_specs=(tok_spec, tok_spec),
        compiler_params=pltpu.CompilerParams(dimension_semantics=("parallel",)),
    )
    out_l, out_r = fn(fl, fr, *weights)
    return out_l.reshape(bh, w, c), out_r.reshape(bh, w, c)


# ----------------------------------------------------------------------------
# Pure-JAX reference of one AttentionLayer (mirrors the PyTorch code exactly).
# ----------------------------------------------------------------------------
def attn_layer_ref(fl, fr, p, nhead):
    bh, w, c = fl.shape
    hd = c // nhead

    def layernorm(x):
        mu = x.mean(-1, keepdims=True)
        var = ((x - mu) ** 2).mean(-1, keepdims=True)
        return (x - mu) / jnp.sqrt(var + 1e-5) * p["gamma"][0] + p["beta"][0]

    ln_l = layernorm(fl)
    ln_r = layernorm(fr)
    l_k = ln_l @ p["lkw"].T + p["lkb"][0]
    l_v = ln_l @ p["lvw"].T + p["lvb"][0]
    r_k = ln_r @ p["rkw"].T + p["rkb"][0]
    r_v = ln_r @ p["rvw"].T + p["rvb"][0]

    l_k = l_k.reshape(bh, w, nhead, hd)
    r_k = r_k.reshape(bh, w, nhead, hd)
    l_v = l_v.reshape(bh, w, nhead, hd)
    r_v = r_v.reshape(bh, w, nhead, hd)

    attn = jnp.einsum("nwec,nvec->newv", l_k, r_k) * 0.1
    sm_l = jax.nn.softmax(attn, axis=-1)
    r_att = jnp.einsum("newv,nved->nwed", sm_l, r_v).reshape(bh, w, c)
    sm_r = jax.nn.softmax(jnp.swapaxes(attn, -1, -2), axis=-1)
    l_att = jnp.einsum("nevw,nwed->nved", sm_r, l_v).reshape(bh, w, c)

    fl_new = fl + r_att @ p["low"].T + p["lob"][0]
    fr_new = fr + l_att @ p["row"].T + p["rob"][0]
    return fl_new, fr_new


# ----------------------------------------------------------------------------
# AttentionFuse forward
# ----------------------------------------------------------------------------
def attention_fuse_forward(feat_left, feat_right, layer_params, nhead, use_pallas=True):
    b, c, h, w = feat_left.shape
    fl = feat_left.transpose(0, 2, 3, 1).reshape(b * h, w, c)
    fr = feat_right.transpose(0, 2, 3, 1).reshape(b * h, w, c)
    if use_pallas:
        fl, fr = attn_fuse_pallas(fl, fr, layer_params, nhead)
    else:
        for p in layer_params:
            fl, fr = attn_layer_ref(fl, fr, p, nhead)
    fl = fl.reshape(b, h, w, c).transpose(0, 3, 1, 2)
    fr = fr.reshape(b, h, w, c).transpose(0, 3, 1, 2)
    return fl, fr


# ----------------------------------------------------------------------------
# Deterministic parameter init (shapes from AttentionLayer.__init__)
# ----------------------------------------------------------------------------
def _xavier_uniform(key, shape):
    fan_out, fan_in = shape
    bound = float(np.sqrt(6.0 / (fan_in + fan_out)))
    return jax.random.uniform(key, shape, jnp.float32, -bound, bound)


def init_attn_layer_params(key, hidden_dim):
    c = hidden_dim
    k = jax.random.split(key, 4)
    l_proj_w = _xavier_uniform(k[0], (2 * c, c))   # xavier_uniform_
    r_proj_w = _xavier_uniform(k[1], (2 * c, c))
    bound = 1.0 / float(np.sqrt(c))
    l_out_w = jax.random.uniform(k[2], (c, c), jnp.float32, -bound, bound)
    r_out_w = jax.random.uniform(k[3], (c, c), jnp.float32, -bound, bound)
    zeros_row = jnp.zeros((1, c), jnp.float32)
    return {
        "lkw": l_proj_w[:c], "lvw": l_proj_w[c:],
        "rkw": r_proj_w[:c], "rvw": r_proj_w[c:],
        "lkb": zeros_row, "lvb": zeros_row,        # l_proj_bias = 0
        "rkb": zeros_row, "rvb": zeros_row,        # r_proj_bias = 0
        "low": l_out_w, "lob": zeros_row,          # l_out_proj (bias = 0)
        "row": r_out_w, "rob": zeros_row,          # r_out_proj (bias = 0)
        "gamma": jnp.ones((1, c), jnp.float32),    # LayerNorm default weight
        "beta": jnp.zeros((1, c), jnp.float32),    # LayerNorm default bias
    }


if __name__ == "__main__":
    hidden_dim = 32
    nhead = 4
    num_attn_layers = 2
    b, h, w = 2, 4, 8
    c = hidden_dim

    key = jax.random.PRNGKey(0)
    k_left, k_right, k_params = jax.random.split(key, 3)
    feat_left = jax.random.normal(k_left, (b, c, h, w), jnp.float32)
    feat_right = jax.random.normal(k_right, (b, c, h, w), jnp.float32)

    layer_keys = jax.random.split(k_params, num_attn_layers)
    layer_params = [init_attn_layer_params(lk, hidden_dim) for lk in layer_keys]

    out_l, out_r = attention_fuse_forward(feat_left, feat_right, layer_params, nhead,
                                          use_pallas=True)
    jax.block_until_ready((out_l, out_r))

    ref_l, ref_r = attention_fuse_forward(feat_left, feat_right, layer_params, nhead,
                                          use_pallas=False)
    # Tolerance loosened vs. the pure-f32 version because the softmax denominator now
    # uses the EUP approximate reciprocal (pl.reciprocal(approx=True)).
    np.testing.assert_allclose(np.asarray(out_l), np.asarray(ref_l), rtol=1e-2, atol=1e-2)
    np.testing.assert_allclose(np.asarray(out_r), np.asarray(ref_r), rtol=1e-2, atol=1e-2)
    assert out_l.shape == (b, c, h, w) and out_r.shape == (b, c, h, w)

    print("KERNEL_OK")
</pallas_src>

<mosaic_0001>
module attributes {stable_mosaic.version = 11 : i64} {
  func.func @kernel(%arg0: i32, %arg1: memref<32x32xf32, #tpu.memory_space<vmem>>, %arg2: memref<32x32xf32, #tpu.memory_space<vmem>>, %arg3: memref<2x32x64xf32, #tpu.memory_space<vmem>>, %arg4: memref<2x1x64xf32, #tpu.memory_space<vmem>>, %arg5: memref<2x32x64xf32, #tpu.memory_space<vmem>>, %arg6: memref<2x1x64xf32, #tpu.memory_space<vmem>>, %arg7: memref<2x32x32xf32, #tpu.memory_space<vmem>>, %arg8: memref<2x1x32xf32, #tpu.memory_space<vmem>>, %arg9: memref<2x32x32xf32, #tpu.memory_space<vmem>>, %arg10: memref<2x1x32xf32, #tpu.memory_space<vmem>>, %arg11: memref<2x1x32xf32, #tpu.memory_space<vmem>>, %arg12: memref<2x1x32xf32, #tpu.memory_space<vmem>>, %arg13: memref<32x32xf32, #tpu.memory_space<vmem>>, %arg14: memref<32x32xf32, #tpu.memory_space<vmem>>) attributes {dimension_semantics = [#tpu.dimension_semantics<parallel>], iteration_bounds = array<i64: 2>, scalar_prefetch = 0 : i64, scratch_operands = 0 : i64, tpu.core_type = #tpu.core_type<tc>, window_params = [{transform_indices = @transform_0, window_bounds = array<i64: 32, 32>}, {transform_indices = @transform_1, window_bounds = array<i64: 32, 32>}, {pipeline_mode = #tpu.pipeline_mode<synchronous>, transform_indices = @transform_2, window_bounds = array<i64: 2, 32, 64>}, {pipeline_mode = #tpu.pipeline_mode<synchronous>, transform_indices = @transform_3, window_bounds = array<i64: 2, 1, 64>}, {pipeline_mode = #tpu.pipeline_mode<synchronous>, transform_indices = @transform_4, window_bounds = array<i64: 2, 32, 64>}, {pipeline_mode = #tpu.pipeline_mode<synchronous>, transform_indices = @transform_5, window_bounds = array<i64: 2, 1, 64>}, {pipeline_mode = #tpu.pipeline_mode<synchronous>, transform_indices = @transform_6, window_bounds = array<i64: 2, 32, 32>}, {pipeline_mode = #tpu.pipeline_mode<synchronous>, transform_indices = @transform_7, window_bounds = array<i64: 2, 1, 32>}, {pipeline_mode = #tpu.pipeline_mode<synchronous>, transform_indices = @transform_8, window_bounds = array<i64: 2, 32, 32>}, {pipeline_mode = #tpu.pipeline_mode<synchronous>, transform_indices = @transform_9, window_bounds = array<i64: 2, 1, 32>}, {pipeline_mode = #tpu.pipeline_mode<synchronous>, transform_indices = @transform_10, window_bounds = array<i64: 2, 1, 32>}, {pipeline_mode = #tpu.pipeline_mode<synchronous>, transform_indices = @transform_11, window_bounds = array<i64: 2, 1, 32>}, {transform_indices = @transform_12, window_bounds = array<i64: 32, 32>}, {transform_indices = @transform_13, window_bounds = array<i64: 32, 32>}]} {
    %c0 = arith.constant 0 : index
    %c0_0 = arith.constant 0 : index
    %0 = vector.load %arg1[%c0, %c0_0] : memref<32x32xf32, #tpu.memory_space<vmem>>, vector<32x32xf32>
    %c0_1 = arith.constant 0 : index
    %c0_2 = arith.constant 0 : index
    %1 = vector.load %arg2[%c0_1, %c0_2] : memref<32x32xf32, #tpu.memory_space<vmem>>, vector<32x32xf32>
    %c0_3 = arith.constant 0 : index
    %c0_4 = arith.constant 0 : index
    %c0_5 = arith.constant 0 : index
    %2 = vector.load %arg11[%c0_3, %c0_4, %c0_5] : memref<2x1x32xf32, #tpu.memory_space<vmem>>, vector<1x1x32xf32>
    %3 = vector.shape_cast %2 : vector<1x1x32xf32> to vector<1x32xf32>
    %c0_6 = arith.constant 0 : index
    %c0_7 = arith.constant 0 : index
    %c0_8 = arith.constant 0 : index
    %4 = vector.load %arg12[%c0_6, %c0_7, %c0_8] : memref<2x1x32xf32, #tpu.memory_space<vmem>>, vector<1x1x32xf32>
    %5 = vector.shape_cast %4 : vector<1x1x32xf32> to vector<1x32xf32>
    %c0_9 = arith.constant 0 : index
    %c0_10 = arith.constant 0 : index
    %c0_11 = arith.constant 0 : index
    %6 = vector.load %arg3[%c0_9, %c0_10, %c0_11] : memref<2x32x64xf32, #tpu.memory_space<vmem>>, vector<1x32x64xf32>
    %7 = vector.shape_cast %6 : vector<1x32x64xf32> to vector<32x64xf32>
    %c0_12 = arith.constant 0 : index
    %c0_13 = arith.constant 0 : index
    %c0_14 = arith.constant 0 : index
    %8 = vector.load %arg4[%c0_12, %c0_13, %c0_14] : memref<2x1x64xf32, #tpu.memory_space<vmem>>, vector<1x1x64xf32>
    %9 = vector.shape_cast %8 : vector<1x1x64xf32> to vector<1x64xf32>
    %c0_15 = arith.constant 0 : index
    %c0_16 = arith.constant 0 : index
    %c0_17 = arith.constant 0 : index
    %10 = vector.load %arg5[%c0_15, %c0_16, %c0_17] : memref<2x32x64xf32, #tpu.memory_space<vmem>>, vector<1x32x64xf32>
    %11 = vector.shape_cast %10 : vector<1x32x64xf32> to vector<32x64xf32>
    %c0_18 = arith.constant 0 : index
    %c0_19 = arith.constant 0 : index
    %c0_20 = arith.constant 0 : index
    %12 = vector.load %arg6[%c0_18, %c0_19, %c0_20] : memref<2x1x64xf32, #tpu.memory_space<vmem>>, vector<1x1x64xf32>
    %13 = vector.shape_cast %12 : vector<1x1x64xf32> to vector<1x64xf32>
    %c0_21 = arith.constant 0 : index
    %c0_22 = arith.constant 0 : index
    %c0_23 = arith.constant 0 : index
    %14 = vector.load %arg7[%c0_21, %c0_22, %c0_23] : memref<2x32x32xf32, #tpu.memory_space<vmem>>, vector<1x32x32xf32>
    %15 = vector.shape_cast %14 : vector<1x32x32xf32> to vector<32x32xf32>
    %c0_24 = arith.constant 0 : index
    %c0_25 = arith.constant 0 : index
    %c0_26 = arith.constant 0 : index
    %16 = vector.load %arg8[%c0_24, %c0_25, %c0_26] : memref<2x1x32xf32, #tpu.memory_space<vmem>>, vector<1x1x32xf32>
    %17 = vector.shape_cast %16 : vector<1x1x32xf32> to vector<1x32xf32>
    %c0_27 = arith.constant 0 : index
    %c0_28 = arith.constant 0 : index
    %c0_29 = arith.constant 0 : index
    %18 = vector.load %arg9[%c0_27, %c0_28, %c0_29] : memref<2x32x32xf32, #tpu.memory_space<vmem>>, vector<1x32x32xf32>
    %19 = vector.shape_cast %18 : vector<1x32x32xf32> to vector<32x32xf32>
    %c0_30 = arith.constant 0 : index
    %c0_31 = arith.constant 0 : index
    %c0_32 = arith.constant 0 : index
    %20 = vector.load %arg10[%c0_30, %c0_31, %c0_32] : memref<2x1x32xf32, #tpu.memory_space<vmem>>, vector<1x1x32xf32>
    %21 = vector.shape_cast %20 : vector<1x1x32xf32> to vector<1x32xf32>
    %cst = arith.constant dense<0.000000e+00> : vector<32xf32>
    %22 = vector.multi_reduction <add>, %0, %cst [1] : vector<32x32xf32> to vector<32xf32>
    %23 = vector.shape_cast %22 : vector<32xf32> to vector<32x1xf32>
    %cst_33 = arith.constant 3.200000e+01 : f32
    %24 = vector.broadcast %cst_33 : f32 to vector<32x1xf32>
    %25 = arith.divf %23, %24 : vector<32x1xf32>
    %26 = vector.broadcast %25 : vector<32x1xf32> to vector<32x32xf32>
    %27 = arith.subf %0, %26 : vector<32x32xf32>
    %28 = arith.mulf %27, %27 : vector<32x32xf32>
    %cst_34 = arith.constant dense<0.000000e+00> : vector<32xf32>
    %29 = vector.multi_reduction <add>, %28, %cst_34 [1] : vector<32x32xf32> to vector<32xf32>
    %30 = vector.shape_cast %29 : vector<32xf32> to vector<32x1xf32>
    %cst_35 = arith.constant 3.200000e+01 : f32
    %31 = vector.broadcast %cst_35 : f32 to vector<32x1xf32>
    %32 = arith.divf %30, %31 : vector<32x1xf32>
    %cst_36 = arith.constant 9.99999974E-6 : f32
    %33 = vector.broadcast %cst_36 : f32 to vector<32x1xf32>
    %34 = arith.addf %32, %33 : vector<32x1xf32>
    %35 = math.rsqrt %34 : vector<32x1xf32>
    %36 = vector.broadcast %35 : vector<32x1xf32> to vector<32x32xf32>
    %37 = arith.mulf %27, %36 : vector<32x32xf32>
    %38 = vector.broadcast %3 : vector<1x32xf32> to vector<32x32xf32>
    %39 = arith.mulf %37, %38 : vector<32x32xf32>
    %40 = vector.broadcast %5 : vector<1x32xf32> to vector<32x32xf32>
    %41 = arith.addf %39, %40 : vector<32x32xf32>
    %cst_37 = arith.constant dense<0.000000e+00> : vector<32xf32>
    %42 = vector.multi_reduction <add>, %1, %cst_37 [1] : vector<32x32xf32> to vector<32xf32>
    %43 = vector.shape_cast %42 : vector<32xf32> to vector<32x1xf32>
    %cst_38 = arith.constant 3.200000e+01 : f32
    %44 = vector.broadcast %cst_38 : f32 to vector<32x1xf32>
    %45 = arith.divf %43, %44 : vector<32x1xf32>
    %46 = vector.broadcast %45 : vector<32x1xf32> to vector<32x32xf32>
    %47 = arith.subf %1, %46 : vector<32x32xf32>
    %48 = arith.mulf %47, %47 : vector<32x32xf32>
    %cst_39 = arith.constant dense<0.000000e+00> : vector<32xf32>
    %49 = vector.multi_reduction <add>, %48, %cst_39 [1] : vector<32x32xf32> to vector<32xf32>
    %50 = vector.shape_cast %49 : vector<32xf32> to vector<32x1xf32>
    %cst_40 = arith.constant 3.200000e+01 : f32
    %51 = vector.broadcast %cst_40 : f32 to vector<32x1xf32>
    %52 = arith.divf %50, %51 : vector<32x1xf32>
    %cst_41 = arith.constant 9.99999974E-6 : f32
    %53 = vector.broadcast %cst_41 : f32 to vector<32x1xf32>
    %54 = arith.addf %52, %53 : vector<32x1xf32>
    %55 = math.rsqrt %54 : vector<32x1xf32>
    %56 = vector.broadcast %55 : vector<32x1xf32> to vector<32x32xf32>
    %57 = arith.mulf %47, %56 : vector<32x32xf32>
    %58 = vector.broadcast %3 : vector<1x32xf32> to vector<32x32xf32>
    %59 = arith.mulf %57, %58 : vector<32x32xf32>
    %60 = vector.broadcast %5 : vector<1x32xf32> to vector<32x32xf32>
    %61 = arith.addf %59, %60 : vector<32x32xf32>
    %cst_42 = arith.constant dense<0.000000e+00> : vector<32x64xf32>
    %62 = tpu.matmul %41, %7, %cst_42 {dimension_numbers = #tpu.dot_dimension_numbers<[1], [0], [0], [1], [0, 0, 1, 1], [], []>} : vector<32x32xf32>, vector<32x64xf32>, vector<32x64xf32> -> vector<32x64xf32>
    %63 = vector.broadcast %9 : vector<1x64xf32> to vector<32x64xf32>
    %64 = arith.addf %62, %63 : vector<32x64xf32>
    %cst_43 = arith.constant dense<0.000000e+00> : vector<32x64xf32>
    %65 = tpu.matmul %61, %11, %cst_43 {dimension_numbers = #tpu.dot_dimension_numbers<[1], [0], [0], [1], [0, 0, 1, 1], [], []>} : vector<32x32xf32>, vector<32x64xf32>, vector<32x64xf32> -> vector<32x64xf32>
    %66 = vector.broadcast %13 : vector<1x64xf32> to vector<32x64xf32>
    %67 = arith.addf %65, %66 : vector<32x64xf32>
    %68 = vector.extract_strided_slice %64 {offsets = [0, 0], sizes = [32, 32], strides = [1, 1]} : vector<32x64xf32> to vector<32x32xf32>
    %69 = vector.extract_strided_slice %64 {offsets = [0, 32], sizes = [32, 32], strides = [1, 1]} : vector<32x64xf32> to vector<32x32xf32>
    %70 = vector.extract_strided_slice %67 {offsets = [0, 0], sizes = [32, 32], strides = [1, 1]} : vector<32x64xf32> to vector<32x32xf32>
    %71 = vector.extract_strided_slice %67 {offsets = [0, 32], sizes = [32, 32], strides = [1, 1]} : vector<32x64xf32> to vector<32x32xf32>
    %72 = vector.shape_cast %68 : vector<32x32xf32> to vector<4x8x32xf32>
    %73 = vector.extract_strided_slice %72 {offsets = [0, 0, 0], sizes = [4, 8, 8], strides = [1, 1, 1]} : vector<4x8x32xf32> to vector<4x8x8xf32>
    %74 = vector.extract_strided_slice %72 {offsets = [0, 0, 8], sizes = [4, 8, 8], strides = [1, 1, 1]} : vector<4x8x32xf32> to vector<4x8x8xf32>
    %75 = vector.extract_strided_slice %72 {offsets = [0, 0, 16], sizes = [4, 8, 8], strides = [1, 1, 1]} : vector<4x8x32xf32> to vector<4x8x8xf32>
    %76 = vector.extract_strided_slice %72 {offsets = [0, 0, 24], sizes = [4, 8, 8], strides = [1, 1, 1]} : vector<4x8x32xf32> to vector<4x8x8xf32>
    %77 = tpu.concatenate %73, %74, %75, %76 in 0 : vector<4x8x8xf32>, vector<4x8x8xf32>, vector<4x8x8xf32>, vector<4x8x8xf32> -> vector<16x8x8xf32>
    %78 = vector.shape_cast %70 : vector<32x32xf32> to vector<4x8x32xf32>
    %79 = vector.extract_strided_slice %78 {offsets = [0, 0, 0], sizes = [4, 8, 8], strides = [1, 1, 1]} : vector<4x8x32xf32> to vector<4x8x8xf32>
    %80 = vector.extract_strided_slice %78 {offsets = [0, 0, 8], sizes = [4, 8, 8], strides = [1, 1, 1]} : vector<4x8x32xf32> to vector<4x8x8xf32>
    %81 = vector.extract_strided_slice %78 {offsets = [0, 0, 16], sizes = [4, 8, 8], strides = [1, 1, 1]} : vector<4x8x32xf32> to vector<4x8x8xf32>
    %82 = vector.extract_strided_slice %78 {offsets = [0, 0, 24], sizes = [4, 8, 8], strides = [1, 1, 1]} : vector<4x8x32xf32> to vector<4x8x8xf32>
    %83 = tpu.concatenate %79, %80, %81, %82 in 0 : vector<4x8x8xf32>, vector<4x8x8xf32>, vector<4x8x8xf32>, vector<4x8x8xf32> -> vector<16x8x8xf32>
    %84 = vector.shape_cast %69 : vector<32x32xf32> to vector<4x8x32xf32>
    %85 = vector.extract_strided_slice %84 {offsets = [0, 0, 0], sizes = [4, 8, 8], strides = [1, 1, 1]} : vector<4x8x32xf32> to vector<4x8x8xf32>
    %86 = vector.extract_strided_slice %84 {offsets = [0, 0, 8], sizes = [4, 8, 8], strides = [1, 1, 1]} : vector<4x8x32xf32> to vector<4x8x8xf32>
    %87 = vector.extract_strided_slice %84 {offsets = [0, 0, 16], sizes = [4, 8, 8], strides = [1, 1, 1]} : vector<4x8x32xf32> to vector<4x8x8xf32>
    %88 = vector.extract_strided_slice %84 {offsets = [0, 0, 24], sizes = [4, 8, 8], strides = [1, 1, 1]} : vector<4x8x32xf32> to vector<4x8x8xf32>
    %89 = tpu.concatenate %85, %86, %87, %88 in 0 : vector<4x8x8xf32>, vector<4x8x8xf32>, vector<4x8x8xf32>, vector<4x8x8xf32> -> vector<16x8x8xf32>
    %90 = vector.shape_cast %71 : vector<32x32xf32> to vector<4x8x32xf32>
    %91 = vector.extract_strided_slice %90 {offsets = [0, 0, 0], sizes = [4, 8, 8], strides = [1, 1, 1]} : vector<4x8x32xf32> to vector<4x8x8xf32>
    %92 = vector.extract_strided_slice %90 {offsets = [0, 0, 8], sizes = [4, 8, 8], strides = [1, 1, 1]} : vector<4x8x32xf32> to vector<4x8x8xf32>
    %93 = vector.extract_strided_slice %90 {offsets = [0, 0, 16], sizes = [4, 8, 8], strides = [1, 1, 1]} : vector<4x8x32xf32> to vector<4x8x8xf32>
    %94 = vector.extract_strided_slice %90 {offsets = [0, 0, 24], sizes = [4, 8, 8], strides = [1, 1, 1]} : vector<4x8x32xf32> to vector<4x8x8xf32>
    %95 = tpu.concatenate %91, %92, %93, %94 in 0 : vector<4x8x8xf32>, vector<4x8x8xf32>, vector<4x8x8xf32>, vector<4x8x8xf32> -> vector<16x8x8xf32>
    "tpu.trace_start"() <{level = 10 : i32, message = "bqd,bkd->bqk"}> : () -> ()
    %cst_44 = arith.constant dense<0.000000e+00> : vector<16x8x8xf32>
    %96 = tpu.matmul %77, %83, %cst_44 {dimension_numbers = #tpu.dot_dimension_numbers<[2], [2], [1], [1], [0, 0, 0, 1, 1, 1], [0], [0]>} : vector<16x8x8xf32>, vector<16x8x8xf32>, vector<16x8x8xf32> -> vector<16x8x8xf32>
    "tpu.trace_stop"() : () -> ()
    %cst_45 = arith.constant 1.000000e-01 : f32
    %97 = vector.broadcast %cst_45 : f32 to vector<16x8x8xf32>
    %98 = arith.mulf %96, %97 : vector<16x8x8xf32>
    "tpu.trace_start"() <{level = 10 : i32, message = "bkd,bqd->bkq"}> : () -> ()
    %cst_46 = arith.constant dense<0.000000e+00> : vector<16x8x8xf32>
    %99 = tpu.matmul %83, %77, %cst_46 {dimension_numbers = #tpu.dot_dimension_numbers<[2], [2], [1], [1], [0, 0, 0, 1, 1, 1], [0], [0]>} : vector<16x8x8xf32>, vector<16x8x8xf32>, vector<16x8x8xf32> -> vector<16x8x8xf32>
    "tpu.trace_stop"() : () -> ()
    %cst_47 = arith.constant 1.000000e-01 : f32
    %100 = vector.broadcast %cst_47 : f32 to vector<16x8x8xf32>
    %101 = arith.mulf %99, %100 : vector<16x8x8xf32>
    %cst_48 = arith.constant dense<0xFF800000> : vector<16x8xf32>
    %102 = vector.multi_reduction <maximumf>, %98, %cst_48 [2] : vector<16x8x8xf32> to vector<16x8xf32>
    %103 = vector.shape_cast %102 : vector<16x8xf32> to vector<16x8x1xf32>
    %104 = vector.broadcast %103 : vector<16x8x1xf32> to vector<16x8x8xf32>
    %105 = arith.subf %98, %104 : vector<16x8x8xf32>
    %106 = math.exp %105 : vector<16x8x8xf32>
    %cst_49 = arith.constant dense<0.000000e+00> : vector<16x8xf32>
    %107 = vector.multi_reduction <add>, %106, %cst_49 [2] : vector<16x8x8xf32> to vector<16x8xf32>
    %108 = vector.shape_cast %107 : vector<16x8xf32> to vector<16x8x1xf32>
    %109 = tpu.reciprocal %108 {approx = true} : vector<16x8x1xf32> -> vector<16x8x1xf32>
    %110 = vector.broadcast %109 : vector<16x8x1xf32> to vector<16x8x8xf32>
    %111 = arith.mulf %106, %110 : vector<16x8x8xf32>
    %cst_50 = arith.constant dense<0xFF800000> : vector<16x8xf32>
    %112 = vector.multi_reduction <maximumf>, %101, %cst_50 [2] : vector<16x8x8xf32> to vector<16x8xf32>
    %113 = vector.shape_cast %112 : vector<16x8xf32> to vector<16x8x1xf32>
    %114 = vector.broadcast %113 : vector<16x8x1xf32> to vector<16x8x8xf32>
    %115 = arith.subf %101, %114 : vector<16x8x8xf32>
    %116 = math.exp %115 : vector<16x8x8xf32>
    %cst_51 = arith.constant dense<0.000000e+00> : vector<16x8xf32>
    %117 = vector.multi_reduction <add>, %116, %cst_51 [2] : vector<16x8x8xf32> to vector<16x8xf32>
    %118 = vector.shape_cast %117 : vector<16x8xf32> to vector<16x8x1xf32>
    %119 = tpu.reciprocal %118 {approx = true} : vector<16x8x1xf32> -> vector<16x8x1xf32>
    %120 = vector.broadcast %119 : vector<16x8x1xf32> to vector<16x8x8xf32>
    %121 = arith.mulf %116, %120 : vector<16x8x8xf32>
    "tpu.trace_start"() <{level = 10 : i32, message = "bqk,bkd->bqd"}> : () -> ()
    %cst_52 = arith.constant dense<0.000000e+00> : vector<16x8x8xf32>
    %122 = tpu.matmul %111, %95, %cst_52 {dimension_numbers = #tpu.dot_dimension_numbers<[2], [1], [1], [2], [0, 0, 0, 1, 1, 2], [0], [0]>} : vector<16x8x8xf32>, vector<16x8x8xf32>, vector<16x8x8xf32> -> vector<16x8x8xf32>
    "tpu.trace_stop"() : () -> ()
    "tpu.trace_start"() <{level = 10 : i32, message = "bkq,bqd->bkd"}> : () -> ()
    %cst_53 = arith.constant dense<0.000000e+00> : vector<16x8x8xf32>
    %123 = tpu.matmul %121, %89, %cst_53 {dimension_numbers = #tpu.dot_dimension_numbers<[2], [1], [1], [2], [0, 0, 0, 1, 1, 2], [0], [0]>} : vector<16x8x8xf32>, vector<16x8x8xf32>, vector<16x8x8xf32> -> vector<16x8x8xf32>
    "tpu.trace_stop"() : () -> ()
    %124 = vector.extract_strided_slice %122 {offsets = [0, 0, 0], sizes = [4, 8, 8], strides = [1, 1, 1]} : vector<16x8x8xf32> to vector<4x8x8xf32>
    %125 = vector.extract_strided_slice %122 {offsets = [4, 0, 0], sizes = [4, 8, 8], strides = [1, 1, 1]} : vector<16x8x8xf32> to vector<4x8x8xf32>
    %126 = vector.extract_strided_slice %122 {offsets = [8, 0, 0], sizes = [4, 8, 8], strides = [1, 1, 1]} : vector<16x8x8xf32> to vector<4x8x8xf32>
    %127 = vector.extract_strided_slice %122 {offsets = [12, 0, 0], sizes = [4, 8, 8], strides = [1, 1, 1]} : vector<16x8x8xf32> to vector<4x8x8xf32>
    %128 = tpu.concatenate %124, %125, %126, %127 in 2 : vector<4x8x8xf32>, vector<4x8x8xf32>, vector<4x8x8xf32>, vector<4x8x8xf32> -> vector<4x8x32xf32>
    %129 = vector.shape_cast %128 : vector<4x8x32xf32> to vector<32x32xf32>
    %130 = vector.extract_strided_slice %123 {offsets = [0, 0, 0], sizes = [4, 8, 8], strides = [1, 1, 1]} : vector<16x8x8xf32> to vector<4x8x8xf32>
    %131 = vector.extract_strided_slice %123 {offsets = [4, 0, 0], sizes = [4, 8, 8], strides = [1, 1, 1]} : vector<16x8x8xf32> to vector<4x8x8xf32>
    %132 = vector.extract_strided_slice %123 {offsets = [8, 0, 0], sizes = [4, 8, 8], strides = [1, 1, 1]} : vector<16x8x8xf32> to vector<4x8x8xf32>
    %133 = vector.extract_strided_slice %123 {offsets = [12, 0, 0], sizes = [4, 8, 8], strides = [1, 1, 1]} : vector<16x8x8xf32> to vector<4x8x8xf32>
    %134 = tpu.concatenate %130, %131, %132, %133 in 2 : vector<4x8x8xf32>, vector<4x8x8xf32>, vector<4x8x8xf32>, vector<4x8x8xf32> -> vector<4x8x32xf32>
    %135 = vector.shape_cast %134 : vector<4x8x32xf32> to vector<32x32xf32>
    %cst_54 = arith.constant dense<0.000000e+00> : vector<32x32xf32>
    %136 = tpu.matmul %129, %15, %cst_54 {dimension_numbers = #tpu.dot_dimension_numbers<[1], [0], [0], [1], [0, 0, 1, 1], [], []>} : vector<32x32xf32>, vector<32x32xf32>, vector<32x32xf32> -> vector<32x32xf32>
    %137 = arith.addf %0, %136 : vector<32x32xf32>
    %138 = vector.broadcast %17 : vector<1x32xf32> to vector<32x32xf32>
    %139 = arith.addf %137, %138 : vector<32x32xf32>
    %cst_55 = arith.constant dense<0.000000e+00> : vector<32x32xf32>
    %140 = tpu.matmul %135, %19, %cst_55 {dimension_numbers = #tpu.dot_dimension_numbers<[1], [0], [0], [1], [0, 0, 1, 1], [], []>} : vector<32x32xf32>, vector<32x32xf32>, vector<32x32xf32> -> vector<32x32xf32>
    %141 = arith.addf %1, %140 : vector<32x32xf32>
    %142 = vector.broadcast %21 : vector<1x32xf32> to vector<32x32xf32>
    %143 = arith.addf %141, %142 : vector<32x32xf32>
    %c1 = arith.constant 1 : index
    %c0_56 = arith.constant 0 : index
    %c0_57 = arith.constant 0 : index
    %144 = vector.load %arg11[%c1, %c0_56, %c0_57] : memref<2x1x32xf32, #tpu.memory_space<vmem>>, vector<1x1x32xf32>
    %145 = vector.shape_cast %144 : vector<1x1x32xf32> to vector<1x32xf32>
    %c1_58 = arith.constant 1 : index
    %c0_59 = arith.constant 0 : index
    %c0_60 = arith.constant 0 : index
    %146 = vector.load %arg12[%c1_58, %c0_59, %c0_60] : memref<2x1x32xf32, #tpu.memory_space<vmem>>, vector<1x1x32xf32>
    %147 = vector.shape_cast %146 : vector<1x1x32xf32> to vector<1x32xf32>
    %c1_61 = arith.constant 1 : index
    %c0_62 = arith.constant 0 : index
    %c0_63 = arith.constant 0 : index
    %148 = vector.load %arg3[%c1_61, %c0_62, %c0_63] : memref<2x32x64xf32, #tpu.memory_space<vmem>>, vector<1x32x64xf32>
    %149 = vector.shape_cast %148 : vector<1x32x64xf32> to vector<32x64xf32>
    %c1_64 = arith.constant 1 : index
    %c0_65 = arith.constant 0 : index
    %c0_66 = arith.constant 0 : index
    %150 = vector.load %arg4[%c1_64, %c0_65, %c0_66] : memref<2x1x64xf32, #tpu.memory_space<vmem>>, vector<1x1x64xf32>
    %151 = vector.shape_cast %150 : vector<1x1x64xf32> to vector<1x64xf32>
    %c1_67 = arith.constant 1 : index
    %c0_68 = arith.constant 0 : index
    %c0_69 = arith.constant 0 : index
    %152 = vector.load %arg5[%c1_67, %c0_68, %c0_69] : memref<2x32x64xf32, #tpu.memory_space<vmem>>, vector<1x32x64xf32>
    %153 = vector.shape_cast %152 : vector<1x32x64xf32> to vector<32x64xf32>
    %c1_70 = arith.constant 1 : index
    %c0_71 = arith.constant 0 : index
    %c0_72 = arith.constant 0 : index
    %154 = vector.load %arg6[%c1_70, %c0_71, %c0_72] : memref<2x1x64xf32, #tpu.memory_space<vmem>>, vector<1x1x64xf32>
    %155 = vector.shape_cast %154 : vector<1x1x64xf32> to vector<1x64xf32>
    %c1_73 = arith.constant 1 : index
    %c0_74 = arith.constant 0 : index
    %c0_75 = arith.constant 0 : index
    %156 = vector.load %arg7[%c1_73, %c0_74, %c0_75] : memref<2x32x32xf32, #tpu.memory_space<vmem>>, vector<1x32x32xf32>
    %157 = vector.shape_cast %156 : vector<1x32x32xf32> to vector<32x32xf32>
    %c1_76 = arith.constant 1 : index
    %c0_77 = arith.constant 0 : index
    %c0_78 = arith.constant 0 : index
    %158 = vector.load %arg8[%c1_76, %c0_77, %c0_78] : memref<2x1x32xf32, #tpu.memory_space<vmem>>, vector<1x1x32xf32>
    %159 = vector.shape_cast %158 : vector<1x1x32xf32> to vector<1x32xf32>
    %c1_79 = arith.constant 1 : index
    %c0_80 = arith.constant 0 : index
    %c0_81 = arith.constant 0 : index
    %160 = vector.load %arg9[%c1_79, %c0_80, %c0_81] : memref<2x32x32xf32, #tpu.memory_space<vmem>>, vector<1x32x32xf32>
    %161 = vector.shape_cast %160 : vector<1x32x32xf32> to vector<32x32xf32>
    %c1_82 = arith.constant 1 : index
    %c0_83 = arith.constant 0 : index
    %c0_84 = arith.constant 0 : index
    %162 = vector.load %arg10[%c1_82, %c0_83, %c0_84] : memref<2x1x32xf32, #tpu.memory_space<vmem>>, vector<1x1x32xf32>
    %163 = vector.shape_cast %162 : vector<1x1x32xf32> to vector<1x32xf32>
    %cst_85 = arith.constant dense<0.000000e+00> : vector<32xf32>
    %164 = vector.multi_reduction <add>, %139, %cst_85 [1] : vector<32x32xf32> to vector<32xf32>
    %165 = vector.shape_cast %164 : vector<32xf32> to vector<32x1xf32>
    %cst_86 = arith.constant 3.200000e+01 : f32
    %166 = vector.broadcast %cst_86 : f32 to vector<32x1xf32>
    %167 = arith.divf %165, %166 : vector<32x1xf32>
    %168 = vector.broadcast %167 : vector<32x1xf32> to vector<32x32xf32>
    %169 = arith.subf %139, %168 : vector<32x32xf32>
    %170 = arith.mulf %169, %169 : vector<32x32xf32>
    %cst_87 = arith.constant dense<0.000000e+00> : vector<32xf32>
    %171 = vector.multi_reduction <add>, %170, %cst_87 [1] : vector<32x32xf32> to vector<32xf32>
    %172 = vector.shape_cast %171 : vector<32xf32> to vector<32x1xf32>
    %cst_88 = arith.constant 3.200000e+01 : f32
    %173 = vector.broadcast %cst_88 : f32 to vector<32x1xf32>
    %174 = arith.divf %172, %173 : vector<32x1xf32>
    %cst_89 = arith.constant 9.99999974E-6 : f32
    %175 = vector.broadcast %cst_89 : f32 to vector<32x1xf32>
    %176 = arith.addf %174, %175 : vector<32x1xf32>
    %177 = math.rsqrt %176 : vector<32x1xf32>
    %178 = vector.broadcast %177 : vector<32x1xf32> to vector<32x32xf32>
    %179 = arith.mulf %169, %178 : vector<32x32xf32>
    %180 = vector.broadcast %145 : vector<1x32xf32> to vector<32x32xf32>
    %181 = arith.mulf %179, %180 : vector<32x32xf32>
    %182 = vector.broadcast %147 : vector<1x32xf32> to vector<32x32xf32>
    %183 = arith.addf %181, %182 : vector<32x32xf32>
    %cst_90 = arith.constant dense<0.000000e+00> : vector<32xf32>
    %184 = vector.multi_reduction <add>, %143, %cst_90 [1] : vector<32x32xf32> to vector<32xf32>
    %185 = vector.shape_cast %184 : vector<32xf32> to vector<32x1xf32>
    %cst_91 = arith.constant 3.200000e+01 : f32
    %186 = vector.broadcast %cst_91 : f32 to vector<32x1xf32>
    %187 = arith.divf %185, %186 : vector<32x1xf32>
    %188 = vector.broadcast %187 : vector<32x1xf32> to vector<32x32xf32>
    %189 = arith.subf %143, %188 : vector<32x32xf32>
    %190 = arith.mulf %189, %189 : vector<32x32xf32>
    %cst_92 = arith.constant dense<0.000000e+00> : vector<32xf32>
    %191 = vector.multi_reduction <add>, %190, %cst_92 [1] : vector<32x32xf32> to vector<32xf32>
    %192 = vector.shape_cast %191 : vector<32xf32> to vector<32x1xf32>
    %cst_93 = arith.constant 3.200000e+01 : f32
    %193 = vector.broadcast %cst_93 : f32 to vector<32x1xf32>
    %194 = arith.divf %192, %193 : vector<32x1xf32>
    %cst_94 = arith.constant 9.99999974E-6 : f32
    %195 = vector.broadcast %cst_94 : f32 to vector<32x1xf32>
    %196 = arith.addf %194, %195 : vector<32x1xf32>
    %197 = math.rsqrt %196 : vector<32x1xf32>
    %198 = vector.broadcast %197 : vector<32x1xf32> to vector<32x32xf32>
    %199 = arith.mulf %189, %198 : vector<32x32xf32>
    %200 = vector.broadcast %145 : vector<1x32xf32> to vector<32x32xf32>
    %201 = arith.mulf %199, %200 : vector<32x32xf32>
    %202 = vector.broadcast %147 : vector<1x32xf32> to vector<32x32xf32>
    %203 = arith.addf %201, %202 : vector<32x32xf32>
    %cst_95 = arith.constant dense<0.000000e+00> : vector<32x64xf32>
    %204 = tpu.matmul %183, %149, %cst_95 {dimension_numbers = #tpu.dot_dimension_numbers<[1], [0], [0], [1], [0, 0, 1, 1], [], []>} : vector<32x32xf32>, vector<32x64xf32>, vector<32x64xf32> -> vector<32x64xf32>
    %205 = vector.broadcast %151 : vector<1x64xf32> to vector<32x64xf32>
    %206 = arith.addf %204, %205 : vector<32x64xf32>
    %cst_96 = arith.constant dense<0.000000e+00> : vector<32x64xf32>
    %207 = tpu.matmul %203, %153, %cst_96 {dimension_numbers = #tpu.dot_dimension_numbers<[1], [0], [0], [1], [0, 0, 1, 1], [], []>} : vector<32x32xf32>, vector<32x64xf32>, vector<32x64xf32> -> vector<32x64xf32>
    %208 = vector.broadcast %155 : vector<1x64xf32> to vector<32x64xf32>
    %209 = arith.addf %207, %208 : vector<32x64xf32>
    %210 = vector.extract_strided_slice %206 {offsets = [0, 0], sizes = [32, 32], strides = [1, 1]} : vector<32x64xf32> to vector<32x32xf32>
    %211 = vector.extract_strided_slice %206 {offsets = [0, 32], sizes = [32, 32], strides = [1, 1]} : vector<32x64xf32> to vector<32x32xf32>
    %212 = vector.extract_strided_slice %209 {offsets = [0, 0], sizes = [32, 32], strides = [1, 1]} : vector<32x64xf32> to vector<32x32xf32>
    %213 = vector.extract_strided_slice %209 {offsets = [0, 32], sizes = [32, 32], strides = [1, 1]} : vector<32x64xf32> to vector<32x32xf32>
    %214 = vector.shape_cast %210 : vector<32x32xf32> to vector<4x8x32xf32>
    %215 = vector.extract_strided_slice %214 {offsets = [0, 0, 0], sizes = [4, 8, 8], strides = [1, 1, 1]} : vector<4x8x32xf32> to vector<4x8x8xf32>
    %216 = vector.extract_strided_slice %214 {offsets = [0, 0, 8], sizes = [4, 8, 8], strides = [1, 1, 1]} : vector<4x8x32xf32> to vector<4x8x8xf32>
    %217 = vector.extract_strided_slice %214 {offsets = [0, 0, 16], sizes = [4, 8, 8], strides = [1, 1, 1]} : vector<4x8x32xf32> to vector<4x8x8xf32>
    %218 = vector.extract_strided_slice %214 {offsets = [0, 0, 24], sizes = [4, 8, 8], strides = [1, 1, 1]} : vector<4x8x32xf32> to vector<4x8x8xf32>
    %219 = tpu.concatenate %215, %216, %217, %218 in 0 : vector<4x8x8xf32>, vector<4x8x8xf32>, vector<4x8x8xf32>, vector<4x8x8xf32> -> vector<16x8x8xf32>
    %220 = vector.shape_cast %212 : vector<32x32xf32> to vector<4x8x32xf32>
    %221 = vector.extract_strided_slice %220 {offsets = [0, 0, 0], sizes = [4, 8, 8], strides = [1, 1, 1]} : vector<4x8x32xf32> to vector<4x8x8xf32>
    %222 = vector.extract_strided_slice %220 {offsets = [0, 0, 8], sizes = [4, 8, 8], strides = [1, 1, 1]} : vector<4x8x32xf32> to vector<4x8x8xf32>
    %223 = vector.extract_strided_slice %220 {offsets = [0, 0, 16], sizes = [4, 8, 8], strides = [1, 1, 1]} : vector<4x8x32xf32> to vector<4x8x8xf32>
    %224 = vector.extract_strided_slice %220 {offsets = [0, 0, 24], sizes = [4, 8, 8], strides = [1, 1, 1]} : vector<4x8x32xf32> to vector<4x8x8xf32>
    %225 = tpu.concatenate %221, %222, %223, %224 in 0 : vector<4x8x8xf32>, vector<4x8x8xf32>, vector<4x8x8xf32>, vector<4x8x8xf32> -> vector<16x8x8xf32>
    %226 = vector.shape_cast %211 : vector<32x32xf32> to vector<4x8x32xf32>
    %227 = vector.extract_strided_slice %226 {offsets = [0, 0, 0], sizes = [4, 8, 8], strides = [1, 1, 1]} : vector<4x8x32xf32> to vector<4x8x8xf32>
    %228 = vector.extract_strided_slice %226 {offsets = [0, 0, 8], sizes = [4, 8, 8], strides = [1, 1, 1]} : vector<4x8x32xf32> to vector<4x8x8xf32>
    %229 = vector.extract_strided_slice %226 {offsets = [0, 0, 16], sizes = [4, 8, 8], strides = [1, 1, 1]} : vector<4x8x32xf32> to vector<4x8x8xf32>
    %230 = vector.extract_strided_slice %226 {offsets = [0, 0, 24], sizes = [4, 8, 8], strides = [1, 1, 1]} : vector<4x8x32xf32> to vector<4x8x8xf32>
    %231 = tpu.concatenate %227, %228, %229, %230 in 0 : vector<4x8x8xf32>, vector<4x8x8xf32>, vector<4x8x8xf32>, vector<4x8x8xf32> -> vector<16x8x8xf32>
    %232 = vector.shape_cast %213 : vector<32x32xf32> to vector<4x8x32xf32>
    %233 = vector.extract_strided_slice %232 {offsets = [0, 0, 0], sizes = [4, 8, 8], strides = [1, 1, 1]} : vector<4x8x32xf32> to vector<4x8x8xf32>
    %234 = vector.extract_strided_slice %232 {offsets = [0, 0, 8], sizes = [4, 8, 8], strides = [1, 1, 1]} : vector<4x8x32xf32> to vector<4x8x8xf32>
    %235 = vector.extract_strided_slice %232 {offsets = [0, 0, 16], sizes = [4, 8, 8], strides = [1, 1, 1]} : vector<4x8x32xf32> to vector<4x8x8xf32>
    %236 = vector.extract_strided_slice %232 {offsets = [0, 0, 24], sizes = [4, 8, 8], strides = [1, 1, 1]} : vector<4x8x32xf32> to vector<4x8x8xf32>
    %237 = tpu.concatenate %233, %234, %235, %236 in 0 : vector<4x8x8xf32>, vector<4x8x8xf32>, vector<4x8x8xf32>, vector<4x8x8xf32> -> vector<16x8x8xf32>
    "tpu.trace_start"() <{level = 10 : i32, message = "bqd,bkd->bqk"}> : () -> ()
    %cst_97 = arith.constant dense<0.000000e+00> : vector<16x8x8xf32>
    %238 = tpu.matmul %219, %225, %cst_97 {dimension_numbers = #tpu.dot_dimension_numbers<[2], [2], [1], [1], [0, 0, 0, 1, 1, 1], [0], [0]>} : vector<16x8x8xf32>, vector<16x8x8xf32>, vector<16x8x8xf32> -> vector<16x8x8xf32>
    "tpu.trace_stop"() : () -> ()
    %cst_98 = arith.constant 1.000000e-01 : f32
    %239 = vector.broadcast %cst_98 : f32 to vector<16x8x8xf32>
    %240 = arith.mulf %238, %239 : vector<16x8x8xf32>
    "tpu.trace_start"() <{level = 10 : i32, message = "bkd,bqd->bkq"}> : () -> ()
    %cst_99 = arith.constant dense<0.000000e+00> : vector<16x8x8xf32>
    %241 = tpu.matmul %225, %219, %cst_99 {dimension_numbers = #tpu.dot_dimension_numbers<[2], [2], [1], [1], [0, 0, 0, 1, 1, 1], [0], [0]>} : vector<16x8x8xf32>, vector<16x8x8xf32>, vector<16x8x8xf32> -> vector<16x8x8xf32>
    "tpu.trace_stop"() : () -> ()
    %cst_100 = arith.constant 1.000000e-01 : f32
    %242 = vector.broadcast %cst_100 : f32 to vector<16x8x8xf32>
    %243 = arith.mulf %241, %242 : vector<16x8x8xf32>
    %cst_101 = arith.constant dense<0xFF800000> : vector<16x8xf32>
    %244 = vector.multi_reduction <maximumf>, %240, %cst_101 [2] : vector<16x8x8xf32> to vector<16x8xf32>
    %245 = vector.shape_cast %244 : vector<16x8xf32> to vector<16x8x1xf32>
    %246 = vector.broadcast %245 : vector<16x8x1xf32> to vector<16x8x8xf32>
    %247 = arith.subf %240, %246 : vector<16x8x8xf32>
    %248 = math.exp %247 : vector<16x8x8xf32>
    %cst_102 = arith.constant dense<0.000000e+00> : vector<16x8xf32>
    %249 = vector.multi_reduction <add>, %248, %cst_102 [2] : vector<16x8x8xf32> to vector<16x8xf32>
    %250 = vector.shape_cast %249 : vector<16x8xf32> to vector<16x8x1xf32>
    %251 = tpu.reciprocal %250 {approx = true} : vector<16x8x1xf32> -> vector<16x8x1xf32>
    %252 = vector.broadcast %251 : vector<16x8x1xf32> to vector<16x8x8xf32>
    %253 = arith.mulf %248, %252 : vector<16x8x8xf32>
    %cst_103 = arith.constant dense<0xFF800000> : vector<16x8xf32>
    %254 = vector.multi_reduction <maximumf>, %243, %cst_103 [2] : vector<16x8x8xf32> to vector<16x8xf32>
    %255 = vector.shape_cast %254 : vector<16x8xf32> to vector<16x8x1xf32>
    %256 = vector.broadcast %255 : vector<16x8x1xf32> to vector<16x8x8xf32>
    %257 = arith.subf %243, %256 : vector<16x8x8xf32>
    %258 = math.exp %257 : vector<16x8x8xf32>
    %cst_104 = arith.constant dense<0.000000e+00> : vector<16x8xf32>
    %259 = vector.multi_reduction <add>, %258, %cst_104 [2] : vector<16x8x8xf32> to vector<16x8xf32>
    %260 = vector.shape_cast %259 : vector<16x8xf32> to vector<16x8x1xf32>
    %261 = tpu.reciprocal %260 {approx = true} : vector<16x8x1xf32> -> vector<16x8x1xf32>
    %262 = vector.broadcast %261 : vector<16x8x1xf32> to vector<16x8x8xf32>
    %263 = arith.mulf %258, %262 : vector<16x8x8xf32>
    "tpu.trace_start"() <{level = 10 : i32, message = "bqk,bkd->bqd"}> : () -> ()
    %cst_105 = arith.constant dense<0.000000e+00> : vector<16x8x8xf32>
    %264 = tpu.matmul %253, %237, %cst_105 {dimension_numbers = #tpu.dot_dimension_numbers<[2], [1], [1], [2], [0, 0, 0, 1, 1, 2], [0], [0]>} : vector<16x8x8xf32>, vector<16x8x8xf32>, vector<16x8x8xf32> -> vector<16x8x8xf32>
    "tpu.trace_stop"() : () -> ()
    "tpu.trace_start"() <{level = 10 : i32, message = "bkq,bqd->bkd"}> : () -> ()
    %cst_106 = arith.constant dense<0.000000e+00> : vector<16x8x8xf32>
    %265 = tpu.matmul %263, %231, %cst_106 {dimension_numbers = #tpu.dot_dimension_numbers<[2], [1], [1], [2], [0, 0, 0, 1, 1, 2], [0], [0]>} : vector<16x8x8xf32>, vector<16x8x8xf32>, vector<16x8x8xf32> -> vector<16x8x8xf32>
    "tpu.trace_stop"() : () -> ()
    %266 = vector.extract_strided_slice %264 {offsets = [0, 0, 0], sizes = [4, 8, 8], strides = [1, 1, 1]} : vector<16x8x8xf32> to vector<4x8x8xf32>
    %267 = vector.extract_strided_slice %264 {offsets = [4, 0, 0], sizes = [4, 8, 8], strides = [1, 1, 1]} : vector<16x8x8xf32> to vector<4x8x8xf32>
    %268 = vector.extract_strided_slice %264 {offsets = [8, 0, 0], sizes = [4, 8, 8], strides = [1, 1, 1]} : vector<16x8x8xf32> to vector<4x8x8xf32>
    %269 = vector.extract_strided_slice %264 {offsets = [12, 0, 0], sizes = [4, 8, 8], strides = [1, 1, 1]} : vector<16x8x8xf32> to vector<4x8x8xf32>
    %270 = tpu.concatenate %266, %267, %268, %269 in 2 : vector<4x8x8xf32>, vector<4x8x8xf32>, vector<4x8x8xf32>, vector<4x8x8xf32> -> vector<4x8x32xf32>
    %271 = vector.shape_cast %270 : vector<4x8x32xf32> to vector<32x32xf32>
    %272 = vector.extract_strided_slice %265 {offsets = [0, 0, 0], sizes = [4, 8, 8], strides = [1, 1, 1]} : vector<16x8x8xf32> to vector<4x8x8xf32>
    %273 = vector.extract_strided_slice %265 {offsets = [4, 0, 0], sizes = [4, 8, 8], strides = [1, 1, 1]} : vector<16x8x8xf32> to vector<4x8x8xf32>
    %274 = vector.extract_strided_slice %265 {offsets = [8, 0, 0], sizes = [4, 8, 8], strides = [1, 1, 1]} : vector<16x8x8xf32> to vector<4x8x8xf32>
    %275 = vector.extract_strided_slice %265 {offsets = [12, 0, 0], sizes = [4, 8, 8], strides = [1, 1, 1]} : vector<16x8x8xf32> to vector<4x8x8xf32>
    %276 = tpu.concatenate %272, %273, %274, %275 in 2 : vector<4x8x8xf32>, vector<4x8x8xf32>, vector<4x8x8xf32>, vector<4x8x8xf32> -> vector<4x8x32xf32>
    %277 = vector.shape_cast %276 : vector<4x8x32xf32> to vector<32x32xf32>
    %cst_107 = arith.constant dense<0.000000e+00> : vector<32x32xf32>
    %278 = tpu.matmul %271, %157, %cst_107 {dimension_numbers = #tpu.dot_dimension_numbers<[1], [0], [0], [1], [0, 0, 1, 1], [], []>} : vector<32x32xf32>, vector<32x32xf32>, vector<32x32xf32> -> vector<32x32xf32>
    %279 = arith.addf %139, %278 : vector<32x32xf32>
    %280 = vector.broadcast %159 : vector<1x32xf32> to vector<32x32xf32>
    %281 = arith.addf %279, %280 : vector<32x32xf32>
    %cst_108 = arith.constant dense<0.000000e+00> : vector<32x32xf32>
    %282 = tpu.matmul %277, %161, %cst_108 {dimension_numbers = #tpu.dot_dimension_numbers<[1], [0], [0], [1], [0, 0, 1, 1], [], []>} : vector<32x32xf32>, vector<32x32xf32>, vector<32x32xf32> -> vector<32x32xf32>
    %283 = arith.addf %143, %282 : vector<32x32xf32>
    %284 = vector.broadcast %163 : vector<1x32xf32> to vector<32x32xf32>
    %285 = arith.addf %283, %284 : vector<32x32xf32>
    %c0_109 = arith.constant 0 : index
    %c0_110 = arith.constant 0 : index
    %286 = vector.load %arg13[%c0_109, %c0_110] : memref<32x32xf32, #tpu.memory_space<vmem>>, vector<32x32xf32>
    tpu.vector_store %arg13[%c0_109, %c0_110], %281 {strides = array<i32>} : memref<32x32xf32, #tpu.memory_space<vmem>>, vector<32x32xf32>,
    %c0_111 = arith.constant 0 : index
    %c0_112 = arith.constant 0 : index
    %287 = vector.load %arg14[%c0_111, %c0_112] : memref<32x32xf32, #tpu.memory_space<vmem>>, vector<32x32xf32>
    tpu.vector_store %arg14[%c0_111, %c0_112], %285 {strides = array<i32>} : memref<32x32xf32, #tpu.memory_space<vmem>>, vector<32x32xf32>,
    return
  }
  func.func @transform_0(%arg0: i32) -> (i32, i32) {
    %c0_i32 = arith.constant 0 : i32
    %c0_i32_0 = arith.constant 0 : i32
    return %arg0, %c0_i32 : i32, i32
  }
  func.func @transform_1(%arg0: i32) -> (i32, i32) {
    %c0_i32 = arith.constant 0 : i32
    %c0_i32_0 = arith.constant 0 : i32
    return %arg0, %c0_i32 : i32, i32
  }
  func.func @transform_2(%arg0: i32) -> (i32, i32, i32) {
    %c0_i32 = arith.constant 0 : i32
    %c0_i32_0 = arith.constant 0 : i32
    %c0_i32_1 = arith.constant 0 : i32
    %c0_i32_2 = arith.constant 0 : i32
    return %c0_i32, %c0_i32_0, %c0_i32_1 : i32, i32, i32
  }
  func.func @transform_3(%arg0: i32) -> (i32, i32, i32) {
    %c0_i32 = arith.constant 0 : i32
    %c0_i32_0 = arith.constant 0 : i32
    %c0_i32_1 = arith.constant 0 : i32
    %c0_i32_2 = arith.constant 0 : i32
    return %c0_i32, %c0_i32_0, %c0_i32_1 : i32, i32, i32
  }
  func.func @transform_4(%arg0: i32) -> (i32, i32, i32) {
    %c0_i32 = arith.constant 0 : i32
    %c0_i32_0 = arith.constant 0 : i32
    %c0_i32_1 = arith.constant 0 : i32
    %c0_i32_2 = arith.constant 0 : i32
    return %c0_i32, %c0_i32_0, %c0_i32_1 : i32, i32, i32
  }
  func.func @transform_5(%arg0: i32) -> (i32, i32, i32) {
    %c0_i32 = arith.constant 0 : i32
    %c0_i32_0 = arith.constant 0 : i32
    %c0_i32_1 = arith.constant 0 : i32
    %c0_i32_2 = arith.constant 0 : i32
    return %c0_i32, %c0_i32_0, %c0_i32_1 : i32, i32, i32
  }
  func.func @transform_6(%arg0: i32) -> (i32, i32, i32) {
    %c0_i32 = arith.constant 0 : i32
    %c0_i32_0 = arith.constant 0 : i32
    %c0_i32_1 = arith.constant 0 : i32
    %c0_i32_2 = arith.constant 0 : i32
    return %c0_i32, %c0_i32_0, %c0_i32_1 : i32, i32, i32
  }
  func.func @transform_7(%arg0: i32) -> (i32, i32, i32) {
    %c0_i32 = arith.constant 0 : i32
    %c0_i32_0 = arith.constant 0 : i32
    %c0_i32_1 = arith.constant 0 : i32
    %c0_i32_2 = arith.constant 0 : i32
    return %c0_i32, %c0_i32_0, %c0_i32_1 : i32, i32, i32
  }
  func.func @transform_8(%arg0: i32) -> (i32, i32, i32) {
    %c0_i32 = arith.constant 0 : i32
    %c0_i32_0 = arith.constant 0 : i32
    %c0_i32_1 = arith.constant 0 : i32
    %c0_i32_2 = arith.constant 0 : i32
    return %c0_i32, %c0_i32_0, %c0_i32_1 : i32, i32, i32
  }
  func.func @transform_9(%arg0: i32) -> (i32, i32, i32) {
    %c0_i32 = arith.constant 0 : i32
    %c0_i32_0 = arith.constant 0 : i32
    %c0_i32_1 = arith.constant 0 : i32
    %c0_i32_2 = arith.constant 0 : i32
    return %c0_i32, %c0_i32_0, %c0_i32_1 : i32, i32, i32
  }
  func.func @transform_10(%arg0: i32) -> (i32, i32, i32) {
    %c0_i32 = arith.constant 0 : i32
    %c0_i32_0 = arith.constant 0 : i32
    %c0_i32_1 = arith.constant 0 : i32
    %c0_i32_2 = arith.constant 0 : i32
    return %c0_i32, %c0_i32_0, %c0_i32_1 : i32, i32, i32
  }
  func.func @transform_11(%arg0: i32) -> (i32, i32, i32) {
    %c0_i32 = arith.constant 0 : i32
    %c0_i32_0 = arith.constant 0 : i32
    %c0_i32_1 = arith.constant 0 : i32
    %c0_i32_2 = arith.constant 0 : i32
    return %c0_i32, %c0_i32_0, %c0_i32_1 : i32, i32, i32
  }
  func.func @transform_12(%arg0: i32) -> (i32, i32) {
    %c0_i32 = arith.constant 0 : i32
    %c0_i32_0 = arith.constant 0 : i32
    return %arg0, %c0_i32 : i32, i32
  }
  func.func @transform_13(%arg0: i32) -> (i32, i32) {
    %c0_i32 = arith.constant 0 : i32
    %c0_i32_0 = arith.constant 0 : i32
    return %arg0, %c0_i32 : i32, i32
  }
}

</mosaic_0001>

<bundles_post_ra>
// kernel: tpu_custom_call.1
= control target key start
LH: loop header
LB: loop body
LE: loop exit
PB: predicated region body
PF: predicated region fallthrough
CT: control target
= control target key end

     0   :  { %19 = vsyncpa [#allocation3], 0  ;;  %s8577_s0 = inlined_call_operand.vmem [shape: f32[64,32], index: 0, kind: input, shape index: {}]   ;;  %s8578_s1 = inlined_call_operand.vmem [shape: f32[64,32], index: 1, kind: input, shape index: {}]   ;;  %s8579_s2 = inlined_call_operand.vmem [shape: f32[2,32,64], index: 2, kind: input, shape index: {}]   ;;  %s8580_s3 = inlined_call_operand.vmem [shape: f32[2,1,64], index: 3, kind: input, shape index: {}]   ;;  %s8581_s4 = inlined_call_operand.vmem [shape: f32[2,32,64], index: 4, kind: input, shape index: {}]   ;;  %s8582_s5 = inlined_call_operand.vmem [shape: f32[2,1,64], index: 5, kind: input, shape index: {}]   ;;  %s8583_s6 = inlined_call_operand.hbm [shape: f32[2,32,32], index: 6, kind: input, shape index: {}]   ;;  %s8584_s7 = inlined_call_operand.vmem [shape: f32[2,1,32], index: 7, kind: input, shape index: {}]   ;;  %s8585_s8 = inlined_call_operand.hbm [shape: f32[2,32,32], index: 8, kind: input, shape index: {}]   ;;  %s8586_s9 = inlined_call_operand.vmem [shape: f32[2,1,32], index: 9, kind: input, shape index: {}]   ;;  %s8587_s10 = inlined_call_operand.vmem [shape: f32[2,1,32], index: 10, kind: input, shape index: {}]   ;;  %s8588_s11 = inlined_call_operand.vmem [shape: f32[2,1,32], index: 11, kind: input, shape index: {}]   ;;  %s8589_s12 = inlined_call_operand.vmem [shape: f32[64,32], index: 12, kind: output, shape index: {0}]   ;;  %s8590_s13 = inlined_call_operand.vmem [shape: f32[64,32], index: 13, kind: output, shape index: {1}]  }
   0x1   :  { %20 = vsyncpa [#allocation5], 0  ;;  %s6605_s25 = smov 0  }
   0x2 LB: > { %s368_s28 = sshll.u32 %s8583_s6, 4  ;;  %s5691_s29 = sadd.s32 4294967295, %s6521_s25   ;;  %s6521_s25 = sphi %s6605_s25, %s26_s25   ;;  %s369_s28 = int_to_ptr.hbm [resolvable:$true] %s368_s28 }
   0x3   : > { %p5693_p0 = scmp.ge.s32.totalorder %s6521_s25, 1  ;;  %p345_p1 = scmp.lt.s32.totalorder %s6521_s25, 3 }
   0x4   : > { %p6616_p2 = scmp.eq.s32.totalorder %s5691_s29, 0  ;;  %s6523_s15 = smov [#allocation2]  }
   0x5   : > { %p6620_p3 = pnand %p5693_p0, %p345_p1  ;;  %s370_s16 = sshll.u32 %s6523_s15, 4  ;;  %s371_s16 = int_to_ptr.vmem [resolvable:$true] %s370_s16 }
   0x6   : > { %s385_s19 = sshll.u32 %s8585_s8, 4  ;;  %s6524_s20 = smov [#allocation4]   ;;  %s386_s19 = int_to_ptr.hbm [resolvable:$true] %s385_s19 }
   0x7   : > { %p5956_p4 = pneg %p6620_p3  ;;  %s387_s21 = sshll.u32 %s6524_s20, 4  ;;  %s388_s21 = int_to_ptr.vmem [resolvable:$true] %s387_s21 }
   0x8   : > { %s6525_s22 = smov 128   ;;  %s6526_s23 = smov 8  }
   0x9   : > { %p5957_p5 = pnand %p6616_p2, %p5956_p4  ;;  %430 = sbr.rel (%p6620_p3) target bundleno = 3071 (0xbff), region = 68 }
   0xb   : > { %5959 = dma.hbm_to_vmem [thread:$0]  (!%p5957_p5), %s369_s28, 1024, %s371_s16, [#allocation3], %s6525_s22, %s6525_s22, %s6526_s23  }
   0xc   : > { %5962 = dma.hbm_to_vmem [thread:$0]  (!%p5957_p5), %s386_s19, 1024, %s388_s21, [#allocation5], %s6525_s22, %s6525_s22, %s6526_s23  }
   0xe   : > { %6512 = dma.done.wait (%p6616_p2), [#allocation3], 1024  }
   0xf   : > { %6514 = vsyncadd (%p6616_p2), [#allocation3], 4294966272 }
  0x10   : > { %6516 = dma.done.wait (%p6616_p2), [#allocation5], 1024  }
  0x11   : > { %6518 = vsyncadd (%p6616_p2), [#allocation5], 4294966272  ;;  %s5700_s24 = sshll.u32 %s5691_s29, 2  ;;  %vm544_vm0 = vcmask 261120   ;;  %v6527_v16 = vmov 32.0   ;;  %v532_v63 = vld [vmem:[%s8581_s4 + $0x18] sm:$0xff] }
  0x12   : > { %p491_p6 = scmp.lt.s32.totalorder %s5700_s24, 7  ;;  %6149 = vrcp.f32 %v6527_v16  ;;  %821 = vmatpush.msra.mxu1 %v532_v63  ;;  %v6794_v63 = vld [vmem:[%s8588_s11] ss:$0 sm:$0xff]  ;;  %s6528_s27 = smov 120  }
  0x13   : > { %s6529_s28 = smov 104   ;;  %s6530_s16 = smov 112  }
  0x14   : > { %s8618_s24 = smov (!%p491_p6, %s5700_s24), 7  ;;  %s6531_s17 = smov 96  }
  0x15   : > { %s6641_s26 = sshll.u32 %s8618_s24, 3  ;;  %s6532_s18 = smov 8  }
  0x16   : > { %s6647_s14 = scalar_lea.vmem %s8578_s1, %s6641_s26  ;;  %s6656_s15 = scalar_lea.vmem %s8577_s0, %s6641_s26 }
  0x17   : > { %v520_v0 = vld [vmem:[%s6647_s14 + $0x10] sm:$0xff]  ;;  %v519_v1 = vld [vmem:[%s6647_s14 + $0x8] sm:$0xff]  ;;  %v518_v2 = vld [vmem:[%s6647_s14] sm:$0xff]  ;;  %s6533_s19 = smov 16   ;;  %s6534_s20 = smov 24  }
  0x18   : > { %v660_v3 = vsel %vm544_vm0, %v520_v0, 0.0  ;;  %v657_v4 = vsel %vm544_vm0, %v519_v1, 0.0  ;;  %v654_v5 = vsel %vm544_vm0, %v518_v2, 0.0  ;;  %v516_v6 = vld [vmem:[%s6656_s15 + $0x10] sm:$0xff]  ;;  %v515_v7 = vld [vmem:[%s6656_s15 + $0x8] sm:$0xff]  ;;  %v514_v8 = vld [vmem:[%s6656_s15] sm:$0xff]  ;;  %v6150_v17 = vpop.eup %6149  ;;  %s512_s30 = scalar_lea.vmem %s8590_s13, %s6641_s26 }
  0x19   : > { %661 = vadd.xlane.f32.xlu2 %v660_v3  ;;  %658 = vadd.xlane.f32.xlu1 %v657_v4  ;;  %v551_v9 = vsel %vm544_vm0, %v516_v6, 0.0  ;;  %v548_v10 = vsel %vm544_vm0, %v515_v7, 0.0  ;;  %v545_v11 = vsel %vm544_vm0, %v514_v8, 0.0  ;;  %v517_v12 = vld [vmem:[%s6656_s15 + $0x18] sm:$0xff]  ;;  %v558_v18 = vmul.f32 32.0, %v6150_v17 }
  0x1a   : > { %655 = vadd.xlane.f32.xlu0 %v654_v5  ;;  %v521_v13 = vld [vmem:[%s6647_s14 + $0x18] sm:$0xff]  ;;  %v554_v14 = vsel %vm544_vm0, %v517_v12, 0.0  ;;  %vm562_vm1 = vweird.f32 %v6150_v17 }
  0x1b   : > { %v663_v15 = vsel %vm544_vm0, %v521_v13, 0.0  ;;  %v559_v19 = vsub.f32 1.0, %v558_v18  ;;  %v527_v3 = vld [vmem:[%s8579_s2 + $0x18] sm:$0xff] }
  0x1c   : > { %777 = vmatpush.msra.mxu0 %v527_v3 }
  0x1d   : > { %v560_v20 = vmul.f32 %v6150_v17, %v559_v19 }
  0x1f   : > { %v561_v21 = vadd.f32 %v6150_v17, %v560_v20 }
  0x21   : > { %552 = vadd.xlane.f32.xlu2 %v551_v9  ;;  %549 = vadd.xlane.f32.xlu1 %v548_v10  ;;  %v6671_v22 = vsel %vm562_vm1, %v6150_v17, %v561_v21  ;;  %v525_v10 = vld [vmem:[%s8579_s2 + $0x8] sm:$0xff] }
  0x22   : > { %546 = vadd.xlane.f32.xlu0 %v545_v11  ;;  %8598 = vst [vmem:[#allocation8_spill] sm:$0xff] %v6671_v22 }
  0x29   : > { %555 = vadd.xlane.f32.xlu1 %v554_v14 }
  0x2a   : > { %664 = vadd.xlane.f32.xlu0 %v663_v15 }
  0x8c   : > { %v662_v23 = vpop.xlane.xlu2 %661  ;;  %v659_v24 = vpop.xlane.xlu1 %658 }
  0x8d   : > { %v667_v25 = vmul.f32 %v659_v24, %v6671_v22  ;;  %v656_v26 = vpop.xlane.xlu0 %655  ;;  %v668_v39 = vmul.f32 %v662_v23, %v6671_v22 }
  0x8e   : > { %v666_v27 = vmul.f32 %v656_v26, %v6671_v22 }
  0x8f   : > { %v6675_v28 = vsub.f32 %v519_v1, %v667_v25  ;;  %v6699_v46 = vsub.f32 %v520_v0, %v668_v39  ;;  %v531_v0 = vld [vmem:[%s8581_s4 + $0x10] sm:$0xff]  ;;  %v530_v1 = vld [vmem:[%s8581_s4 + $0x8] sm:$0xff] }
  0x90   : > { %v6677_v29 = vsub.f32 %v518_v2, %v666_v27  ;;  %822 = vmatpush.msra.mxu1 %v531_v0  ;;  %v529_v2 = vld [vmem:[%s8581_s4] sm:$0xff] }
  0x91   : > { %v675_v30 = vmul.f32 %v6675_v28, %v6675_v28  ;;  %v676_v55 = vmul.f32 %v6699_v46, %v6699_v46 }
  0x92   : > { %v674_v31 = vmul.f32 %v6677_v29, %v6677_v29  ;;  %823 = vmatpush.msra.mxu1 %v530_v1 }
  0x93   : > { %v681_v32 = vsel %vm544_vm0, %v675_v30, 0.0  ;;  %v684_v58 = vsel %vm544_vm0, %v676_v55, 0.0 }
  0x94   : > { %v678_v33 = vsel %vm544_vm0, %v674_v31, 0.0  ;;  %v553_v34 = vpop.xlane.xlu2 %552  ;;  %682 = vadd.xlane.f32.xlu1 %v681_v32  ;;  %v550_v35 = vpop.xlane.xlu1 %549  ;;  %824 = vmatpush.msra.mxu1 %v529_v2 }
  0x95   : > { %679 = vadd.xlane.f32.xlu2 %v678_v33  ;;  %v566_v36 = vmul.f32 %v6671_v22, %v553_v34  ;;  %v565_v37 = vmul.f32 %v6671_v22, %v550_v35  ;;  %v547_v38 = vpop.xlane.xlu0 %546 }
  0x96   : > { %v564_v40 = vmul.f32 %v6671_v22, %v547_v38 }
  0x97   : > { %v6689_v41 = vsub.f32 %v516_v6, %v566_v36  ;;  %v6691_v42 = vsub.f32 %v515_v7, %v565_v37  ;;  %v526_v7 = vld [vmem:[%s8579_s2 + $0x10] sm:$0xff] }
  0x98   : > { %v6693_v43 = vsub.f32 %v514_v8, %v564_v40  ;;  %778 = vmatpush.msra.mxu0 %v526_v7 }
  0x99   : > { %v574_v44 = vmul.f32 %v6689_v41, %v6689_v41  ;;  %v573_v45 = vmul.f32 %v6691_v42, %v6691_v42 }
  0x9a   : > { %v572_v47 = vmul.f32 %v6693_v43, %v6693_v43  ;;  %779 = vmatpush.msra.mxu0 %v525_v10 }
  0x9b   : > { %v582_v48 = vsel %vm544_vm0, %v574_v44, 0.0  ;;  %v579_v49 = vsel %vm544_vm0, %v573_v45, 0.0 }
  0x9c   : > { %583 = vadd.xlane.f32.xlu1 %v582_v48  ;;  %v576_v50 = vsel %vm544_vm0, %v572_v47, 0.0  ;;  %v556_v51 = vpop.xlane.xlu1 %555 }
  0x9d   : > { %580 = vadd.xlane.f32.xlu2 %v579_v49  ;;  %577 = vadd.xlane.f32.xlu0 %v576_v50  ;;  %v665_v52 = vpop.xlane.xlu0 %664  ;;  %v567_v54 = vmul.f32 %v6671_v22, %v556_v51 }
  0x9e   : > { %v669_v53 = vmul.f32 %v665_v52, %v6671_v22 }
  0x9f   : > { %v6712_v57 = vsub.f32 %v517_v12, %v567_v54  ;;  %v524_v12 = vld [vmem:[%s8579_s2] sm:$0xff] }
  0xa0   : > { %v6710_v56 = vsub.f32 %v521_v13, %v669_v53  ;;  %780 = vmatpush.msra.mxu0 %v524_v12  ;;  %v6783_v54 = vld [vmem:[%s8587_s10] ss:$0 sm:$0xff] }
  0xa1   : > { %v575_v61 = vmul.f32 %v6712_v57, %v6712_v57 }
  0xa2   : > { %v677_v59 = vmul.f32 %v6710_v56, %v6710_v56 }
  0xa3   : > { %v585_v62 = vsel %vm544_vm0, %v575_v61, 0.0 }
  0xa4   : > { %v687_v60 = vsel %vm544_vm0, %v677_v59, 0.0 }
  0xa5   : > { %685 = vadd.xlane.f32.xlu0 %v684_v58  ;;  %688 = vadd.xlane.f32.xlu2 %v687_v60 }
  0xad   : > { %586 = vadd.xlane.f32.xlu0 %v585_v62 }
 0x107   : > { %v683_v4 = vpop.xlane.xlu1 %682 }
 0x108   : > { %v680_v5 = vpop.xlane.xlu2 %679  ;;  %v691_v6 = vmul.f32 %v683_v4, %v6671_v22 }
 0x109   : > { %v690_v8 = vmul.f32 %v680_v5, %v6671_v22 }
 0x10a   : > { %v695_v9 = vadd.f32 1e-05, %v691_v6 }
 0x10b   : > { %v694_v11 = vadd.f32 1e-05, %v690_v8 }
 0x10c   : > { %6151 = vrsqrt.f32 %v695_v9  ;;  %vm714_vm4 = vweird.f32 %v695_v9 }
 0x10d   : > { %6153 = vrsqrt.f32 %v694_v11  ;;  %vm704_vm2 = vweird.f32 %v694_v11 }
 0x10f   : > { %v584_v13 = vpop.xlane.xlu1 %583 }
 0x110   : > { %v581_v14 = vpop.xlane.xlu2 %580  ;;  %v590_v15 = vmul.f32 %v584_v13, %v6671_v22  ;;  %v578_v16 = vpop.xlane.xlu0 %577 }
 0x111   : > { %v589_v17 = vmul.f32 %v581_v14, %v6671_v22  ;;  %v588_v18 = vmul.f32 %v578_v16, %v6671_v22 }
 0x112   : > { %v6750_v19 = vpop.eup %6151  ;;  %v6752_v20 = vadd.f32 1e-05, %v590_v15 }
 0x113   : > { %v6154_v21 = vpop.eup %6153  ;;  %v709_v23 = vmul.f32 %v6750_v19, %v695_v9  ;;  %v6755_v24 = vadd.f32 1e-05, %v589_v17  ;;  %v6757_v25 = vadd.f32 1e-05, %v588_v18  ;;  %vm715_vm5 = vweird.f32 %v6750_v19 }
 0x114   : > { %v699_v26 = vmul.f32 %v6154_v21, %v694_v11  ;;  %6155 = vrsqrt.f32 %v6752_v20  ;;  %vm705_vm3 = vweird.f32 %v6154_v21  ;;  %vm6786_vm7 = vmor %vm714_vm4, %vm715_vm5  ;;  %vm622_vm1 = vweird.f32 %v6752_v20 }
 0x115   : > { %v710_v27 = vmul.f32 %v6750_v19, %v709_v23  ;;  %6157 = vrsqrt.f32 %v6755_v24  ;;  %vm706_vm6 = vmor %vm704_vm2, %vm705_vm3  ;;  %vm612_vm8 = vweird.f32 %v6755_v24  ;;  %vm602_vm9 = vweird.f32 %v6757_v25 }
 0x116   : > { %v700_v30 = vmul.f32 %v6154_v21, %v699_v26  ;;  %6159 = vrsqrt.f32 %v6757_v25 }
 0x117   : > { %v711_v31 = vmul.f32 0.5, %v710_v27 }
 0x118   : > { %v701_v32 = vmul.f32 0.5, %v700_v30  ;;  %v689_v33 = vpop.xlane.xlu2 %688  ;;  %v686_v34 = vpop.xlane.xlu0 %685 }
 0x119   : > { %v712_v35 = vsub.f32 1.5, %v711_v31  ;;  %v693_v36 = vmul.f32 %v689_v33, %v6671_v22  ;;  %v692_v37 = vmul.f32 %v686_v34, %v6671_v22 }
 0x11a   : > { %v6765_v38 = vpop.eup %6155  ;;  %v702_v39 = vsub.f32 1.5, %v701_v32 }
 0x11b   : > { %v6767_v40 = vpop.eup %6157  ;;  %v6769_v44 = vadd.f32 1e-05, %v693_v36  ;;  %v617_v49 = vmul.f32 %v6765_v38, %v6752_v20  ;;  %v696_v50 = vadd.f32 1e-05, %v692_v37  ;;  %v713_v51 = vmul.f32 %v6750_v19, %v712_v35 }
 0x11c   : > { %v6160_v45 = vpop.eup %6159  ;;  %v703_v47 = vmul.f32 %v6154_v21, %v702_v39  ;;  %v607_v48 = vmul.f32 %v6767_v40, %v6755_v24  ;;  %vm613_vm10 = vweird.f32 %v6767_v40  ;;  %vm623_vm2 = vweird.f32 %v6765_v38 }
 0x11d   : > { %v597_v52 = vmul.f32 %v6160_v45, %v6757_v25  ;;  %6161 = vrsqrt.f32 %v6769_v44  ;;  %v618_v61 = vmul.f32 %v6765_v38, %v617_v49  ;;  %v717_v3 = vsel %vm6786_vm7, %v6750_v19, %v713_v51  ;;  %vm6820_vm13 = vmor %vm612_vm8, %vm613_vm10 }
 0x11e   : > { %v608_v53 = vmul.f32 %v6767_v40, %v607_v48  ;;  %6163 = vrsqrt.f32 %v696_v50  ;;  %v707_v58 = vsel %vm706_vm6, %v6154_v21, %v703_v47  ;;  %vm603_vm11 = vweird.f32 %v6160_v45  ;;  %vm6843_vm6 = vmor %vm622_vm1, %vm623_vm2 }
 0x11f   : > { %v598_v55 = vmul.f32 %v6160_v45, %v597_v52  ;;  %v738_v0 = vmul.f32 %v707_v58, %v6677_v29  ;;  %v619_v9 = vmul.f32 0.5, %v618_v61  ;;  %v739_v12 = vmul.f32 %v717_v3, %v6675_v28  ;;  %vm604_vm12 = vmor %vm602_vm9, %vm603_vm11  ;;  %v6139_v3 = vld [vmem:[%s8582_s5] ss:$0 sm:$0xff] }
 0x120   : > { %v609_v60 = vmul.f32 0.5, %v608_v53  ;;  %v587_v62 = vpop.xlane.xlu0 %586  ;;  %vm724_vm14 = vweird.f32 %v696_v50  ;;  %vm734_vm3 = vweird.f32 %v6769_v44  ;;  %vm894_vm11 = vcmask 64512  }
 0x121   : > { %v599_v1 = vmul.f32 0.5, %v598_v55  ;;  %v591_v2 = vmul.f32 %v587_v62, %v6671_v22  ;;  %v742_v5 = vmul.f32 %v6783_v54, %v738_v0  ;;  %v743_v23 = vmul.f32 %v6783_v54, %v739_v12 }
 0x122   : > { %v610_v4 = vsub.f32 1.5, %v609_v60  ;;  %v620_v25 = vsub.f32 1.5, %v619_v9 }
 0x123   : > { %v6804_v6 = vpop.eup %6161  ;;  %v600_v7 = vsub.f32 1.5, %v599_v1  ;;  %v595_v29 = vadd.f32 1e-05, %v591_v2  ;;  %v746_v11 = vadd.f32 %v6794_v63, %v742_v5  ;;  %v747_v20 = vadd.f32 %v6794_v63, %v743_v23 }
 0x124   : > { %v6164_v8 = vpop.eup %6163  ;;  %v729_v10 = vmul.f32 %v6804_v6, %v6769_v44  ;;  %v611_v13 = vmul.f32 %v6767_v40, %v610_v4  ;;  %vm735_vm4 = vweird.f32 %v6804_v6  ;;  %v621_v36 = vmul.f32 %v6765_v38, %v620_v25 }
 0x125   : > { %v601_v14 = vmul.f32 %v6160_v45, %v600_v7  ;;  %v719_v15 = vmul.f32 %v6164_v8, %v696_v50  ;;  %6165 = vrsqrt.f32 %v595_v29  ;;  %5712 = vmatmul.msk.f32.vlgmr.msra.gmra.mxu1 %vm544_vm0, %v746_v11  ;;  %vm725_vm15 = vweird.f32 %v6164_v8  ;;  %vm6848_vm7 = vmor %vm734_vm3, %vm735_vm4 }
 0x126   : > { %v730_v16 = vmul.f32 %v6804_v6, %v729_v10  ;;  %v615_v27 = vsel %vm6820_vm13, %v6767_v40, %v611_v13  ;;  %vm6835_vm5 = vmor %vm724_vm14, %vm725_vm15  ;;  %v625_v50 = vsel %vm6843_vm6, %v6765_v38, %v621_v36  ;;  %vm632_vm8 = vweird.f32 %v595_v29 }
 0x127   : > { %v720_v17 = vmul.f32 %v6164_v8, %v719_v15  ;;  %v605_v18 = vsel %vm604_vm12, %v6160_v45, %v601_v14  ;;  %v637_v35 = vmul.f32 %v615_v27, %v6691_v42  ;;  %v638_v59 = vmul.f32 %v625_v50, %v6689_v41 }
 0x128   : > { %v731_v19 = vmul.f32 0.5, %v730_v16  ;;  %v636_v21 = vmul.f32 %v605_v18, %v6693_v43  ;;  %vm2867_vm12 = vcmask 130048   ;;  %vm2872_vm13 = vcmask 195584  }
 0x129   : > { %v721_v26 = vmul.f32 0.5, %v720_v17  ;;  %v644_v48 = vmul.f32 %v6783_v54, %v637_v35  ;;  %v645_v38 = vmul.f32 %v6783_v54, %v638_v59 }
 0x12a   : > { %v732_v24 = vsub.f32 1.5, %v731_v19  ;;  %v643_v30 = vmul.f32 %v6783_v54, %v636_v21 }
 0x12b   : > { %v6166_v31 = vpop.eup %6165  ;;  %v722_v43 = vsub.f32 1.5, %v721_v26  ;;  %v651_v55 = vadd.f32 %v6794_v63, %v644_v48  ;;  %v652_v0 = vadd.f32 %v6794_v63, %v645_v38 }
 0x12c   : > { %v627_v33 = vmul.f32 %v6166_v31, %v595_v29  ;;  %v650_v34 = vadd.f32 %v6794_v63, %v643_v30  ;;  %v733_v39 = vmul.f32 %v6804_v6, %v732_v24  ;;  %vm633_vm9 = vweird.f32 %v6166_v31 }
 0x12d   : > { %v723_v40 = vmul.f32 %v6164_v8, %v722_v43  ;;  %5713 = vmatmul.msk.f32.gmra.mxu1 %vm544_vm0, %v747_v20  ;;  %vm634_vm10 = vmor %vm632_vm8, %vm633_vm9 }
 0x12e   : > { %v628_v45 = vmul.f32 %v6166_v31, %v627_v33  ;;  %5708 = vmatmul.msk.f32.vlgmr.msra.gmra.mxu0 %vm544_vm0, %v650_v34  ;;  %v737_v51 = vsel %vm6848_vm7, %v6804_v6, %v733_v39 }
 0x12f   : > { %v727_v42 = vsel %vm6835_vm5, %v6164_v8, %v723_v40 }
 0x130   : > { %v629_v47 = vmul.f32 0.5, %v628_v45  ;;  %v740_v49 = vmul.f32 %v727_v42, %v6699_v46  ;;  %v741_v46 = vmul.f32 %v737_v51, %v6710_v56 }
 0x132   : > { %v630_v52 = vsub.f32 1.5, %v629_v47  ;;  %v744_v53 = vmul.f32 %v6783_v54, %v740_v49  ;;  %v745_v61 = vmul.f32 %v6783_v54, %v741_v46 }
 0x134   : > { %v748_v58 = vadd.f32 %v6794_v63, %v744_v53  ;;  %v631_v60 = vmul.f32 %v6166_v31, %v630_v52  ;;  %v749_v1 = vadd.f32 %v6794_v63, %v745_v61 }
 0x136   : > { %5709 = vmatmul.msk.f32.gmra.mxu0 %vm544_vm0, %v651_v55  ;;  %5714 = vmatmul.msk.f32.gmra.mxu1 %vm544_vm0, %v748_v58  ;;  %v635_v62 = vsel %vm634_vm10, %v6166_v31, %v631_v60 }
 0x137   : > { %v639_v2 = vmul.f32 %v635_v62, %v6712_v57  ;;  %v6140_v57 = vld [vmem:[%s8580_s3] ss:$0 sm:$0xff] }
 0x139   : > { %v646_v41 = vmul.f32 %v6783_v54, %v639_v2 }
 0x13b   : > { %v653_v56 = vadd.f32 %v6794_v63, %v646_v41 }
 0x13e   : > { %5710 = vmatmul.msk.f32.gmra.mxu0 %vm544_vm0, %v652_v0  ;;  %5715 = vmatmul.msk.f32.gmra.mxu1 %vm544_vm0, %v749_v1 }
 0x146   : > { %5711 = vmatmul.msk.f32.gmra.mxu0 %vm544_vm0, %v653_v56 }
 0x1a2   : > { %v826_v4 = vpop.f32.mrf.mxu1 }
 0x1a3   : > { %v6884_v5 = vadd.f32 %v6139_v3, %v826_v4 }
 0x1a5   : > { %5716 = vmatpush.xpose.msk.msrb.mxu0 %vm894_vm11, %v6884_v5  ;;  %870 = vrot.lane.b32.xlu1 %v6884_v5, %s6528_s27 }
 0x1a6   : > { %886 = vrot.lane.b32.xlu0 %v6884_v5, %s6529_s28 }
 0x1aa   : > { %v829_v63 = vpop.f32.mrf.mxu1 }
 0x1ab   : > { %v782_v54 = vpop.f32.mrf.mxu0  ;;  %v6897_v7 = vadd.f32 %v6139_v3, %v829_v63 }
 0x1ac   : > { %v6895_v6 = vadd.f32 %v6140_v57, %v782_v54 }
 0x1ad   : > { %878 = vrot.lane.b32.xlu1 %v6884_v5, %s6530_s16  ;;  %5718 = vmatpush.xpose.msk.msrb.mxu1 %vm894_vm11, %v6897_v7  ;;  %v5987_v18 = vpack.i.bf16 %v6897_v7, %v6884_v5 }
 0x1ae   : > { %872 = vrot.lane.b32.xlu0 %v6897_v7, %s6528_s27  ;;  %842 = vrot.lane.b32.xlu2 %v6895_v6, %s6528_s27 }
 0x1af   : > { %5717 = vmatmul.msk.f32.vlgmr.msrb.gmra.mxu0 %vm894_vm11, %v6895_v6 }
 0x1b3   : > { %v785_v29 = vpop.f32.mrf.mxu0  ;;  %v832_v8 = vpop.f32.mrf.mxu1 }
 0x1b4   : > { %v6909_v9 = vadd.f32 %v6140_v57, %v785_v29  ;;  %v6911_v10 = vadd.f32 %v6139_v3, %v832_v8 }
 0x1b6   : > { %844 = vrot.lane.b32.xlu1 %v6909_v9, %s6528_s27  ;;  %5719 = vmatmul.msk.f32.vlgmr.msrb.gmra.mxu1 %vm894_vm11, %v6909_v9  ;;  %v5992_v17 = vpack.i.bf16 %v6911_v10, %v6895_v6 }
 0x1b7   : > { %888 = vrot.lane.b32.xlu0 %v6897_v7, %s6529_s28  ;;  %850 = vrot.lane.b32.xlu2 %v6895_v6, %s6530_s16 }
 0x1b8   : > { %5720 = vmatpush.xpose.msk.msra.mxu0 %vm894_vm11, %v6911_v10 }
 0x1bb   : > { %v788_v11 = vpop.f32.mrf.mxu0  ;;  %v835_v12 = vpop.f32.mrf.mxu1 }
 0x1bc   : > { %v6923_v13 = vadd.f32 %v6140_v57, %v788_v11  ;;  %v6925_v14 = vadd.f32 %v6139_v3, %v835_v12 }
 0x1be   : > { %880 = vrot.lane.b32.xlu1 %v6897_v7, %s6530_s16  ;;  %5721 = vmatmul.msk.f32.vlgmr.msra.gmra.mxu0 %vm894_vm11, %v6923_v13 }
 0x1bf   : > { %846 = vrot.lane.b32.xlu0 %v6923_v13, %s6528_s27  ;;  %852 = vrot.lane.b32.xlu2 %v6909_v9, %s6530_s16 }
 0x1c0   : > { %5722 = vmatpush.xpose.msk.msra.mxu1 %vm894_vm11, %v6925_v14 }
 0x1c3   : > { %v791_v15 = vpop.f32.mrf.mxu0 }
 0x1c4   : > { %v6937_v16 = vadd.f32 %v6140_v57, %v791_v15 }
 0x1c6   : > { %858 = vrot.lane.b32.xlu1 %v6895_v6, %s6529_s28  ;;  %5723 = vmatmul.msk.f32.vlgmr.msra.gmra.mxu1 %vm894_vm11, %v6937_v16 }
 0x1c7   : > { %854 = vrot.lane.b32.xlu0 %v6923_v13, %s6530_s16  ;;  %860 = vrot.lane.b32.xlu2 %v6909_v9, %s6529_s28 }
 0x1ce   : > { %882 = vrot.lane.b32.xlu1 %v6911_v10, %s6530_s16 }
 0x1cf   : > { %874 = vrot.lane.b32.xlu2 %v6911_v10, %s6528_s27  ;;  %848 = vrot.lane.b32.xlu0 %v6937_v16, %s6528_s27 }
 0x1d6   : > { %890 = vrot.lane.b32.xlu1 %v6911_v10, %s6529_s28 }
 0x1d7   : > { %862 = vrot.lane.b32.xlu2 %v6923_v13, %s6529_s28  ;;  %856 = vrot.lane.b32.xlu0 %v6937_v16, %s6530_s16 }
 0x1de   : > { %892 = vrot.lane.b32.xlu1 %v6925_v14, %s6529_s28 }
 0x1df   : > { %876 = vrot.lane.b32.xlu2 %v6925_v14, %s6528_s27  ;;  %5993 = vrot.lane.b32.xlu0 %v5992_v17, %s6531_s17 }
 0x1e6   : > { %5988 = vrot.lane.b32.xlu1 %v5987_v18, %s6531_s17 }
 0x1e7   : > { %884 = vrot.lane.b32.xlu2 %v6925_v14, %s6530_s16  ;;  %864 = vrot.lane.b32.xlu0 %v6937_v16, %s6529_s28 }
 0x208   : > { %v843_v28 = vpop.permute.xlu2 %842 }
 0x209   : > { %v5997_v19 = vpack.i.bf16 %v843_v28, %v6909_v9 }
 0x20b   : > { %5998 = vrot.lane.b32.xlu1 %v5997_v19, %s6531_s17 }
 0x211   : > { %v851_v21 = vpop.permute.xlu2 %850 }
 0x217   : > { %v6975_v23 = vpop.permute.xlu1 %870 }
 0x218   : > { %v6979_v26 = vpop.permute.xlu0 %886  ;;  %5724 = vmatpush.xpose.msk.msra.mxu2 %vm894_vm11, %v6975_v23 }
 0x219   : > { %v6977_v25 = vpop.permute.xlu2 %852 }
 0x21b   : > { %5725 = vmatmul.msk.f32.vlgmr.msra.gmra.mxu2 %vm894_vm11, %v843_v28 }
 0x21f   : > { %v6984_v27 = vpop.permute.xlu1 %878 }
 0x220   : > { %v6988_v30 = vpop.permute.xlu0 %872 }
 0x221   : > { %v6986_v24 = vpop.permute.xlu2 %860  ;;  %5726 = vmatpush.xpose.msk.msra.mxu3 %vm894_vm11, %v6988_v30  ;;  %v6002_v31 = vpack.i.bf16 %v6988_v30, %v6975_v23 }
 0x223   : > { %6003 = vrot.lane.b32.xlu2 %v6002_v31, %s6531_s17 }
 0x228   : > { %v845_v43 = vpop.permute.xlu1 %844 }
 0x229   : > { %v6995_v32 = vpop.permute.xlu2 %874  ;;  %v6997_v33 = vpop.permute.xlu0 %888  ;;  %5727 = vmatmul.msk.f32.vlgmr.msra.gmra.mxu3 %vm894_vm11, %v845_v43  ;;  %v6017_v34 = vpack.i.bf16 %v851_v21, %v845_v43 }
 0x22a   : > { %5728 = vmatpush.xpose.msk.msrb.mxu2 %vm894_vm11, %v6995_v32  ;;  %v6012_v20 = vpack.i.bf16 %v6997_v33, %v6979_v26  ;;  %v6027_v51 = vpack.i.bf16 %v6995_v32, %v6925_v14 }
 0x22b   : > { %6018 = vrot.lane.b32.xlu0 %v6017_v34, %s6531_s17 }
 0x22c   : > { %6013 = vrot.lane.b32.xlu1 %v6012_v20, %s6531_s17  ;;  %v916_v62 = vpop.f32.mrf.mxu0 }
 0x22d   : > { %v7117_v1 = vmul.f32 0.1, %v916_v62 }
 0x22e   : > { %5732 = vmatpush.xpose.msk.msra.mxu2 %vm894_vm11, %v6984_v27 }
 0x22f   : > { %v1631_v56 = vsel %vm894_vm11, %v7117_v1, -inf }
 0x230   : > { %v7008_v35 = vpop.permute.xlu1 %880 }
 0x231   : > { %v7010_v36 = vpop.permute.xlu2 %862  ;;  %v7012_v37 = vpop.permute.xlu0 %846  ;;  %v6007_v39 = vpack.i.bf16 %v7008_v35, %v6984_v27 }
 0x232   : > { %5729 = vmatmul.msk.f32.vlgmr.msrb.gmra.mxu2 %vm894_vm11, %v7012_v37 }
 0x233   : > { %5740 = vmatpush.xpose.msk.msrb.mxu2 %vm894_vm11, %v6979_v26  ;;  %6008 = vrot.lane.b32.xlu2 %v6007_v39, %s6531_s17  ;;  %v940_v0 = vpop.f32.mrf.mxu1 }
 0x234   : > { %v7119_v41 = vmul.f32 0.1, %v940_v0 }
 0x236   : > { %v1634_v3 = vsel %vm894_vm11, %v7119_v41, -inf }
 0x238   : > { %v859_v40 = vpop.permute.xlu1 %858 }
 0x239   : > { %v7021_v44 = vpop.permute.xlu2 %876  ;;  %v7023_v45 = vpop.permute.xlu0 %854  ;;  %v6022_v42 = vpack.i.bf16 %v859_v40, %v6977_v25 }
 0x23a   : > { %5730 = vmatpush.xpose.msk.msrb.mxu3 %vm894_vm11, %v7021_v44  ;;  %5733 = vmatmul.msk.f32.vlgmr.msra.gmra.mxu2 %vm894_vm11, %v851_v21 }
 0x23b   : > { %5748 = vmatpush.xpose.msk.msra.mxu2 %vm894_vm11, %v6895_v6  ;;  %6023 = vrot.lane.b32.xlu2 %v6022_v42, %s6531_s17  ;;  %v964_v12 = vpop.f32.mrf.mxu0 }
 0x23c   : > { %v7149_v15 = vmul.f32 0.1, %v964_v12 }
 0x23e   : > { %5734 = vmatpush.xpose.msk.msra.mxu3 %vm894_vm11, %v7008_v35  ;;  %v1637_v17 = vsel %vm894_vm11, %v7149_v15, -inf }
 0x240   : > { %v883_v47 = vpop.permute.xlu1 %882 }
 0x241   : > { %v7034_v48 = vpop.permute.xlu2 %884  ;;  %v7036_v49 = vpop.permute.xlu0 %848  ;;  %5736 = vmatpush.xpose.msk.msrb.mxu0 %vm894_vm11, %v883_v47  ;;  %v6032_v50 = vpack.i.bf16 %v883_v47, %v7021_v44 }
 0x242   : > { %5731 = vmatmul.msk.f32.vlgmr.msrb.gmra.mxu3 %vm894_vm11, %v7036_v49  ;;  %5738 = vmatpush.xpose.msk.msrb.mxu1 %vm894_vm11, %v7034_v48 }
 0x243   : > { %5741 = vmatmul.msk.f32.vlgmr.msrb.gmra.mxu2 %vm894_vm11, %v859_v40  ;;  %5742 = vmatpush.xpose.msk.msrb.mxu3 %vm894_vm11, %v6997_v33  ;;  %v988_v18 = vpop.f32.mrf.mxu1 }
 0x244   : > { %5756 = vmatpush.xpose.msk.msrb.mxu2 %vm894_vm11, %v843_v28  ;;  %6028 = vrot.lane.b32.xlu2 %v6027_v51, %s6531_s17  ;;  %v7155_v19 = vmul.f32 0.1, %v988_v18 }
 0x245   : > { %6033 = vrot.lane.b32.xlu1 %v6032_v50, %s6531_s17  ;;  %5737 = vmatmul.msk.f32.vlgmr.msrb.gmra.mxu0 %vm894_vm11, %v7023_v45 }
 0x248   : > { %v891_v52 = vpop.permute.xlu1 %890 }
 0x249   : > { %v7054_v53 = vpop.permute.xlu0 %856  ;;  %5744 = vmatpush.xpose.msk.msra.mxu0 %vm894_vm11, %v891_v52  ;;  %v6037_v55 = vpack.i.bf16 %v891_v52, %v7034_v48 }
 0x24a   : > { %5735 = vmatmul.msk.f32.vlgmr.msra.gmra.mxu3 %vm894_vm11, %v6977_v25  ;;  %5739 = vmatmul.msk.f32.vlgmr.msrb.gmra.mxu1 %vm894_vm11, %v7054_v53 }
 0x24b   : > { %5749 = vmatmul.msk.f32.vlgmr.msra.gmra.mxu2 %vm894_vm11, %v6884_v5  ;;  %5750 = vmatpush.xpose.msk.msra.mxu3 %vm894_vm11, %v6909_v9 }
 0x24c   : > { %5764 = vmatpush.xpose.msk.msra.mxu2 %vm894_vm11, %v851_v21  ;;  %6038 = vrot.lane.b32.xlu0 %v6037_v55, %s6531_s17 }
 0x24d   : > { %5752 = vmatpush.xpose.msk.msrb.mxu0 %vm894_vm11, %v6923_v13 }
 0x24e   : > { %5745 = vmatmul.msk.f32.vlgmr.msra.gmra.mxu0 %vm894_vm11, %v7010_v36 }
 0x250   : > { %v893_v58 = vpop.permute.xlu1 %892 }
 0x251   : > { %5760 = vmatpush.xpose.msk.msra.mxu0 %vm894_vm11, %v7012_v37  ;;  %v7074_v59 = vpop.permute.xlu0 %5993  ;;  %5746 = vmatpush.xpose.msk.msra.mxu1 %vm894_vm11, %v893_v58  ;;  %v6042_v54 = vpack.i.bf16 %v893_v58, %v6986_v24 }
 0x252   : > { %5743 = vmatmul.msk.f32.vlgmr.msrb.gmra.mxu3 %vm894_vm11, %v6986_v24  ;;  %v5996_v61 = vunpack.i.h.bf16 %v7074_v59 }
 0x253   : > { %5757 = vmatmul.msk.f32.vlgmr.msrb.gmra.mxu2 %vm894_vm11, %v6975_v23  ;;  %5758 = vmatpush.xpose.msk.msrb.mxu3 %vm894_vm11, %v845_v43  ;;  %v1640_v23 = vsel %vm894_vm11, %v7155_v19, -inf }
 0x254   : > { %5772 = vmatpush.xpose.msk.msrb.mxu2 %vm894_vm11, %v859_v40 }
 0x255   : > { %5754 = vmatpush.xpose.msk.msrb.mxu1 %vm894_vm11, %v6937_v16 }
 0x256   : > { %5753 = vmatmul.msk.f32.vlgmr.msrb.gmra.mxu0 %vm894_vm11, %v6911_v10 }
 0x257   : > { %5768 = vmatpush.xpose.msk.msrb.mxu0 %vm894_vm11, %v7023_v45 }
 0x258   : > { %v5989_v46 = vpop.permute.xlu1 %5988 }
 0x259   : > { %v5990_v60 = vunpack.i.l.bf16 %v5989_v46  ;;  %v7089_v38 = vpop.permute.xlu0 %864  ;;  %v5991_v2 = vunpack.i.h.bf16 %v5989_v46 }
 0x25a   : > { %5747 = vmatmul.msk.f32.vlgmr.msra.gmra.mxu1 %vm894_vm11, %v7089_v38  ;;  %5751 = vmatmul.msk.f32.vlgmr.msra.gmra.mxu3 %vm894_vm11, %v6897_v7 }
 0x25b   : > { %5762 = vmatpush.xpose.msk.msra.mxu1 %vm894_vm11, %v7036_v49  ;;  %5765 = vmatmul.msk.f32.vlgmr.msra.gmra.mxu2 %vm894_vm11, %v6984_v27 }
 0x25c   : > { %5766 = vmatpush.xpose.msk.msra.mxu3 %vm894_vm11, %v6977_v25  ;;  %2004 = vmatpush.msra.mxu2 %v5990_v60 }
 0x25e   : > { %5761 = vmatmul.msk.f32.vlgmr.msra.gmra.mxu0 %vm894_vm11, %v6995_v32 }
 0x25f   : > { %5776 = vmatpush.xpose.msk.msra.mxu0 %vm894_vm11, %v7010_v36 }
 0x262   : > { %5755 = vmatmul.msk.f32.vlgmr.msrb.gmra.mxu1 %vm894_vm11, %v6925_v14  ;;  %5759 = vmatmul.msk.f32.vlgmr.msrb.gmra.mxu3 %vm894_vm11, %v6988_v30 }
 0x263   : > { %5770 = vmatpush.xpose.msk.msrb.mxu1 %vm894_vm11, %v7054_v53  ;;  %5773 = vmatmul.msk.f32.vlgmr.msrb.gmra.mxu2 %vm894_vm11, %v6979_v26 }
 0x264   : > { %5774 = vmatpush.xpose.msk.msrb.mxu3 %vm894_vm11, %v6986_v24 }
 0x266   : > { %5769 = vmatmul.msk.f32.vlgmr.msrb.gmra.mxu0 %vm894_vm11, %v883_v47 }
 0x267   : > { %2056 = vmatpush.msrb.mxu0 %v5996_v61 }
 0x26a   : > { %5763 = vmatmul.msk.f32.vlgmr.msra.gmra.mxu1 %vm894_vm11, %v7021_v44  ;;  %5767 = vmatmul.msk.f32.vlgmr.msra.gmra.mxu3 %vm894_vm11, %v7008_v35 }
 0x26b   : > { %5778 = vmatpush.xpose.msk.msra.mxu1 %vm894_vm11, %v7089_v38  ;;  %2030 = vmatpush.msra.mxu3 %v5991_v2 }
 0x26d   : > { %1632 = vmax.xlane.f32.xlu2 %v1631_v56 }
 0x26e   : > { %5777 = vmatmul.msk.f32.vlgmr.msra.gmra.mxu0 %vm894_vm11, %v891_v52 }
 0x26f   : > { %1635 = vmax.xlane.f32.xlu1 %v1634_v3 }
 0x272   : > { %5771 = vmatmul.msk.f32.vlgmr.msrb.gmra.mxu1 %vm894_vm11, %v7034_v48  ;;  %5775 = vmatmul.msk.f32.vlgmr.msrb.gmra.mxu3 %vm894_vm11, %v6997_v33 }
 0x27a   : > { %5779 = vmatmul.msk.f32.vlgmr.msra.gmra.mxu1 %vm894_vm11, %v893_v58 }
 0x27d   : > { %v6004_v4 = vpop.permute.xlu2 %6003  ;;  %v7147_v14 = vpop.permute.xlu1 %5998 }
 0x27e   : > { %v6006_v5 = vunpack.i.h.bf16 %v6004_v4  ;;  %v6005_v57 = vunpack.i.l.bf16 %v6004_v4 }
 0x280   : > { %2108 = vmatpush.msrb.mxu2 %v6005_v57  ;;  %2134 = vmatpush.msrb.mxu3 %v6006_v5 }
 0x285   : > { %6043 = vrot.lane.b32.xlu2 %v6042_v54, %s6531_s17 }
 0x28d   : > { %v7139_v63 = vpop.permute.xlu2 %6008 }
 0x295   : > { %v7141_v6 = vpop.permute.xlu2 %6023 }
 0x29e   : > { %v6029_v7 = vpop.permute.xlu2 %6028  ;;  %v1012_v9 = vpop.f32.mrf.mxu2 }
 0x29f   : > { %v6031_v29 = vunpack.i.h.bf16 %v6029_v7  ;;  %v6030_v8 = vunpack.i.l.bf16 %v6029_v7  ;;  %v7143_v10 = vmul.f32 0.1, %v1012_v9  ;;  %v7153_v28 = vpop.permute.xlu1 %6013 }
 0x2a1   : > { %2082 = vmatpush.msrb.mxu1 %v6030_v8  ;;  %2160 = vmatpush.msra.mxu0 %v6031_v29  ;;  %v1643_v11 = vsel %vm894_vm11, %v7143_v10, -inf }
 0x2a2   : > { %1644 = vmax.xlane.f32.xlu0 %v1643_v11 }
 0x2ac   : > { %v1036_v30 = vpop.f32.mrf.mxu3 }
 0x2ad   : > { %v7204_v29 = vmul.f32 0.1, %v1036_v30 }
 0x2ae   : > { %1638 = vmax.xlane.f32.xlu2 %v1637_v17 }
 0x2af   : > { %v1646_v9 = vsel %vm894_vm11, %v7204_v29, -inf }
 0x2b5   : > { %v1060_v21 = vpop.f32.mrf.mxu2 }
 0x2b6   : > { %v7159_v25 = vmul.f32 0.1, %v1060_v21  ;;  %1641 = vmax.xlane.f32.xlu2 %v1640_v23 }
 0x2b7   : > { %v7161_v26 = vpop.permute.xlu1 %6033 }
 0x2b8   : > { %v6035_v27 = vunpack.i.l.bf16 %v7161_v26  ;;  %v1649_v24 = vsel %vm894_vm11, %v7159_v25, -inf }
 0x2b9   : > { %1650 = vmax.xlane.f32.xlu1 %v1649_v24 }
 0x2ba   : > { %2186 = vmatpush.msra.mxu1 %v6035_v27 }
 0x2bd   : > { %v1108_v39 = vpop.f32.mrf.mxu2 }
 0x2be   : > { %v7176_v42 = vmul.f32 0.1, %v1108_v39 }
 0x2c0   : > { %v1655_v47 = vsel %vm894_vm11, %v7176_v42, -inf }
 0x2c2   : > { %v1156_v31 = vpop.f32.mrf.mxu0 }
 0x2c3   : > { %v7166_v43 = vmul.f32 0.1, %v1156_v31 }
 0x2c5   : > { %v1084_v32 = vpop.f32.mrf.mxu3  ;;  %v1661_v33 = vsel %vm894_vm11, %v7166_v43, -inf }
 0x2c6   : > { %1662 = vmax.xlane.f32.xlu0 %v1661_v33  ;;  %v7180_v51 = vmul.f32 0.1, %v1084_v32 }
 0x2c7   : > { %v1180_v44 = vpop.f32.mrf.mxu1 }
 0x2c8   : > { %v1652_v52 = vsel %vm894_vm11, %v7180_v51, -inf  ;;  %v7212_v17 = vmul.f32 0.1, %v1180_v44 }
 0x2ca   : > { %v1664_v21 = vsel %vm894_vm11, %v7212_v17, -inf }
 0x2cb   : > { %v1252_v34 = vpop.f32.mrf.mxu0 }
 0x2cc   : > { %v7170_v20 = vmul.f32 0.1, %v1252_v34  ;;  %v1204_v34 = vpop.f32.mrf.mxu2 }
 0x2cd   : > { %v7174_v40 = vpop.f32.mrf.mxu3 }
 0x2ce   : > { %v1673_v35 = vsel %vm894_vm11, %v7170_v20, -inf }
 0x2cf   : > { %1674 = vmax.xlane.f32.xlu1 %v1673_v35 }
 0x2d3   : > { %v1352_v39 = vpop.f32.mrf.mxu0 }
 0x2d5   : > { %v1228_v50 = vpop.f32.mrf.mxu3 }
 0x2d6   : > { %v7190_v4 = vmul.f32 0.1, %v1228_v50 }
 0x2d7   : > { %1656 = vmax.xlane.f32.xlu1 %v1655_v47  ;;  %v1276_v48 = vpop.f32.mrf.mxu1 }
 0x2d8   : > { %v7220_v27 = vmul.f32 0.1, %v1276_v48 }
 0x2da   : > { %v1676_v24 = vsel %vm894_vm11, %v7220_v27, -inf }
 0x2dd   : > { %v1332_v61 = vpop.f32.mrf.mxu3 }
 0x2de   : > { %v7206_v8 = vmul.f32 0.1, %v1332_v61 }
 0x2df   : > { %1653 = vmax.xlane.f32.xlu1 %v1652_v52  ;;  %v1372_v55 = vpop.f32.mrf.mxu1  ;;  %v7232_v52 = vpop.permute.xlu0 %6018 }
 0x2e0   : > { %v1633_v58 = vpop.xlane.xlu2 %1632  ;;  %v7184_v46 = vmul.f32 0.1, %v1372_v55  ;;  %v1810_v11 = vsel %vm894_vm11, %v7206_v8, -inf  ;;  %v7234_v55 = vmul.f32 0.1, %v1352_v39 }
 0x2e1   : > { %v1679_v60 = vsub.f32 %v7117_v1, %v1633_v58 }
 0x2e2   : > { %v1636_v62 = vpop.xlane.xlu1 %1635  ;;  %v1816_v3 = vsel %vm894_vm11, %v7184_v46, -inf  ;;  %v1813_v61 = vsel %vm894_vm11, %v7234_v55, -inf }
 0x2e3   : > { %v1695_v0 = vmul.f32 1.442695, %v1679_v60  ;;  %v1680_v2 = vsub.f32 %v7119_v41, %v1636_v62  ;;  %v1670_v41 = vsel %vm894_vm11, %v7190_v4, -inf  ;;  %v1432_v60 = vpop.f32.mrf.mxu0 }
 0x2e5   : > { %6167 = vpow2.f32 %v1695_v0  ;;  %v1697_v56 = vmul.f32 1.442695, %v1680_v2  ;;  %v7194_v57 = vpop.f32.mrf.mxu3  ;;  %v7244_v0 = vmul.f32 0.1, %v1204_v34  ;;  %v7247_v2 = vmul.f32 0.1, %v7174_v40 }
 0x2e7   : > { %1817 = vmax.xlane.f32.xlu1 %v1816_v3  ;;  %6169 = vpow2.f32 %v1697_v56  ;;  %v7242_v62 = vpop.permute.xlu0 %6038  ;;  %v1452_v39 = vpop.f32.mrf.mxu1 }
 0x2e8   : > { %v7224_v30 = vpop.permute.xlu2 %6043 }
 0x2eb   : > { %v7192_v5 = vpop.eup %6167 }
 0x2ec   : > { %v1727_v1 = vsel %vm894_vm11, %v7192_v5, 0.0 }
 0x2ed   : > { %v7198_v54 = vpop.eup %6169  ;;  %1728 = vadd.xlane.f32.xlu2 %v1727_v1  ;;  %v1492_v12 = vpop.f32.mrf.mxu3  ;;  %v1658_v1 = vsel %vm894_vm11, %v7247_v2, -inf }
 0x2ee   : > { %v1730_v7 = vsel %vm894_vm11, %v7198_v54, 0.0  ;;  %v7214_v18 = vmul.f32 0.1, %v1492_v12 }
 0x2ef   : > { %1671 = vmax.xlane.f32.xlu1 %v1670_v41  ;;  %1731 = vadd.xlane.f32.xlu0 %v1730_v7  ;;  %v1667_v41 = vsel %vm894_vm11, %v7244_v0, -inf  ;;  %v1512_v7 = vpop.f32.mrf.mxu0 }
 0x2f0   : > { %v1834_v23 = vsel %vm894_vm11, %v7214_v18, -inf }
 0x2f5   : > { %1647 = vmax.xlane.f32.xlu2 %v1646_v9  ;;  %v7255_v9 = vmul.f32 0.1, %v1432_v60 }
 0x2f7   : > { %1811 = vmax.xlane.f32.xlu1 %v1810_v11  ;;  %v7257_v11 = vmul.f32 0.1, %v1512_v7  ;;  %v1532_v7 = vpop.f32.mrf.mxu1 }
 0x2fd   : > { %1665 = vmax.xlane.f32.xlu2 %v1664_v21 }
 0x2ff   : > { %1835 = vmax.xlane.f32.xlu1 %v1834_v23  ;;  %v1825_v23 = vsel %vm894_vm11, %v7255_v9, -inf }
 0x305   : > { %1677 = vmax.xlane.f32.xlu2 %v1676_v24  ;;  %v1837_v24 = vsel %vm894_vm11, %v7257_v11, -inf }
 0x315   : > { %v1645_v12 = vpop.xlane.xlu0 %1644 }
 0x316   : > { %v1683_v40 = vsub.f32 %v7143_v10, %v1645_v12 }
 0x321   : > { %v1639_v31 = vpop.xlane.xlu2 %1638 }
 0x322   : > { %v1681_v32 = vsub.f32 %v7149_v15, %v1639_v31  ;;  %v1312_v15 = vpop.f32.mrf.mxu2 }
 0x324   : > { %v1699_v33 = vmul.f32 1.442695, %v1681_v32  ;;  %v1703_v32 = vmul.f32 1.442695, %v1683_v40  ;;  %v7290_v40 = vmul.f32 0.1, %v1532_v7 }
 0x326   : > { %6171 = vpow2.f32 %v1699_v33  ;;  %v7266_v33 = vmul.f32 0.1, %v1312_v15 }
 0x328   : > { %v1807_v10 = vsel %vm894_vm11, %v7266_v33, -inf }
 0x329   : > { %v1642_v35 = vpop.xlane.xlu2 %1641 }
 0x32a   : > { %v1682_v44 = vsub.f32 %v7155_v19, %v1642_v35  ;;  %v1392_v56 = vpop.f32.mrf.mxu2 }
 0x32c   : > { %v7228_v47 = vpop.eup %6171  ;;  %v1701_v48 = vmul.f32 1.442695, %v1682_v44  ;;  %v7249_v3 = vpop.xlane.xlu1 %1650 }
 0x32d   : > { %v1733_v50 = vsel %vm894_vm11, %v7228_v47, 0.0 }
 0x32e   : > { %6173 = vpow2.f32 %v1701_v48  ;;  %1734 = vadd.xlane.f32.xlu0 %v1733_v50  ;;  %v7276_v48 = vmul.f32 0.1, %v1452_v39 }
 0x32f   : > { %6175 = vpow2.f32 %v1703_v32  ;;  %v1592_v32 = vpop.f32.mrf.mxu0 }
 0x330   : > { %v1828_v15 = vsel %vm894_vm11, %v7276_v48, -inf }
 0x332   : > { %v1472_v31 = vpop.f32.mrf.mxu2 }
 0x333   : > { %v7268_v34 = vmul.f32 0.1, %v1472_v31  ;;  %v1840_v31 = vsel %vm894_vm11, %v7290_v40, -inf }
 0x334   : > { %v7236_v58 = vpop.eup %6173 }
 0x335   : > { %v1736_v19 = vsel %vm894_vm11, %v7236_v58, 0.0  ;;  %v1831_v35 = vsel %vm894_vm11, %v7268_v34, -inf  ;;  %v7278_v50 = vpop.eup %6175 }
 0x336   : > { %1814 = vmax.xlane.f32.xlu0 %v1813_v61  ;;  %1737 = vadd.xlane.f32.xlu2 %v1736_v19  ;;  %v1739_v60 = vsel %vm894_vm11, %v7278_v50, 0.0  ;;  %v7286_v19 = vmul.f32 0.1, %v1392_v56 }
 0x33e   : > { %1659 = vmax.xlane.f32.xlu0 %v1658_v1  ;;  %1668 = vmax.xlane.f32.xlu2 %v1667_v41  ;;  %v1663_v1 = vpop.xlane.xlu0 %1662  ;;  %v1819_v41 = vsel %vm894_vm11, %v7286_v19, -inf }
 0x342   : > { %v7260_v21 = vpop.xlane.xlu1 %1674 }
 0x346   : > { %1826 = vmax.xlane.f32.xlu0 %v1825_v23  ;;  %1838 = vmax.xlane.f32.xlu2 %v1837_v24 }
 0x34a   : > { %v7274_v44 = vpop.xlane.xlu1 %1656 }
 0x34e   : > { %1808 = vmax.xlane.f32.xlu0 %v1807_v10  ;;  %1832 = vmax.xlane.f32.xlu2 %v1831_v35 }
 0x352   : > { %v7284_v61 = vpop.xlane.xlu1 %1653 }
 0x356   : > { %1829 = vmax.xlane.f32.xlu0 %v1828_v15  ;;  %1740 = vadd.xlane.f32.xlu2 %v1739_v60  ;;  %v6010_v15 = vunpack.i.l.bf16 %v7139_v63  ;;  %v7298_v60 = vmul.f32 0.1, %v1592_v32  ;;  %v7311_v32 = vmul.f32 0.1, %v7194_v57 }
 0x35a   : > { %v7292_v23 = vpop.xlane.xlu1 %1817 }
 0x35e   : > { %1820 = vmax.xlane.f32.xlu0 %v1819_v41 }
 0x360   : > { %v1729_v12 = vpop.xlane.xlu2 %1728 }
 0x361   : > { %6177 = vrcp.f32 %v1729_v12  ;;  %v6011_v12 = vunpack.i.h.bf16 %v7139_v63 }
 0x362   : > { %v1732_v24 = vpop.xlane.xlu0 %1731  ;;  %v7305_v22 = vpop.xlane.xlu1 %1671 }
 0x363   : > { %6179 = vrcp.f32 %v1732_v24  ;;  %v1689_v24 = vsub.f32 %v7166_v43, %v1663_v1  ;;  %v1685_v43 = vsub.f32 %v7159_v25, %v7249_v3 }
 0x366   : > { %1841 = vmax.xlane.f32.xlu0 %v1840_v31 }
 0x367   : > { %v6178_v56 = vpop.eup %6177 }
 0x368   : > { %v1791_v10 = vmul.f32 %v6178_v56, %v7192_v5  ;;  %v1648_v35 = vpop.xlane.xlu2 %1647  ;;  %v1849_v5 = vsel %vm894_vm11, %v7298_v60, -inf  ;;  %v1822_v56 = vsel %vm894_vm11, %v7311_v32, -inf }
 0x369   : > { %v6180_v39 = vpop.eup %6179  ;;  %v1684_v41 = vsub.f32 %v7204_v29, %v1648_v35  ;;  %v1715_v29 = vmul.f32 1.442695, %v1689_v24 }
 0x36a   : > { %v1792_v7 = vmul.f32 %v6180_v39, %v7198_v54  ;;  %5780 = vmatmul.msk.f32.vlgmr.msra.gmra.mxu2 %vm894_vm11, %v1791_v10  ;;  %v1612_v10 = vpop.f32.mrf.mxu1  ;;  %v1812_v35 = vpop.xlane.xlu1 %1811  ;;  %v1707_v39 = vmul.f32 1.442695, %v1685_v43 }
 0x36b   : > { %v1705_v31 = vmul.f32 1.442695, %v1684_v41  ;;  %2212 = vmatpush.msra.mxu2 %v6010_v15  ;;  %v7323_v41 = vmul.f32 0.1, %v1612_v10  ;;  %v1856_v25 = vsub.f32 %v7206_v8, %v1812_v35  ;;  %v1693_v10 = vsub.f32 %v7170_v20, %v7260_v21 }
 0x36c   : > { %5781 = vmatmul.msk.f32.vlgmr.msra.gmra.mxu3 %vm894_vm11, %v1792_v7  ;;  %v1858_v21 = vsub.f32 %v7184_v46, %v7292_v23 }
 0x36d   : > { %6181 = vpow2.f32 %v1705_v31  ;;  %2238 = vmatpush.msra.mxu3 %v6011_v12  ;;  %v1852_v31 = vsel %vm894_vm11, %v7323_v41, -inf }
 0x36e   : > { %1850 = vmax.xlane.f32.xlu0 %v1849_v5  ;;  %6183 = vpow2.f32 %v1715_v29  ;;  %v1552_v5 = vpop.f32.mrf.mxu2  ;;  %v1873_v29 = vmul.f32 1.442695, %v1856_v25 }
 0x36f   : > { %6185 = vpow2.f32 %v1707_v39  ;;  %v7334_v8 = vmul.f32 0.1, %v1552_v5 }
 0x370   : > { %v1666_v54 = vpop.xlane.xlu2 %1665 }
 0x371   : > { %v1690_v3 = vsub.f32 %v7212_v17, %v1666_v54  ;;  %v1686_v17 = vsub.f32 %v7180_v51, %v7284_v61  ;;  %v1843_v51 = vsel %vm894_vm11, %v7334_v8, -inf  ;;  %v1572_v61 = vpop.f32.mrf.mxu3 }
 0x372   : > { %v7353_v20 = vmul.f32 0.1, %v1572_v61 }
 0x373   : > { %v7313_v63 = vpop.eup %6181  ;;  %v1717_v43 = vmul.f32 1.442695, %v1690_v3 }
 0x374   : > { %v1742_v1 = vsel %vm894_vm11, %v7313_v63, 0.0  ;;  %v7321_v57 = vpop.eup %6183  ;;  %v1846_v5 = vsel %vm894_vm11, %v7353_v20, -inf }
 0x375   : > { %1743 = vadd.xlane.f32.xlu2 %v1742_v1  ;;  %v1757_v24 = vsel %vm894_vm11, %v7321_v57, 0.0  ;;  %v1836_v1 = vpop.xlane.xlu1 %1835 }
 0x376   : > { %1823 = vmax.xlane.f32.xlu0 %v1822_v56  ;;  %v1864_v56 = vsub.f32 %v7214_v18, %v1836_v1  ;;  %v1723_v18 = vmul.f32 1.442695, %v1693_v10 }
 0x378   : > { %v1678_v15 = vpop.xlane.xlu2 %1677 }
 0x379   : > { %v1694_v7 = vsub.f32 %v7220_v27, %v1678_v15  ;;  %v7332_v27 = vpop.eup %6185  ;;  %v1709_v15 = vmul.f32 1.442695, %v1686_v17 }
 0x37a   : > { %v1745_v39 = vsel %vm894_vm11, %v7332_v27, 0.0 }
 0x37b   : > { %v1725_v12 = vmul.f32 1.442695, %v1694_v7  ;;  %v1889_v7 = vmul.f32 1.442695, %v1864_v56 }
 0x37d   : > { %6187 = vpow2.f32 %v1725_v12  ;;  %1758 = vadd.xlane.f32.xlu2 %v1757_v24  ;;  %v1687_v12 = vsub.f32 %v7176_v42, %v7274_v44 }
 0x37e   : > { %1853 = vmax.xlane.f32.xlu0 %v1852_v31  ;;  %6189 = vpow2.f32 %v1873_v29  ;;  %v1877_v29 = vmul.f32 1.442695, %v1858_v21  ;;  %v6036_v21 = vunpack.i.h.bf16 %v7161_v26  ;;  %v6040_v26 = vunpack.i.l.bf16 %v7242_v62 }
 0x37f   : > { %6191 = vpow2.f32 %v1717_v43  ;;  %v1711_v46 = vmul.f32 1.442695, %v1687_v12 }
 0x380   : > { %6193 = vpow2.f32 %v1709_v15 }
 0x381   : > { %6195 = vpow2.f32 %v1889_v7 }
 0x382   : > { %6197 = vpow2.f32 %v1723_v18 }
 0x383   : > { %v7338_v54 = vpop.eup %6187  ;;  %6199 = vpow2.f32 %v1877_v29 }
 0x384   : > { %v1772_v35 = vsel %vm894_vm11, %v7338_v54, 0.0  ;;  %v7349_v25 = vpop.eup %6189  ;;  %6201 = vpow2.f32 %v1711_v46 }
 0x385   : > { %1773 = vadd.xlane.f32.xlu1 %v1772_v35  ;;  %1746 = vadd.xlane.f32.xlu2 %v1745_v39  ;;  %v7351_v3 = vpop.eup %6191  ;;  %v1906_v24 = vsel %vm894_vm11, %v7349_v25, 0.0 }
 0x386   : > { %1844 = vmax.xlane.f32.xlu0 %v1843_v51  ;;  %v1760_v31 = vsel %vm894_vm11, %v7351_v3, 0.0  ;;  %v7365_v43 = vpop.eup %6193 }
 0x387   : > { %v7367_v23 = vpop.eup %6195  ;;  %v1748_v44 = vsel %vm894_vm11, %v7365_v43, 0.0 }
 0x388   : > { %v7369_v1 = vpop.eup %6197  ;;  %v1930_v42 = vsel %vm894_vm11, %v7367_v23, 0.0 }
 0x389   : > { %v1769_v17 = vsel %vm894_vm11, %v7369_v1, 0.0  ;;  %v7377_v56 = vpop.eup %6199 }
 0x38a   : > { %v7379_v10 = vpop.eup %6201  ;;  %v1912_v35 = vsel %vm894_vm11, %v7377_v56, 0.0 }
 0x38b   : > { %v1751_v39 = vsel %vm894_vm11, %v7379_v10, 0.0 }
 0x38d   : > { %1907 = vadd.xlane.f32.xlu1 %v1906_v24  ;;  %1761 = vadd.xlane.f32.xlu2 %v1760_v31  ;;  %v6047_v31 = vpack.i.bf16 %v6937_v16, %v6923_v13 }
 0x38e   : > { %1847 = vmax.xlane.f32.xlu0 %v1846_v5 }
 0x395   : > { %1931 = vadd.xlane.f32.xlu1 %v1930_v42  ;;  %1749 = vadd.xlane.f32.xlu2 %v1748_v44 }
 0x396   : > { %1770 = vadd.xlane.f32.xlu0 %v1769_v17 }
 0x39d   : > { %1913 = vadd.xlane.f32.xlu2 %v1912_v35 }
 0x39e   : > { %1752 = vadd.xlane.f32.xlu0 %v1751_v39 }
 0x3a1   : > { %v1735_v51 = vpop.xlane.xlu0 %1734 }
 0x3a2   : > { %6203 = vrcp.f32 %v1735_v51 }
 0x3a8   : > { %v6204_v61 = vpop.eup %6203 }
 0x3a9   : > { %v1793_v15 = vmul.f32 %v6204_v61, %v7228_v47  ;;  %v1738_v7 = vpop.xlane.xlu2 %1737  ;;  %v1815_v18 = vpop.xlane.xlu0 %1814 }
 0x3aa   : > { %6205 = vrcp.f32 %v1738_v7  ;;  %v1857_v12 = vsub.f32 %v7234_v55, %v1815_v18  ;;  %v1692_v18 = vsub.f32 %v7190_v4, %v7305_v22 }
 0x3ab   : > { %5782 = vmatmul.msk.f32.vlgmr.msrb.gmra.mxu0 %vm894_vm11, %v1793_v15 }
 0x3ac   : > { %v1875_v24 = vmul.f32 1.442695, %v1857_v12  ;;  %2264 = vmatpush.msrb.mxu0 %v6036_v21  ;;  %v1721_v12 = vmul.f32 1.442695, %v1692_v18 }
 0x3ae   : > { %6207 = vpow2.f32 %v1875_v24  ;;  %6048 = vrot.lane.b32.xlu1 %v6047_v31, %s6531_s17 }
 0x3b0   : > { %v6206_v5 = vpop.eup %6205 }
 0x3b1   : > { %v1794_v47 = vmul.f32 %v6206_v5, %v7236_v58  ;;  %v1669_v29 = vpop.xlane.xlu2 %1668  ;;  %v1660_v46 = vpop.xlane.xlu0 %1659 }
 0x3b2   : > { %v1688_v42 = vsub.f32 %v7247_v2, %v1660_v46  ;;  %v1691_v13 = vsub.f32 %v7244_v0, %v1669_v29 }
 0x3b3   : > { %5783 = vmatmul.msk.f32.vlgmr.msrb.gmra.mxu1 %vm894_vm11, %v1794_v47 }
 0x3b4   : > { %v7396_v55 = vpop.eup %6207  ;;  %v1713_v44 = vmul.f32 1.442695, %v1688_v42  ;;  %2290 = vmatpush.msrb.mxu1 %v6040_v26  ;;  %v1719_v58 = vmul.f32 1.442695, %v1691_v13 }
 0x3b5   : > { %v1909_v16 = vsel %vm894_vm11, %v7396_v55, 0.0 }
 0x3b6   : > { %1910 = vadd.xlane.f32.xlu0 %v1909_v16  ;;  %6209 = vpow2.f32 %v1713_v44  ;;  %v6015_v44 = vunpack.i.l.bf16 %v7153_v28 }
 0x3b7   : > { %6211 = vpow2.f32 %v1719_v58 }
 0x3b9   : > { %v7401_v17 = vpop.xlane.xlu2 %1838  ;;  %v1827_v35 = vpop.xlane.xlu0 %1826 }
 0x3ba   : > { %v1861_v2 = vsub.f32 %v7255_v9, %v1827_v35 }
 0x3bc   : > { %v7403_v39 = vpop.eup %6209  ;;  %v1883_v61 = vmul.f32 1.442695, %v1861_v2 }
 0x3bd   : > { %v1754_v51 = vsel %vm894_vm11, %v7403_v39, 0.0  ;;  %v7408_v7 = vpop.eup %6211 }
 0x3be   : > { %1755 = vadd.xlane.f32.xlu0 %v1754_v51  ;;  %6213 = vpow2.f32 %v1883_v61  ;;  %v1763_v21 = vsel %vm894_vm11, %v7408_v7, 0.0 }
 0x3c1   : > { %v1833_v0 = vpop.xlane.xlu2 %1832  ;;  %v1809_v15 = vpop.xlane.xlu0 %1808 }
 0x3c2   : > { %v1855_v29 = vsub.f32 %v7266_v33, %v1809_v15 }
 0x3c4   : > { %v7415_v5 = vpop.eup %6213  ;;  %v1871_v46 = vmul.f32 1.442695, %v1855_v29 }
 0x3c5   : > { %v1921_v22 = vsel %vm894_vm11, %v7415_v5, 0.0 }
 0x3c6   : > { %1764 = vadd.xlane.f32.xlu0 %v1763_v21 }
 0x3c9   : > { %v1741_v24 = vpop.xlane.xlu2 %1740  ;;  %v1830_v9 = vpop.xlane.xlu0 %1829 }
 0x3ca   : > { %6215 = vrcp.f32 %v1741_v24  ;;  %v1862_v31 = vsub.f32 %v7276_v48, %v1830_v9  ;;  %v1863_v24 = vsub.f32 %v7268_v34, %v1833_v0 }
 0x3cb   : > { %6217 = vpow2.f32 %v1721_v12 }
 0x3cc   : > { %v1885_v47 = vmul.f32 1.442695, %v1862_v31 }
 0x3ce   : > { %6219 = vpow2.f32 %v1885_v47  ;;  %1922 = vadd.xlane.f32.xlu0 %v1921_v22  ;;  %v1887_v47 = vmul.f32 1.442695, %v1863_v24 }
 0x3cf   : > { %6221 = vpow2.f32 %v1871_v46 }
 0x3d0   : > { %v6216_v4 = vpop.eup %6215 }
 0x3d1   : > { %v1795_v26 = vmul.f32 %v6216_v4, %v7278_v50  ;;  %v1821_v42 = vpop.xlane.xlu0 %1820  ;;  %v7423_v13 = vpop.eup %6217  ;;  %v6016_v4 = vunpack.i.h.bf16 %v7153_v28 }
 0x3d2   : > { %v1859_v48 = vsub.f32 %v7286_v19, %v1821_v42  ;;  %v1766_v58 = vsel %vm894_vm11, %v7423_v13, 0.0 }
 0x3d3   : > { %5784 = vmatmul.msk.f32.vlgmr.msrb.gmra.mxu2 %vm894_vm11, %v1795_v26  ;;  %v6052_v26 = vpack.i.bf16 %v7036_v49, %v7012_v37 }
 0x3d4   : > { %v7426_v16 = vpop.eup %6219  ;;  %v1879_v33 = vmul.f32 1.442695, %v1859_v48  ;;  %2316 = vmatpush.msrb.mxu2 %v6015_v44 }
 0x3d5   : > { %v1924_v50 = vsel %vm894_vm11, %v7426_v16, 0.0  ;;  %v7432_v19 = vpop.eup %6221 }
 0x3d6   : > { %6223 = vpow2.f32 %v1879_v33  ;;  %1767 = vadd.xlane.f32.xlu0 %v1766_v58  ;;  %v1903_v61 = vsel %vm894_vm11, %v7432_v19, 0.0 }
 0x3d8   : > { %1925 = vadd.xlane.f32.xlu1 %v1924_v50 }
 0x3d9   : > { %v1842_v35 = vpop.xlane.xlu0 %1841 }
 0x3da   : > { %v1866_v37 = vsub.f32 %v7290_v40, %v1842_v35 }
 0x3dc   : > { %v7434_v2 = vpop.eup %6223 }
 0x3dd   : > { %v1915_v51 = vsel %vm894_vm11, %v7434_v2, 0.0 }
 0x3de   : > { %1916 = vadd.xlane.f32.xlu2 %v1915_v51  ;;  %1904 = vadd.xlane.f32.xlu0 %v1903_v61  ;;  %v6041_v51 = vunpack.i.h.bf16 %v7242_v62 }
 0x3e1   : > { %v1851_v15 = vpop.xlane.xlu0 %1850 }
 0x3e2   : > { %v1869_v40 = vsub.f32 %v7298_v60, %v1851_v15 }
 0x3e8   : > { %v1744_v18 = vpop.xlane.xlu2 %1743 }
 0x3e9   : > { %6225 = vrcp.f32 %v1744_v18  ;;  %v1824_v21 = vpop.xlane.xlu0 %1823 }
 0x3ea   : > { %v1860_v12 = vsub.f32 %v7311_v32, %v1824_v21  ;;  %v1865_v32 = vsub.f32 %v7257_v11, %v7401_v17  ;;  %v1893_v11 = vmul.f32 1.442695, %v1866_v37  ;;  %v1899_v21 = vmul.f32 1.442695, %v1869_v40 }
 0x3ec   : > { %v1881_v9 = vmul.f32 1.442695, %v1860_v12  ;;  %v1891_v28 = vmul.f32 1.442695, %v1865_v32  ;;  %v6046_v32 = vunpack.i.h.bf16 %v7224_v30 }
 0x3ee   : > { %6227 = vpow2.f32 %v1881_v9 }
 0x3ef   : > { %v6226_v31 = vpop.eup %6225  ;;  %6229 = vpow2.f32 %v1887_v47 }
 0x3f0   : > { %v1796_v29 = vmul.f32 %v6226_v31, %v7313_v63  ;;  %v1759_v22 = vpop.xlane.xlu2 %1758 }
 0x3f1   : > { %v7444_v46 = vpop.xlane.xlu0 %1853 }
 0x3f2   : > { %5785 = vmatmul.msk.f32.vlgmr.msrb.gmra.mxu3 %vm894_vm11, %v1796_v29  ;;  %6053 = vrot.lane.b32.xlu0 %v6052_v26, %s6531_s17 }
 0x3f3   : > { %2342 = vmatpush.msrb.mxu3 %v6016_v4 }
 0x3f4   : > { %v7450_v34 = vpop.eup %6227 }
 0x3f5   : > { %v1918_v63 = vsel %vm894_vm11, %v7450_v34, 0.0  ;;  %v7456_v44 = vpop.eup %6229 }
 0x3f6   : > { %1919 = vadd.xlane.f32.xlu2 %v1918_v63  ;;  %v1927_v49 = vsel %vm894_vm11, %v7456_v44, 0.0  ;;  %v1870_v63 = vsub.f32 %v7323_v41, %v7444_v46 }
 0x3f8   : > { %v1747_v0 = vpop.xlane.xlu2 %1746  ;;  %v1774_v35 = vpop.xlane.xlu1 %1773 }
 0x3f9   : > { %v1845_v42 = vpop.xlane.xlu0 %1844  ;;  %6231 = vrcp.f32 %v1747_v0 }
 0x3fa   : > { %6233 = vpow2.f32 %v1891_v28  ;;  %v1867_v62 = vsub.f32 %v7334_v8, %v1845_v42  ;;  %v1901_v42 = vmul.f32 1.442695, %v1870_v63 }
 0x3fb   : > { %6235 = vrcp.f32 %v1759_v22 }
 0x3fc   : > { %6237 = vpow2.f32 %v1893_v11  ;;  %v1895_v47 = vmul.f32 1.442695, %v1867_v62 }
 0x3fe   : > { %1928 = vadd.xlane.f32.xlu2 %v1927_v49 }
 0x3ff   : > { %v6232_v48 = vpop.eup %6231 }
 0x400   : > { %v1762_v17 = vpop.xlane.xlu2 %1761  ;;  %v1797_v33 = vmul.f32 %v6232_v48, %v7332_v27  ;;  %v7462_v50 = vpop.eup %6233  ;;  %v5995_v48 = vunpack.i.l.bf16 %v7074_v59 }
 0x401   : > { %v1848_v58 = vpop.xlane.xlu0 %1847  ;;  %v1933_v61 = vsel %vm894_vm11, %v7462_v50, 0.0  ;;  %v6236_v18 = vpop.eup %6235 }
 0x402   : > { %5786 = vmatmul.msk.f32.vlgmr.msra.gmra.mxu0 %vm894_vm11, %v1797_v33  ;;  %v1801_v27 = vmul.f32 %v6236_v18, %v7321_v57  ;;  %v7470_v9 = vpop.eup %6237  ;;  %v1868_v60 = vsub.f32 %v7353_v20, %v1848_v58  ;;  %v7477_v31 = vpop.xlane.xlu1 %1907 }
 0x403   : > { %2368 = vmatpush.msra.mxu0 %v6041_v51  ;;  %v1936_v15 = vsel %vm894_vm11, %v7470_v9, 0.0 }
 0x404   : > { %v1897_v29 = vmul.f32 1.442695, %v1868_v60 }
 0x406   : > { %1934 = vadd.xlane.f32.xlu2 %v1933_v61 }
 0x408   : > { %v1750_v12 = vpop.xlane.xlu2 %1749 }
 0x409   : > { %v1771_v24 = vpop.xlane.xlu0 %1770  ;;  %6239 = vrcp.f32 %v1750_v12 }
 0x40a   : > { %6241 = vrcp.f32 %v1771_v24  ;;  %5790 = vmatmul.msk.f32.vlgmr.msrb.gmra.mxu0 %vm894_vm11, %v1801_v27 }
 0x40b   : > { %6243 = vpow2.f32 %v1899_v21 }
 0x40c   : > { %6245 = vrcp.f32 %v1762_v17 }
 0x40e   : > { %1937 = vadd.xlane.f32.xlu2 %v1936_v15  ;;  %v6000_v15 = vunpack.i.l.bf16 %v7147_v14 }
 0x40f   : > { %v6240_v57 = vpop.eup %6239 }
 0x410   : > { %v6242_v22 = vpop.eup %6241  ;;  %v1798_v4 = vmul.f32 %v6240_v57, %v7365_v43  ;;  %v1914_v17 = vpop.xlane.xlu2 %1913 }
 0x411   : > { %v1753_v8 = vpop.xlane.xlu0 %1752  ;;  %v7480_v26 = vpop.eup %6243  ;;  %v1805_v20 = vmul.f32 %v6242_v22, %v7369_v1 }
 0x412   : > { %6247 = vrcp.f32 %v1753_v8  ;;  %5787 = vmatmul.msk.f32.vlgmr.msra.gmra.mxu1 %vm894_vm11, %v1798_v4  ;;  %v1945_v43 = vsel %vm894_vm11, %v7480_v26, 0.0  ;;  %v6246_v28 = vpop.eup %6245  ;;  %v7490_v1 = vpop.xlane.xlu1 %1931 }
 0x413   : > { %6249 = vpow2.f32 %v1895_v47  ;;  %2394 = vmatpush.msra.mxu1 %v6046_v32  ;;  %5794 = vmatmul.msk.f32.vlgmr.msra.gmra.mxu0 %vm894_vm11, %v1805_v20  ;;  %v1802_v49 = vmul.f32 %v6246_v28, %v7351_v3  ;;  %v6001_v47 = vunpack.i.h.bf16 %v7147_v14  ;;  %v6021_v20 = vunpack.i.h.bf16 %v7232_v52 }
 0x414   : > { %6251 = vpow2.f32 %v1897_v29 }
 0x415   : > { %6253 = vrcp.f32 %v1774_v35 }
 0x416   : > { %1946 = vadd.xlane.f32.xlu2 %v1945_v43  ;;  %6255 = vpow2.f32 %v1901_v42 }
 0x417   : > { %6257 = vrcp.f32 %v1914_v17 }
 0x418   : > { %v6248_v0 = vpop.eup %6247 }
 0x419   : > { %v7492_v37 = vpop.eup %6249  ;;  %v1799_v41 = vmul.f32 %v6248_v0, %v7379_v10 }
 0x41a   : > { %v7496_v46 = vpop.eup %6251  ;;  %5791 = vmatmul.msk.f32.vlgmr.msrb.gmra.mxu1 %vm894_vm11, %v1802_v49  ;;  %v1939_v11 = vsel %vm894_vm11, %v7492_v37, 0.0 }
 0x41b   : > { %5788 = vmatmul.msk.f32.vlgmr.msra.gmra.mxu2 %vm894_vm11, %v1799_v41  ;;  %v1942_v3 = vsel %vm894_vm11, %v7496_v46, 0.0  ;;  %v6254_v33 = vpop.eup %6253 }
 0x41c   : > { %2420 = vmatpush.msra.mxu2 %v5995_v48  ;;  %1940 = vadd.xlane.f32.xlu0 %v1939_v11  ;;  %v1806_v59 = vmul.f32 %v6254_v33, %v7338_v54  ;;  %v7506_v40 = vpop.eup %6255  ;;  %v6057_v54 = vpack.i.bf16 %v7054_v53, %v7023_v45 }
 0x41d   : > { %v1948_v35 = vsel %vm894_vm11, %v7506_v40, 0.0  ;;  %v6258_v61 = vpop.eup %6257 }
 0x41e   : > { %1943 = vadd.xlane.f32.xlu2 %v1942_v3  ;;  %v1970_v18 = vmul.f32 %v6258_v61, %v7377_v56  ;;  %v6045_v3 = vunpack.i.l.bf16 %v7224_v30 }
 0x420   : > { %v6049_v10 = vpop.permute.xlu1 %6048 }
 0x421   : > { %v6051_v58 = vunpack.i.h.bf16 %v6049_v10  ;;  %v6050_v51 = vunpack.i.l.bf16 %v6049_v10 }
 0x422   : > { %5795 = vmatmul.msk.f32.vlgmr.msra.gmra.mxu1 %vm894_vm11, %v1806_v59 }
 0x423   : > { %2472 = vmatpush.msrb.mxu0 %v6050_v51  ;;  %2498 = vmatpush.msrb.mxu1 %v6051_v58 }
 0x426   : > { %1949 = vadd.xlane.f32.xlu2 %v1948_v35 }
 0x429   : > { %v1911_v21 = vpop.xlane.xlu0 %1910 }
 0x42a   : > { %6259 = vrcp.f32 %v1911_v21  ;;  %5799 = vmatmul.msk.f32.vlgmr.msrb.gmra.mxu1 %vm894_vm11, %v1970_v18 }
 0x430   : > { %v6260_v12 = vpop.eup %6259  ;;  %6058 = vrot.lane.b32.xlu0 %v6057_v54, %s6531_s17 }
 0x431   : > { %v1969_v27 = vmul.f32 %v6260_v12, %v7396_v55  ;;  %v1756_v24 = vpop.xlane.xlu0 %1755 }
 0x432   : > { %6261 = vrcp.f32 %v1756_v24 }
 0x433   : > { %5798 = vmatmul.msk.f32.vlgmr.msrb.gmra.mxu0 %vm894_vm11, %v1969_v27 }
 0x438   : > { %v6262_v62 = vpop.eup %6261  ;;  %2763 = vrot.lane.b32.xlu0 %v7010_v36, %s6531_s17 }
 0x439   : > { %v1800_v56 = vmul.f32 %v6262_v62, %v7403_v39  ;;  %v1765_v60 = vpop.xlane.xlu0 %1764  ;;  %v7528_v39 = vpop.f32.mrf.mxu2 }
 0x43a   : > { %6263 = vrcp.f32 %v1765_v60 }
 0x43b   : > { %5789 = vmatmul.msk.f32.vlgmr.msra.gmra.mxu3 %vm894_vm11, %v1800_v56 }
 0x43c   : > { %2446 = vmatpush.msra.mxu3 %v6000_v15 }
 0x43e   : > { %2789 = vrot.lane.b32.xlu2 %v7089_v38, %s6531_s17  ;;  %v6020_v38 = vunpack.i.l.bf16 %v7232_v52 }
 0x440   : > { %v6264_v45 = vpop.eup %6263 }
 0x441   : > { %v1803_v53 = vmul.f32 %v6264_v45, %v7408_v7  ;;  %v1923_v55 = vpop.xlane.xlu0 %1922 }
 0x443   : > { %5792 = vmatmul.msk.f32.vlgmr.msrb.gmra.mxu2 %vm894_vm11, %v1803_v53 }
 0x444   : > { %2524 = vmatpush.msrb.mxu2 %v6001_v47 }
 0x449   : > { %v1768_v36 = vpop.xlane.xlu0 %1767 }
 0x44a   : > { %6265 = vrcp.f32 %v1768_v36 }
 0x44b   : > { %6267 = vrcp.f32 %v7477_v31  ;;  %v1926_v63 = vpop.xlane.xlu1 %1925 }
 0x450   : > { %v6266_v57 = vpop.eup %6265 }
 0x451   : > { %v1804_v29 = vmul.f32 %v6266_v57, %v7423_v13  ;;  %v1905_v22 = vpop.xlane.xlu0 %1904  ;;  %v1917_v14 = vpop.xlane.xlu2 %1916  ;;  %v6025_v13 = vunpack.i.l.bf16 %v7141_v6 }
 0x452   : > { %6269 = vrcp.f32 %v1905_v22  ;;  %v6268_v4 = vpop.eup %6267 }
 0x453   : > { %5793 = vmatmul.msk.f32.vlgmr.msrb.gmra.mxu3 %vm894_vm11, %v1804_v29  ;;  %6271 = vrcp.f32 %v1917_v14  ;;  %v1968_v32 = vmul.f32 %v6268_v4, %v7349_v25  ;;  %v6026_v25 = vunpack.i.h.bf16 %v7141_v6  ;;  %v7578_v29 = vpop.f32.mrf.mxu0  ;;  %v7581_v14 = vpop.f32.mrf.mxu1 }
 0x454   : > { %2550 = vmatpush.msrb.mxu3 %v6020_v38  ;;  %6273 = vrcp.f32 %v1923_v55  ;;  %v7567_v55 = vpop.f32.mrf.mxu3 }
 0x455   : > { %6275 = vrcp.f32 %v1926_v63  ;;  %v537_v63 = vld [vmem:[#allocation2 + $0x18] sm:$0xff] }
 0x456   : > { %v2110_v7 = vpop.f32.mrf.mxu2 }
 0x457   : > { %2819 = vrot.lane.b32.xlu0 %v2110_v7, %s6532_s18 }
 0x458   : > { %v6270_v8 = vpop.eup %6269 }
 0x459   : > { %v1967_v31 = vmul.f32 %v6270_v8, %v7432_v19  ;;  %v6272_v43 = vpop.eup %6271 }
 0x45a   : > { %v1971_v28 = vmul.f32 %v6272_v43, %v7434_v2  ;;  %v6274_v0 = vpop.eup %6273  ;;  %v536_v43 = vld [vmem:[#allocation2 + $0x10] sm:$0xff] }
 0x45b   : > { %5796 = vmatmul.msk.f32.vlgmr.msra.gmra.mxu2 %vm894_vm11, %v1967_v31  ;;  %5797 = vmatmul.msk.f32.vlgmr.msra.gmra.mxu3 %vm894_vm11, %v1968_v32  ;;  %v6276_v19 = vpop.eup %6275  ;;  %v1973_v41 = vmul.f32 %v6274_v0, %v7415_v5 }
 0x45c   : > { %2628 = vmatpush.msra.mxu2 %v6021_v20  ;;  %2654 = vmatpush.msra.mxu3 %v6025_v13  ;;  %v1974_v48 = vmul.f32 %v6276_v19, %v7426_v16 }
 0x463   : > { %5800 = vmatmul.msk.f32.vlgmr.msrb.gmra.mxu2 %vm894_vm11, %v1971_v28  ;;  %v535_v28 = vld [vmem:[#allocation2 + $0x8] sm:$0xff] }
 0x464   : > { %2732 = vmatpush.msrb.mxu2 %v6026_v25  ;;  %v6054_v52 = vpop.permute.xlu0 %6053  ;;  %v534_v25 = vld [vmem:[#allocation2] sm:$0xff] }
 0x465   : > { %v6056_v42 = vunpack.i.h.bf16 %v6054_v52  ;;  %v6055_v49 = vunpack.i.l.bf16 %v6054_v52 }
 0x467   : > { %2576 = vmatpush.msra.mxu0 %v6055_v49  ;;  %2602 = vmatpush.msra.mxu1 %v6056_v42 }
 0x468   : > { %5802 = vmatmul.msk.f32.vlgmr.msra.gmra.mxu0 %vm894_vm11, %v1973_v41  ;;  %5803 = vmatmul.msk.f32.vlgmr.msra.gmra.mxu1 %vm894_vm11, %v1974_v48 }
 0x469   : > { %v1920_v2 = vpop.xlane.xlu2 %1919 }
 0x46a   : > { %6277 = vrcp.f32 %v1920_v2 }
 0x46b   : > { %6279 = vrcp.f32 %v7490_v1 }
 0x470   : > { %v6278_v6 = vpop.eup %6277 }
 0x471   : > { %v1972_v11 = vmul.f32 %v6278_v6, %v7450_v34  ;;  %v1929_v17 = vpop.xlane.xlu2 %1928  ;;  %v6280_v5 = vpop.eup %6279 }
 0x472   : > { %6281 = vrcp.f32 %v1929_v17  ;;  %v1976_v33 = vmul.f32 %v6280_v5, %v7367_v23 }
 0x473   : > { %5801 = vmatmul.msk.f32.vlgmr.msrb.gmra.mxu3 %vm894_vm11, %v1972_v11 }
 0x474   : > { %2758 = vmatpush.msrb.mxu3 %v6045_v3 }
 0x478   : > { %v6282_v16 = vpop.eup %6281 }
 0x479   : > { %v1975_v10 = vmul.f32 %v6282_v16, %v7456_v44  ;;  %v1935_v59 = vpop.xlane.xlu2 %1934 }
 0x47b   : > { %5804 = vmatmul.msk.f32.vlgmr.msra.gmra.mxu2 %vm894_vm11, %v1975_v10  ;;  %5805 = vmatmul.msk.f32.vlgmr.msra.gmra.mxu3 %vm894_vm11, %v1976_v33 }
 0x47c   : > { %2961 = vmatpush.msra.mxu2 %v537_v63 }
 0x47e   : > { %2962 = vmatpush.msra.mxu2 %v536_v43 }
 0x47f   : > { %v2162_v38 = vpop.f32.mrf.mxu0 }
 0x480   : > { %2963 = vmatpush.msra.mxu2 %v535_v28 }
 0x481   : > { %v1938_v1 = vpop.xlane.xlu2 %1937 }
 0x482   : > { %2964 = vmatpush.msra.mxu2 %v534_v25 }
 0x487   : > { %v2266_v8 = vpop.f32.mrf.mxu0 }
 0x489   : > { %v1947_v34 = vpop.xlane.xlu2 %1946 }
 0x48f   : > { %v1941_v58 = vpop.xlane.xlu0 %1940  ;;  %v2188_v32 = vpop.f32.mrf.mxu1 }
 0x490   : > { %6283 = vrcp.f32 %v1941_v58  ;;  %v2370_v31 = vpop.f32.mrf.mxu0 }
 0x491   : > { %v1944_v30 = vpop.xlane.xlu2 %1943 }
 0x492   : > { %6285 = vrcp.f32 %v1944_v30 }
 0x493   : > { %6287 = vrcp.f32 %v1935_v59  ;;  %v542_v59 = vld [vmem:[#allocation4 + $0x18] sm:$0xff] }
 0x494   : > { %6289 = vrcp.f32 %v1938_v1  ;;  %3013 = vmatpush.msra.mxu3 %v542_v59  ;;  %v540_v1 = vld [vmem:[#allocation4 + $0x8] sm:$0xff] }
 0x495   : > { %6291 = vrcp.f32 %v1947_v34  ;;  %v539_v34 = vld [vmem:[#allocation4] sm:$0xff] }
 0x496   : > { %v6284_v51 = vpop.eup %6283 }
 0x497   : > { %v1979_v61 = vmul.f32 %v6284_v51, %v7492_v37  ;;  %v2292_v13 = vpop.f32.mrf.mxu1 }
 0x498   : > { %v6286_v35 = vpop.eup %6285 }
 0x499   : > { %v1980_v18 = vmul.f32 %v6286_v35, %v7496_v46  ;;  %5808 = vmatmul.msk.f32.vlgmr.msrb.gmra.mxu2 %vm894_vm11, %v1979_v61  ;;  %v1950_v23 = vpop.xlane.xlu2 %1949  ;;  %v6288_v21 = vpop.eup %6287 }
 0x49a   : > { %v6290_v54 = vpop.eup %6289  ;;  %6293 = vrcp.f32 %v1950_v23  ;;  %v1977_v46 = vmul.f32 %v6288_v21, %v7462_v50  ;;  %v2136_v50 = vpop.f32.mrf.mxu3 }
 0x49b   : > { %5809 = vmatmul.msk.f32.vlgmr.msrb.gmra.mxu3 %vm894_vm11, %v1980_v18  ;;  %v1978_v24 = vmul.f32 %v6290_v54, %v7470_v9  ;;  %v6292_v56 = vpop.eup %6291 }
 0x49c   : > { %v1981_v45 = vmul.f32 %v6292_v56, %v7480_v26 }
 0x49e   : > { %v2214_v44 = vpop.f32.mrf.mxu2 }
 0x49f   : > { %2835 = vrot.lane.b32.xlu2 %v2214_v44, %s6533_s19  ;;  %v2396_v0 = vpop.f32.mrf.mxu1 }
 0x4a0   : > { %v6294_v60 = vpop.eup %6293 }
 0x4a1   : > { %v2790_v62 = vpop.permute.xlu2 %2789  ;;  %v1982_v53 = vmul.f32 %v6294_v60, %v7506_v40 }
 0x4a2   : > { %v6059_v12 = vpop.permute.xlu0 %6058 }
 0x4a3   : > { %v6061_v27 = vunpack.i.h.bf16 %v6059_v12  ;;  %v6060_v37 = vunpack.i.l.bf16 %v6059_v12 }
 0x4a5   : > { %2680 = vmatpush.msrb.mxu0 %v6060_v37  ;;  %2706 = vmatpush.msrb.mxu1 %v6061_v27 }
 0x4a6   : > { %5806 = vmatmul.msk.f32.vlgmr.msrb.gmra.mxu0 %vm894_vm11, %v1977_v46  ;;  %5807 = vmatmul.msk.f32.vlgmr.msrb.gmra.mxu1 %vm894_vm11, %v1978_v24 }
 0x4a7   : > { %2810 = vmatpush.msra.mxu1 %v2790_v62  ;;  %v7590_v49 = vpop.f32.mrf.mxu1 }
 0x4aa   : > { %v2764_v15 = vpop.permute.xlu0 %2763 }
 0x4ab   : > { %2784 = vmatpush.msra.mxu0 %v2764_v15 }
 0x4ae   : > { %5810 = vmatmul.msk.f32.vlgmr.msra.gmra.mxu0 %vm894_vm11, %v1981_v45  ;;  %5811 = vmatmul.msk.f32.vlgmr.msra.gmra.mxu1 %vm894_vm11, %v1982_v53 }
 0x4b0   : > { %v7586_v20 = vpop.f32.mrf.mxu0 }
 0x4be   : > { %v2240_v9 = vpop.f32.mrf.mxu3 }
 0x4bf   : > { %2837 = vrot.lane.b32.xlu2 %v2240_v9, %s6533_s19 }
 0x4c6   : > { %v2318_v47 = vpop.f32.mrf.mxu2 }
 0x4c7   : > { %2851 = vrot.lane.b32.xlu1 %v2318_v47, %s6534_s20 }
 0x4c9   : > { %v2820_v11 = vpop.permute.xlu0 %2819 }
 0x4ca   : > { %v2863_v3 = vsel %vm894_vm11, %v7528_v39, %v2820_v11  ;;  %v541_v39 = vld [vmem:[#allocation4 + $0x10] sm:$0xff] }
 0x4cb   : > { %3014 = vmatpush.msra.mxu3 %v541_v39 }
 0x4cd   : > { %3015 = vmatpush.msra.mxu3 %v540_v1 }
 0x4cf   : > { %3016 = vmatpush.msra.mxu3 %v539_v34 }
 0x4d6   : > { %v2344_v57 = vpop.f32.mrf.mxu3 }
 0x4de   : > { %v7573_v36 = vpop.f32.mrf.mxu2  ;;  %v7576_v40 = vpop.f32.mrf.mxu3 }
 0x4e5   : > { %v2578_v19 = vpop.f32.mrf.mxu0  ;;  %v2604_v48 = vpop.f32.mrf.mxu1 }
 0x4e6   : > { %v2526_v26 = vpop.f32.mrf.mxu2 }
 0x4e7   : > { %2881 = vrot.lane.b32.xlu1 %v2526_v26, %s6532_s18 }
 0x4ef   : > { %2853 = vrot.lane.b32.xlu1 %v2344_v57, %s6534_s20 }
 0x4f6   : > { %v2552_v22 = vpop.f32.mrf.mxu3 }
 0x4f9   : > { %v2836_v17 = vpop.permute.xlu2 %2835 }
 0x4fa   : > { %v2868_v5 = vsel %vm2867_vm12, %v2863_v3, %v2836_v17  ;;  %v6441_v3 = vld [vmem:[%s6647_s14 + $0x8] sm:$0xff] }
 0x4fe   : > { %v2630_v7 = vpop.f32.mrf.mxu2  ;;  %v2656_v4 = vpop.f32.mrf.mxu3 }
 0x4ff   : > { %2899 = vrot.lane.b32.xlu2 %v2656_v4, %s6533_s19  ;;  %2897 = vrot.lane.b32.xlu0 %v2630_v7, %s6533_s19 }
 0x507   : > { %2883 = vrot.lane.b32.xlu0 %v2552_v22, %s6532_s18 }
 0x519   : > { %v2838_v35 = vpop.permute.xlu2 %2837 }
 0x51c   : > { %v2734_v52 = vpop.f32.mrf.mxu2 }
 0x51d   : > { %2913 = vrot.lane.b32.xlu0 %v2734_v52, %s6534_s20 }
 0x51e   : > { %v2760_v42 = vpop.f32.mrf.mxu3 }
 0x51f   : > { %2915 = vrot.lane.b32.xlu1 %v2760_v42, %s6534_s20 }
 0x523   : > { %v2682_v41 = vpop.f32.mrf.mxu0  ;;  %v2708_v6 = vpop.f32.mrf.mxu1 }
 0x524   : > { %2901 = vrot.lane.b32.xlu2 %v2682_v41, %s6533_s19 }
 0x525   : > { %2821 = vrot.lane.b32.xlu0 %v2136_v50, %s6532_s18 }
 0x52b   : > { %v2786_v2 = vpop.f32.mrf.mxu0  ;;  %v2812_v10 = vpop.f32.mrf.mxu1 }
 0x52c   : > { %2839 = vrot.lane.b32.xlu2 %v2266_v8, %s6533_s19  ;;  %2917 = vrot.lane.b32.xlu1 %v2786_v2, %s6534_s20 }
 0x52d   : > { %2885 = vrot.lane.b32.xlu0 %v2578_v19, %s6532_s18  ;;  %v6439_v19 = vld [vmem:[%s6656_s15] sm:$0xff] }
 0x534   : > { %2903 = vrot.lane.b32.xlu2 %v2708_v6, %s6533_s19  ;;  %2855 = vrot.lane.b32.xlu1 %v2370_v31, %s6534_s20 }
 0x535   : > { %2823 = vrot.lane.b32.xlu0 %v2162_v38, %s6532_s18 }
 0x539   : > { %v2852_v16 = vpop.permute.xlu1 %2851 }
 0x53a   : > { %v2873_v33 = vsel %vm2872_vm13, %v2868_v5, %v2852_v16 }
 0x53b   : > { %5812 = vmatmul.msk.f32.vlgmr.msra.gmra.mxu2 %vm544_vm0, %v2873_v33 }
 0x53c   : > { %2841 = vrot.lane.b32.xlu2 %v2292_v13, %s6533_s19  ;;  %2919 = vrot.lane.b32.xlu1 %v2812_v10, %s6534_s20  ;;  %v6442_v10 = vld [vmem:[%s6656_s15 + $0x8] sm:$0xff] }
 0x53d   : > { %2887 = vrot.lane.b32.xlu0 %v2604_v48, %s6532_s18  ;;  %v6440_v48 = vld [vmem:[%s6647_s14] sm:$0xff] }
 0x544   : > { %2857 = vrot.lane.b32.xlu1 %v2396_v0, %s6534_s20  ;;  %v6141_v0 = vld [vmem:[%s8584_s7] ss:$0 sm:$0xff] }
 0x545   : > { %2825 = vrot.lane.b32.xlu0 %v2188_v32, %s6532_s18 }
 0x559   : > { %v2882_v30 = vpop.permute.xlu1 %2881  ;;  %v2900_v54 = vpop.permute.xlu2 %2899 }
 0x55a   : > { %v2925_v18 = vsel %vm894_vm11, %v7573_v36, %v2882_v30  ;;  %v6443_v30 = vld [vmem:[%s6647_s14 + $0x10] sm:$0xff] }
 0x561   : > { %v2854_v61 = vpop.permute.xlu1 %2853 }
 0x571   : > { %v2898_v58 = vpop.permute.xlu0 %2897 }
 0x572   : > { %v2929_v23 = vsel %vm2867_vm12, %v2925_v18, %v2898_v58 }
 0x579   : > { %v2884_v51 = vpop.permute.xlu0 %2883 }
 0x57a   : > { %v2926_v12 = vsel %vm894_vm11, %v7576_v40, %v2884_v51 }
 0x57b   : > { %v2930_v46 = vsel %vm2867_vm12, %v2926_v12, %v2900_v54 }
 0x57e   : > { %v2902_v60 = vpop.permute.xlu2 %2901 }
 0x586   : > { %v2840_v47 = vpop.permute.xlu2 %2839 }
 0x58e   : > { %v2904_v38 = vpop.permute.xlu2 %2903 }
 0x58f   : > { %v2914_v44 = vpop.permute.xlu0 %2913 }
 0x590   : > { %v2933_v21 = vsel %vm2872_vm13, %v2929_v23, %v2914_v44  ;;  %v6444_v23 = vld [vmem:[%s6656_s15 + $0x10] sm:$0xff] }
 0x591   : > { %5816 = vmatmul.msk.f32.vlgmr.msra.gmra.mxu3 %vm544_vm0, %v2933_v21  ;;  %v2916_v27 = vpop.permute.xlu1 %2915 }
 0x592   : > { %v2934_v62 = vsel %vm2872_vm13, %v2930_v46, %v2916_v27  ;;  %v6445_v27 = vld [vmem:[%s6647_s14 + $0x18] sm:$0xff] }
 0x596   : > { %v2842_v13 = vpop.permute.xlu2 %2841 }
 0x597   : > { %v2822_v37 = vpop.permute.xlu0 %2821 }
 0x598   : > { %v2864_v24 = vsel %vm894_vm11, %v7567_v55, %v2822_v37 }
 0x599   : > { %5817 = vmatmul.msk.f32.gmra.mxu3 %vm544_vm0, %v2934_v62  ;;  %v2869_v56 = vsel %vm2867_vm12, %v2864_v24, %v2838_v35  ;;  %v8610_v24 = vld [vmem:[#allocation8_spill] sm:$0xff] }
 0x59a   : > { %v2874_v15 = vsel %vm2872_vm13, %v2869_v56, %v2854_v61 }
 0x59b   : > { %5813 = vmatmul.msk.f32.gmra.mxu2 %vm544_vm0, %v2874_v15 }
 0x59e   : > { %v2918_v45 = vpop.permute.xlu1 %2917 }
 0x59f   : > { %v2886_v53 = vpop.permute.xlu0 %2885 }
 0x5a0   : > { %v2927_v50 = vsel %vm894_vm11, %v7586_v20, %v2886_v53  ;;  %v6446_v53 = vld [vmem:[%s6656_s15 + $0x18] sm:$0xff] }
 0x5a1   : > { %v2931_v9 = vsel %vm2867_vm12, %v2927_v50, %v2902_v60 }
 0x5a2   : > { %v2935_v55 = vsel %vm2872_vm13, %v2931_v9, %v2918_v45 }
 0x5a3   : > { %5818 = vmatmul.msk.f32.gmra.mxu3 %vm544_vm0, %v2935_v55 }
 0x5a6   : > { %v2856_v36 = vpop.permute.xlu1 %2855 }
 0x5a7   : > { %v2824_v57 = vpop.permute.xlu0 %2823 }
 0x5a8   : > { %v2865_v26 = vsel %vm894_vm11, %v7578_v29, %v2824_v57 }
 0x5a9   : > { %v2870_v40 = vsel %vm2867_vm12, %v2865_v26, %v2840_v47 }
 0x5aa   : > { %v2875_v22 = vsel %vm2872_vm13, %v2870_v40, %v2856_v36 }
 0x5ab   : > { %5814 = vmatmul.msk.f32.gmra.mxu2 %vm544_vm0, %v2875_v22 }
 0x5ae   : > { %v2920_v7 = vpop.permute.xlu1 %2919 }
 0x5af   : > { %v2888_v4 = vpop.permute.xlu0 %2887 }
 0x5b0   : > { %v2928_v8 = vsel %vm894_vm11, %v7590_v49, %v2888_v4  ;;  %v6142_v49 = vld [vmem:[%s8586_s9] ss:$0 sm:$0xff] }
 0x5b1   : > { %v2932_v32 = vsel %vm2867_vm12, %v2928_v8, %v2904_v38 }
 0x5b2   : > { %v2936_v31 = vsel %vm2872_vm13, %v2932_v32, %v2920_v7 }
 0x5b3   : > { %5819 = vmatmul.msk.f32.gmra.mxu3 %vm544_vm0, %v2936_v31 }
 0x5b6   : > { %v2858_v63 = vpop.permute.xlu1 %2857 }
 0x5b7   : > { %v2826_v29 = vpop.permute.xlu0 %2825 }
 0x5b8   : > { %v2866_v20 = vsel %vm894_vm11, %v7581_v14, %v2826_v29 }
 0x5b9   : > { %v2871_v43 = vsel %vm2867_vm12, %v2866_v20, %v2842_v13 }
 0x5ba   : > { %v2876_v28 = vsel %vm2872_vm13, %v2871_v43, %v2858_v63 }
 0x5bb   : > { %5815 = vmatmul.msk.f32.gmra.mxu2 %vm544_vm0, %v2876_v28 }
 0x5be   : > { %v2966_v25 = vpop.f32.mrf.mxu2 }
 0x5bf   : > { %v2978_v52 = vadd.f32 %v6439_v19, %v2966_v25 }
 0x5c1   : > { %v7649_v42 = vadd.f32 %v6141_v0, %v2978_v52 }
 0x5c3   : > { %v3073_v14 = vsel %vm544_vm0, %v7649_v42, 0.0 }
 0x5c4   : > { %3074 = vadd.xlane.f32.xlu2 %v3073_v14 }
 0x614   : > { %v3018_v41 = vpop.f32.mrf.mxu3 }
 0x615   : > { %v3030_v2 = vadd.f32 %v6440_v48, %v3018_v41 }
 0x617   : > { %v7657_v6 = vadd.f32 %v6142_v49, %v3030_v2  ;;  %v5825_v2 = vld [vmem:[%s8579_s2 + $0x38] sm:$0xff] }
 0x618   : > { %3298 = vmatpush.msrb.mxu0 %v5825_v2 }
 0x619   : > { %v3175_v11 = vsel %vm544_vm0, %v7657_v6, 0.0 }
 0x61a   : > { %3176 = vadd.xlane.f32.xlu0 %v3175_v11 }
 0x61c   : > { %v3021_v17 = vpop.f32.mrf.mxu3 }
 0x61d   : > { %v3031_v5 = vadd.f32 %v6441_v3, %v3021_v17  ;;  %v5824_v3 = vld [vmem:[%s8579_s2 + $0x30] sm:$0xff] }
 0x61e   : > { %v2969_v16 = vpop.f32.mrf.mxu2  ;;  %3299 = vmatpush.msrb.mxu0 %v5824_v3 }
 0x61f   : > { %v7662_v33 = vadd.f32 %v6142_v49, %v3031_v5  ;;  %v2979_v59 = vadd.f32 %v6442_v10, %v2969_v16  ;;  %v5823_v16 = vld [vmem:[%s8579_s2 + $0x28] sm:$0xff]  ;;  %v5822_v10 = vld [vmem:[%s8579_s2 + $0x20] sm:$0xff] }
 0x620   : > { %3300 = vmatpush.msrb.mxu0 %v5823_v16 }
 0x621   : > { %v7665_v39 = vadd.f32 %v6141_v0, %v2979_v59  ;;  %v3178_v1 = vsel %vm544_vm0, %v7662_v33, 0.0 }
 0x622   : > { %3179 = vadd.xlane.f32.xlu1 %v3178_v1  ;;  %3301 = vmatpush.msrb.mxu0 %v5822_v10 }
 0x623   : > { %v3076_v34 = vsel %vm544_vm0, %v7665_v39, 0.0 }
 0x624   : > { %3077 = vadd.xlane.f32.xlu2 %v3076_v34 }
 0x626   : > { %v3024_v58 = vpop.f32.mrf.mxu3 }
 0x627   : > { %v3032_v51 = vadd.f32 %v6443_v30, %v3024_v58 }
 0x629   : > { %v7672_v35 = vadd.f32 %v6142_v49, %v3032_v51 }
 0x62b   : > { %8609 = vst [vmem:[#allocation9_spill] sm:$0xff] %v7672_v35  ;;  %v3181_v61 = vsel %vm544_vm0, %v7672_v35, 0.0 }
 0x62c   : > { %3182 = vadd.xlane.f32.xlu0 %v3181_v61 }
 0x62e   : > { %v2972_v18 = vpop.f32.mrf.mxu2 }
 0x62f   : > { %v2980_v44 = vadd.f32 %v6444_v23, %v2972_v18 }
 0x631   : > { %v7677_v21 = vadd.f32 %v6141_v0, %v2980_v44 }
 0x633   : > { %v3079_v54 = vsel %vm544_vm0, %v7677_v21, 0.0 }
 0x634   : > { %3080 = vadd.xlane.f32.xlu1 %v3079_v54 }
 0x636   : > { %v3027_v12 = vpop.f32.mrf.mxu3 }
 0x637   : > { %v3033_v37 = vadd.f32 %v6445_v27, %v3027_v12  ;;  %v3075_v46 = vpop.xlane.xlu2 %3074 }
 0x638   : > { %v3085_v62 = vmul.f32 %v3075_v46, %v8610_v24 }
 0x639   : > { %v7683_v56 = vadd.f32 %v6142_v49, %v3033_v37 }
 0x63a   : > { %v7686_v60 = vsub.f32 %v7649_v42, %v3085_v62 }
 0x63b   : > { %8611 = vst [vmem:[#allocation8_spill] sm:$0xff] %v7683_v56  ;;  %v3184_v15 = vsel %vm544_vm0, %v7683_v56, 0.0 }
 0x63c   : > { %3185 = vadd.xlane.f32.xlu2 %v3184_v15  ;;  %v3093_v9 = vmul.f32 %v7686_v60, %v7686_v60 }
 0x63e   : > { %v2975_v45 = vpop.f32.mrf.mxu2  ;;  %v3097_v47 = vsel %vm544_vm0, %v3093_v9, 0.0  ;;  %v7769_v9 = vld [vmem:[%s8588_s11 + $0x1] ss:$0 sm:$0xff] }
 0x63f   : > { %v2981_v50 = vadd.f32 %v6446_v53, %v2975_v45  ;;  %v7763_v45 = vld [vmem:[%s8587_s10 + $0x1] ss:$0 sm:$0xff] }
 0x641   : > { %v7693_v55 = vadd.f32 %v6141_v0, %v2981_v50 }
 0x643   : > { %8612 = vst [vmem:[#allocation10_spill] sm:$0xff] %v7693_v55  ;;  %v3082_v36 = vsel %vm544_vm0, %v7693_v55, 0.0 }
 0x644   : > { %3098 = vadd.xlane.f32.xlu2 %v3097_v47  ;;  %3083 = vadd.xlane.f32.xlu0 %v3082_v36 }
 0x68d   : > { %v3177_v57 = vpop.xlane.xlu0 %3176 }
 0x68e   : > { %v3187_v26 = vmul.f32 %v3177_v57, %v8610_v24  ;;  %v5830_v57 = vld [vmem:[%s8581_s4 + $0x38] sm:$0xff] }
 0x68f   : > { %3342 = vmatpush.msrb.mxu1 %v5830_v57 }
 0x690   : > { %v7700_v40 = vsub.f32 %v7657_v6, %v3187_v26  ;;  %v5828_v26 = vld [vmem:[%s8581_s4 + $0x28] sm:$0xff] }
 0x692   : > { %v3195_v22 = vmul.f32 %v7700_v40, %v7700_v40 }
 0x694   : > { %v3199_v38 = vsel %vm544_vm0, %v3195_v22, 0.0  ;;  %v5827_v22 = vld [vmem:[%s8581_s4 + $0x20] sm:$0xff] }
 0x695   : > { %v3180_v7 = vpop.xlane.xlu1 %3179  ;;  %3200 = vadd.xlane.f32.xlu1 %v3199_v38 }
 0x696   : > { %v3188_v4 = vmul.f32 %v3180_v7, %v8610_v24 }
 0x697   : > { %v3078_v8 = vpop.xlane.xlu2 %3077 }
 0x698   : > { %v7707_v32 = vsub.f32 %v7662_v33, %v3188_v4  ;;  %v3086_v31 = vmul.f32 %v3078_v8, %v8610_v24 }
 0x69a   : > { %v7711_v29 = vsub.f32 %v7665_v39, %v3086_v31  ;;  %v3196_v13 = vmul.f32 %v7707_v32, %v7707_v32 }
 0x69c   : > { %v3202_v20 = vsel %vm544_vm0, %v3196_v13, 0.0  ;;  %v3094_v63 = vmul.f32 %v7711_v29, %v7711_v29 }
 0x69d   : > { %3203 = vadd.xlane.f32.xlu0 %v3202_v20 }
 0x69e   : > { %v3100_v43 = vsel %vm544_vm0, %v3094_v63, 0.0 }
 0x69f   : > { %v3183_v28 = vpop.xlane.xlu0 %3182  ;;  %3101 = vadd.xlane.f32.xlu1 %v3100_v43 }
 0x6a0   : > { %v3189_v0 = vmul.f32 %v3183_v28, %v8610_v24 }
 0x6a2   : > { %v7721_v25 = vsub.f32 %v7672_v35, %v3189_v0 }
 0x6a4   : > { %v3197_v19 = vmul.f32 %v7721_v25, %v7721_v25 }
 0x6a6   : > { %v3205_v52 = vsel %vm544_vm0, %v3197_v19, 0.0 }
 0x6a7   : > { %3206 = vadd.xlane.f32.xlu2 %v3205_v52  ;;  %v3081_v14 = vpop.xlane.xlu1 %3080 }
 0x6a8   : > { %v3087_v49 = vmul.f32 %v3081_v14, %v8610_v24 }
 0x6aa   : > { %v7728_v41 = vsub.f32 %v7677_v21, %v3087_v49 }
 0x6ac   : > { %v3095_v48 = vmul.f32 %v7728_v41, %v7728_v41 }
 0x6ae   : > { %v3103_v11 = vsel %vm544_vm0, %v3095_v48, 0.0 }
 0x6af   : > { %v3186_v17 = vpop.xlane.xlu2 %3185  ;;  %3104 = vadd.xlane.f32.xlu0 %v3103_v11 }
 0x6b0   : > { %v3190_v5 = vmul.f32 %v3186_v17, %v8610_v24 }
 0x6b2   : > { %v7747_v59 = vsub.f32 %v7683_v56, %v3190_v5 }
 0x6b4   : > { %v3198_v1 = vmul.f32 %v7747_v59, %v7747_v59 }
 0x6b6   : > { %v3208_v34 = vsel %vm544_vm0, %v3198_v1, 0.0 }
 0x6b7   : > { %v3099_v58 = vpop.xlane.xlu2 %3098  ;;  %3209 = vadd.xlane.f32.xlu1 %v3208_v34  ;;  %v3084_v30 = vpop.xlane.xlu0 %3083 }
 0x6b8   : > { %v3109_v51 = vmul.f32 %v3099_v58, %v8610_v24  ;;  %v3088_v61 = vmul.f32 %v3084_v30, %v8610_v24 }
 0x6ba   : > { %v3113_v18 = vadd.f32 1e-05, %v3109_v51  ;;  %v7755_v23 = vsub.f32 %v7693_v55, %v3088_v61 }
 0x6bc   : > { %6295 = vrsqrt.f32 %v3113_v18  ;;  %v3096_v44 = vmul.f32 %v7755_v23, %v7755_v23  ;;  %vm3123_vm15 = vweird.f32 %v3113_v18 }
 0x6be   : > { %v3106_v54 = vsel %vm544_vm0, %v3096_v44, 0.0 }
 0x6bf   : > { %3107 = vadd.xlane.f32.xlu2 %v3106_v54 }
 0x6c2   : > { %v6296_v12 = vpop.eup %6295 }
 0x6c3   : > { %v3118_v27 = vmul.f32 %v6296_v12, %v3113_v18  ;;  %vm3124_vm14 = vweird.f32 %v6296_v12 }
 0x6c4   : > { %vm3125_vm1 = vmor %vm3123_vm15, %vm3124_vm14 }
 0x6c5   : > { %v3119_v37 = vmul.f32 %v6296_v12, %v3118_v27 }
 0x6c7   : > { %v3120_v46 = vmul.f32 0.5, %v3119_v37 }
 0x6c9   : > { %v3121_v62 = vsub.f32 1.5, %v3120_v46 }
 0x6cb   : > { %v3122_v15 = vmul.f32 %v6296_v12, %v3121_v62 }
 0x6cd   : > { %v3126_v53 = vsel %vm3125_vm1, %v6296_v12, %v3122_v15 }
 0x6ce   : > { %v3157_v50 = vmul.f32 %v3126_v53, %v7686_v60  ;;  %v5829_v60 = vld [vmem:[%s8581_s4 + $0x30] sm:$0xff] }
 0x6cf   : > { %3343 = vmatpush.msrb.mxu1 %v5829_v60 }
 0x6d0   : > { %v3164_v47 = vmul.f32 %v7763_v45, %v3157_v50 }
 0x6d1   : > { %3344 = vmatpush.msrb.mxu1 %v5828_v26 }
 0x6d2   : > { %v3171_v36 = vadd.f32 %v7769_v9, %v3164_v47 }
 0x6d3   : > { %3345 = vmatpush.msrb.mxu1 %v5827_v22 }
 0x6d4   : > { %5834 = vmatmul.msk.f32.vlgmr.msrb.gmra.mxu0 %vm544_vm0, %v3171_v36 }
 0x708   : > { %v3201_v38 = vpop.xlane.xlu1 %3200 }
 0x709   : > { %v3211_v7 = vmul.f32 %v3201_v38, %v8610_v24 }
 0x70b   : > { %v3215_v4 = vadd.f32 1e-05, %v3211_v7 }
 0x70d   : > { %6297 = vrsqrt.f32 %v3215_v4  ;;  %vm3225_vm3 = vweird.f32 %v3215_v4 }
 0x710   : > { %v3204_v8 = vpop.xlane.xlu0 %3203 }
 0x711   : > { %v3212_v31 = vmul.f32 %v3204_v8, %v8610_v24 }
 0x712   : > { %v3102_v13 = vpop.xlane.xlu1 %3101 }
 0x713   : > { %v6298_v20 = vpop.eup %6297  ;;  %v3216_v63 = vadd.f32 1e-05, %v3212_v31  ;;  %v3110_v43 = vmul.f32 %v3102_v13, %v8610_v24 }
 0x714   : > { %v3220_v28 = vmul.f32 %v6298_v20, %v3215_v4  ;;  %vm3226_vm2 = vweird.f32 %v6298_v20 }
 0x715   : > { %6299 = vrsqrt.f32 %v3216_v63  ;;  %v3114_v0 = vadd.f32 1e-05, %v3110_v43  ;;  %vm3227_vm4 = vmor %vm3225_vm3, %vm3226_vm2  ;;  %vm3235_vm6 = vweird.f32 %v3216_v63 }
 0x716   : > { %v3221_v19 = vmul.f32 %v6298_v20, %v3220_v28 }
 0x717   : > { %6301 = vrsqrt.f32 %v3114_v0  ;;  %vm3133_vm9 = vweird.f32 %v3114_v0 }
 0x718   : > { %v3222_v52 = vmul.f32 0.5, %v3221_v19 }
 0x71a   : > { %v3223_v14 = vsub.f32 1.5, %v3222_v52  ;;  %v3207_v49 = vpop.xlane.xlu2 %3206 }
 0x71b   : > { %v6300_v48 = vpop.eup %6299  ;;  %v3213_v2 = vmul.f32 %v3207_v49, %v8610_v24 }
 0x71c   : > { %v3224_v11 = vmul.f32 %v6298_v20, %v3223_v14  ;;  %v3230_v17 = vmul.f32 %v6300_v48, %v3216_v63  ;;  %vm3236_vm5 = vweird.f32 %v6300_v48 }
 0x71d   : > { %v6302_v3 = vpop.eup %6301  ;;  %v3217_v5 = vadd.f32 1e-05, %v3213_v2  ;;  %vm3237_vm8 = vmor %vm3235_vm6, %vm3236_vm5 }
 0x71e   : > { %v3228_v16 = vsel %vm3227_vm4, %v6298_v20, %v3224_v11  ;;  %v3231_v10 = vmul.f32 %v6300_v48, %v3230_v17  ;;  %v3128_v1 = vmul.f32 %v6302_v3, %v3114_v0  ;;  %vm3134_vm7 = vweird.f32 %v6302_v3 }
 0x71f   : > { %v3259_v34 = vmul.f32 %v3228_v16, %v7700_v40  ;;  %6303 = vrsqrt.f32 %v3217_v5  ;;  %vm3135_vm10 = vmor %vm3133_vm9, %vm3134_vm7  ;;  %vm3245_vm15 = vweird.f32 %v3217_v5 }
 0x720   : > { %v3232_v58 = vmul.f32 0.5, %v3231_v10  ;;  %v3129_v30 = vmul.f32 %v6302_v3, %v3128_v1 }
 0x721   : > { %v3263_v51 = vmul.f32 %v7763_v45, %v3259_v34 }
 0x722   : > { %v3233_v61 = vsub.f32 1.5, %v3232_v58  ;;  %v3130_v18 = vmul.f32 0.5, %v3129_v30  ;;  %v3105_v44 = vpop.xlane.xlu0 %3104 }
 0x723   : > { %v3111_v54 = vmul.f32 %v3105_v44, %v8610_v24  ;;  %v3267_v12 = vadd.f32 %v7769_v9, %v3263_v51 }
 0x724   : > { %v3234_v27 = vmul.f32 %v6300_v48, %v3233_v61  ;;  %v3131_v37 = vsub.f32 1.5, %v3130_v18 }
 0x725   : > { %v6304_v46 = vpop.eup %6303  ;;  %v3115_v40 = vadd.f32 1e-05, %v3111_v54  ;;  %5838 = vmatmul.msk.f32.vlgmr.msrb.gmra.mxu1 %vm544_vm0, %v3267_v12 }
 0x726   : > { %v3132_v62 = vmul.f32 %v6302_v3, %v3131_v37  ;;  %v3240_v15 = vmul.f32 %v6304_v46, %v3217_v5  ;;  %v3238_v53 = vsel %vm3237_vm8, %v6300_v48, %v3234_v27  ;;  %vm3246_vm14 = vweird.f32 %v6304_v46 }
 0x727   : > { %6305 = vrsqrt.f32 %v3115_v40  ;;  %v3260_v50 = vmul.f32 %v3238_v53, %v7707_v32  ;;  %vm3247_vm1 = vmor %vm3245_vm15, %vm3246_vm14  ;;  %vm3143_vm3 = vweird.f32 %v3115_v40 }
 0x728   : > { %v3136_v47 = vsel %vm3135_vm10, %v6302_v3, %v3132_v62  ;;  %v3241_v36 = vmul.f32 %v6304_v46, %v3240_v15 }
 0x729   : > { %v3264_v57 = vmul.f32 %v7763_v45, %v3260_v50  ;;  %v3158_v60 = vmul.f32 %v3136_v47, %v7711_v29 }
 0x72a   : > { %v3242_v26 = vmul.f32 0.5, %v3241_v36  ;;  %v3210_v22 = vpop.xlane.xlu1 %3209 }
 0x72b   : > { %v3214_v38 = vmul.f32 %v3210_v22, %v8610_v24  ;;  %v3268_v7 = vadd.f32 %v7769_v9, %v3264_v57  ;;  %v3165_v4 = vmul.f32 %v7763_v45, %v3158_v60 }
 0x72c   : > { %v3243_v8 = vsub.f32 1.5, %v3242_v26 }
 0x72d   : > { %v6306_v31 = vpop.eup %6305  ;;  %v3218_v13 = vadd.f32 1e-05, %v3214_v38  ;;  %5839 = vmatmul.msk.f32.gmra.mxu1 %vm544_vm0, %v3268_v7  ;;  %v3172_v32 = vadd.f32 %v7769_v9, %v3165_v4 }
 0x72e   : > { %v3244_v20 = vmul.f32 %v6304_v46, %v3243_v8  ;;  %v3138_v63 = vmul.f32 %v6306_v31, %v3115_v40  ;;  %vm3144_vm2 = vweird.f32 %v6306_v31 }
 0x72f   : > { %6307 = vrsqrt.f32 %v3218_v13  ;;  %5835 = vmatmul.msk.f32.gmra.mxu0 %vm544_vm0, %v3172_v32  ;;  %vm3145_vm4 = vmor %vm3143_vm3, %vm3144_vm2  ;;  %vm3255_vm6 = vweird.f32 %v3218_v13 }
 0x730   : > { %v3248_v29 = vsel %vm3247_vm1, %v6304_v46, %v3244_v20  ;;  %v3139_v43 = vmul.f32 %v6306_v31, %v3138_v63 }
 0x731   : > { %v3261_v28 = vmul.f32 %v3248_v29, %v7721_v25 }
 0x732   : > { %v3140_v0 = vmul.f32 0.5, %v3139_v43  ;;  %v3108_v19 = vpop.xlane.xlu2 %3107 }
 0x733   : > { %v3112_v52 = vmul.f32 %v3108_v19, %v8610_v24  ;;  %v3265_v14 = vmul.f32 %v7763_v45, %v3261_v28 }
 0x734   : > { %v3141_v49 = vsub.f32 1.5, %v3140_v0 }
 0x735   : > { %v6308_v48 = vpop.eup %6307  ;;  %v3116_v2 = vadd.f32 1e-05, %v3112_v52  ;;  %v3269_v11 = vadd.f32 %v7769_v9, %v3265_v14 }
 0x736   : > { %v3142_v17 = vmul.f32 %v6306_v31, %v3141_v49  ;;  %v3250_v3 = vmul.f32 %v6308_v48, %v3218_v13  ;;  %vm3256_vm5 = vweird.f32 %v6308_v48 }
 0x737   : > { %6309 = vrsqrt.f32 %v3116_v2  ;;  %5840 = vmatmul.msk.f32.gmra.mxu1 %vm544_vm0, %v3269_v11  ;;  %vm3257_vm7 = vmor %vm3255_vm6, %vm3256_vm5  ;;  %vm3153_vm9 = vweird.f32 %v3116_v2 }
 0x738   : > { %v3146_v25 = vsel %vm3145_vm4, %v6306_v31, %v3142_v17  ;;  %v3251_v5 = vmul.f32 %v6308_v48, %v3250_v3 }
 0x739   : > { %v3159_v16 = vmul.f32 %v3146_v25, %v7728_v41 }
 0x73a   : > { %v3252_v24 = vmul.f32 0.5, %v3251_v5 }
 0x73b   : > { %v3166_v10 = vmul.f32 %v7763_v45, %v3159_v16 }
 0x73c   : > { %v3253_v1 = vsub.f32 1.5, %v3252_v24 }
 0x73d   : > { %v6310_v34 = vpop.eup %6309  ;;  %v3173_v58 = vadd.f32 %v7769_v9, %v3166_v10 }
 0x73e   : > { %v3254_v30 = vmul.f32 %v6308_v48, %v3253_v1  ;;  %v3148_v51 = vmul.f32 %v6310_v34, %v3116_v2  ;;  %vm3154_vm8 = vweird.f32 %v6310_v34 }
 0x73f   : > { %5836 = vmatmul.msk.f32.gmra.mxu0 %vm544_vm0, %v3173_v58  ;;  %vm3155_vm10 = vmor %vm3153_vm9, %vm3154_vm8 }
 0x740   : > { %v3258_v61 = vsel %vm3257_vm7, %v6308_v48, %v3254_v30  ;;  %v3149_v18 = vmul.f32 %v6310_v34, %v3148_v51 }
 0x741   : > { %v3262_v44 = vmul.f32 %v3258_v61, %v7747_v59  ;;  %v6145_v59 = vld [vmem:[%s8580_s3 + $0x1] ss:$0 sm:$0xff] }
 0x742   : > { %v3150_v54 = vmul.f32 0.5, %v3149_v18 }
 0x743   : > { %v3266_v41 = vmul.f32 %v7763_v45, %v3262_v44 }
 0x744   : > { %v3151_v12 = vsub.f32 1.5, %v3150_v54 }
 0x745   : > { %v3270_v27 = vadd.f32 %v7769_v9, %v3266_v41 }
 0x746   : > { %v3152_v37 = vmul.f32 %v6310_v34, %v3151_v12 }
 0x747   : > { %5841 = vmatmul.msk.f32.gmra.mxu1 %vm544_vm0, %v3270_v27 }
 0x748   : > { %v3156_v46 = vsel %vm3155_vm10, %v6310_v34, %v3152_v37 }
 0x749   : > { %v3160_v40 = vmul.f32 %v3156_v46, %v7755_v23  ;;  %v6146_v23 = vld [vmem:[%s8582_s5 + $0x1] ss:$0 sm:$0xff] }
 0x74b   : > { %v3167_v62 = vmul.f32 %v7763_v45, %v3160_v40 }
 0x74d   : > { %v3174_v15 = vadd.f32 %v7769_v9, %v3167_v62 }
 0x74f   : > { %5837 = vmatmul.msk.f32.gmra.mxu0 %vm544_vm0, %v3174_v15 }
 0x751   : > { %v3303_v53 = vpop.f32.mrf.mxu0 }
 0x752   : > { %v7824_v50 = vadd.f32 %v6145_v59, %v3303_v53 }
 0x754   : > { %3363 = vrot.lane.b32.xlu1 %v7824_v50, %s6528_s27  ;;  %3371 = vrot.lane.b32.xlu2 %v7824_v50, %s6530_s16 }
 0x75c   : > { %3379 = vrot.lane.b32.xlu1 %v7824_v50, %s6529_s28 }
 0x7a2   : > { %v3347_v45 = vpop.f32.mrf.mxu1 }
 0x7a3   : > { %v7835_v9 = vadd.f32 %v6146_v23, %v3347_v45 }
 0x7a5   : > { %5842 = vmatpush.xpose.msk.msrb.mxu2 %vm894_vm11, %v7835_v9 }
 0x7a8   : > { %5843 = vmatmul.msk.f32.vlgmr.msrb.gmra.mxu2 %vm894_vm11, %v7824_v50 }
 0x7aa   : > { %v3350_v47 = vpop.f32.mrf.mxu1 }
 0x7ab   : > { %v7841_v36 = vadd.f32 %v6146_v23, %v3350_v47 }
 0x7ac   : > { %v3306_v57 = vpop.f32.mrf.mxu0 }
 0x7ad   : > { %v7843_v60 = vadd.f32 %v6145_v59, %v3306_v57  ;;  %3401 = vrot.lane.b32.xlu1 %v7841_v36, %s6530_s16  ;;  %3393 = vrot.lane.b32.xlu2 %v7841_v36, %s6528_s27  ;;  %v6062_v32 = vpack.i.bf16 %v7841_v36, %v7835_v9 }
 0x7ae   : > { %5844 = vmatpush.xpose.msk.msrb.mxu3 %vm894_vm11, %v7841_v36  ;;  %v3372_v29 = vpop.permute.xlu2 %3371 }
 0x7af   : > { %3365 = vrot.lane.b32.xlu0 %v7843_v60, %s6528_s27 }
 0x7b1   : > { %5845 = vmatmul.msk.f32.vlgmr.msrb.gmra.mxu3 %vm894_vm11, %v7843_v60 }
 0x7b4   : > { %v3353_v26 = vpop.f32.mrf.mxu1 }
 0x7b5   : > { %v7855_v22 = vadd.f32 %v6146_v23, %v3353_v26  ;;  %3373 = vrot.lane.b32.xlu2 %v7843_v60, %s6530_s16 }
 0x7b7   : > { %3391 = vrot.lane.b32.xlu0 %v7835_v9, %s6528_s27  ;;  %5846 = vmatpush.xpose.msk.msra.mxu0 %vm894_vm11, %v7855_v22 }
 0x7b8   : > { %3395 = vrot.lane.b32.xlu1 %v7855_v22, %s6528_s27 }
 0x7bc   : > { %v3309_v38 = vpop.f32.mrf.mxu0 }
 0x7bd   : > { %v7865_v7 = vadd.f32 %v6145_v59, %v3309_v38  ;;  %3381 = vrot.lane.b32.xlu2 %v7843_v60, %s6529_s28 }
 0x7bf   : > { %3399 = vrot.lane.b32.xlu0 %v7835_v9, %s6530_s16  ;;  %5847 = vmatmul.msk.f32.vlgmr.msra.gmra.mxu0 %vm894_vm11, %v7865_v7 }
 0x7c0   : > { %3403 = vrot.lane.b32.xlu1 %v7855_v22, %s6530_s16 }
 0x7c4   : > { %v3356_v4 = vpop.f32.mrf.mxu1 }
 0x7c5   : > { %v7875_v8 = vadd.f32 %v6146_v23, %v3356_v4  ;;  %3375 = vrot.lane.b32.xlu2 %v7865_v7, %s6530_s16 }
 0x7c6   : > { %v3364_v20 = vpop.permute.xlu1 %3363 }
 0x7c7   : > { %3407 = vrot.lane.b32.xlu0 %v7835_v9, %s6529_s28  ;;  %5848 = vmatpush.xpose.msk.msra.mxu1 %vm894_vm11, %v7875_v8  ;;  %v6067_v63 = vpack.i.bf16 %v3364_v20, %v7843_v60 }
 0x7c8   : > { %3383 = vrot.lane.b32.xlu1 %v7865_v7, %s6529_s28 }
 0x7cc   : > { %v3312_v31 = vpop.f32.mrf.mxu0 }
 0x7cd   : > { %v7885_v13 = vadd.f32 %v6145_v59, %v3312_v31  ;;  %3397 = vrot.lane.b32.xlu2 %v7875_v8, %s6528_s27 }
 0x7ce   : > { %v3380_v28 = vpop.permute.xlu1 %3379 }
 0x7cf   : > { %5849 = vmatmul.msk.f32.vlgmr.msra.gmra.mxu1 %vm894_vm11, %v7885_v13  ;;  %3367 = vrot.lane.b32.xlu0 %v7865_v7, %s6528_s27 }
 0x7d0   : > { %3405 = vrot.lane.b32.xlu1 %v7875_v8, %s6530_s16 }
 0x7d5   : > { %3377 = vrot.lane.b32.xlu2 %v7885_v13, %s6530_s16 }
 0x7d7   : > { %3369 = vrot.lane.b32.xlu0 %v7885_v13, %s6528_s27 }
 0x7d8   : > { %6063 = vrot.lane.b32.xlu1 %v6062_v32, %s6531_s17 }
 0x7dd   : > { %3385 = vrot.lane.b32.xlu2 %v7885_v13, %s6529_s28 }
 0x7df   : > { %3409 = vrot.lane.b32.xlu0 %v7841_v36, %s6529_s28 }
 0x7e0   : > { %6068 = vrot.lane.b32.xlu1 %v6067_v63, %s6531_s17 }
 0x7e7   : > { %3411 = vrot.lane.b32.xlu0 %v7855_v22, %s6529_s28 }
 0x7ef   : > { %3413 = vrot.lane.b32.xlu0 %v7875_v8, %s6529_s28 }
 0x807   : > { %v7912_v43 = vpop.permute.xlu2 %3393 }
 0x808   : > { %5852 = vmatpush.xpose.msk.msra.mxu3 %vm894_vm11, %v7912_v43 }
 0x80f   : > { %v7916_v0 = vpop.permute.xlu2 %3373 }
 0x810   : > { %v6077_v19 = vpack.i.bf16 %v3380_v28, %v7916_v0 }
 0x812   : > { %6078 = vrot.lane.b32.xlu1 %v6077_v19, %s6531_s17 }
 0x817   : > { %v7920_v52 = vpop.permute.xlu2 %3381 }
 0x81f   : > { %v7922_v14 = vpop.permute.xlu1 %3401  ;;  %v7924_v49 = vpop.permute.xlu2 %3375 }
 0x820   : > { %5860 = vmatpush.xpose.msk.msrb.mxu3 %vm894_vm11, %v7922_v14 }
 0x821   : > { %v3366_v48 = vpop.permute.xlu0 %3365 }
 0x822   : > { %v6072_v2 = vpack.i.bf16 %v3372_v29, %v3366_v48  ;;  %5853 = vmatmul.msk.f32.vlgmr.msra.gmra.mxu3 %vm894_vm11, %v3366_v48 }
 0x824   : > { %6073 = vrot.lane.b32.xlu0 %v6072_v2, %s6531_s17 }
 0x827   : > { %v7930_v11 = vpop.permute.xlu2 %3397 }
 0x828   : > { %5856 = vmatpush.xpose.msk.msrb.mxu1 %vm894_vm11, %v7930_v11 }
 0x829   : > { %v3392_v17 = vpop.permute.xlu0 %3391 }
 0x82a   : > { %v7934_v3 = vpop.permute.xlu1 %3395  ;;  %v6097_v25 = vpack.i.bf16 %v7912_v43, %v3392_v17  ;;  %5850 = vmatpush.xpose.msk.msra.mxu2 %vm894_vm11, %v3392_v17  ;;  %5861 = vmatmul.msk.f32.vlgmr.msrb.gmra.mxu3 %vm894_vm11, %v7916_v0 }
 0x82b   : > { %5854 = vmatpush.xpose.msk.msrb.mxu0 %vm894_vm11, %v7934_v3  ;;  %v6112_v37 = vpack.i.bf16 %v7934_v3, %v7875_v8  ;;  %v3436_v45 = vpop.f32.mrf.mxu2 }
 0x82c   : > { %6098 = vrot.lane.b32.xlu2 %v6097_v25, %s6531_s17 }
 0x82d   : > { %5851 = vmatmul.msk.f32.vlgmr.msra.gmra.mxu2 %vm894_vm11, %v3364_v20 }
 0x82f   : > { %v7944_v5 = vpop.permute.xlu2 %3377 }
 0x831   : > { %v3400_v24 = vpop.permute.xlu0 %3399 }
 0x832   : > { %v7948_v10 = vpop.permute.xlu1 %3403  ;;  %5858 = vmatpush.xpose.msk.msrb.mxu2 %vm894_vm11, %v3400_v24  ;;  %v6092_v54 = vpack.i.bf16 %v7855_v22, %v3400_v24 }
 0x833   : > { %5862 = vmatpush.xpose.msk.msra.mxu0 %vm894_vm11, %v7948_v10  ;;  %v6117_v51 = vpack.i.bf16 %v7948_v10, %v7930_v11 }
 0x835   : > { %5859 = vmatmul.msk.f32.vlgmr.msrb.gmra.mxu2 %vm894_vm11, %v3372_v29 }
 0x839   : > { %v3408_v1 = vpop.permute.xlu0 %3407 }
 0x83a   : > { %v7954_v34 = vpop.permute.xlu1 %3383  ;;  %v6102_v58 = vpack.i.bf16 %v3408_v1, %v7922_v14  ;;  %5866 = vmatpush.xpose.msk.msra.mxu2 %vm894_vm11, %v3408_v1 }
 0x83c   : > { %6103 = vrot.lane.b32.xlu2 %v6102_v58, %s6531_s17 }
 0x83d   : > { %5867 = vmatmul.msk.f32.vlgmr.msra.gmra.mxu2 %vm894_vm11, %v3380_v28 }
 0x83e   : > { %5874 = vmatpush.xpose.msk.msrb.mxu2 %vm894_vm11, %v7824_v50 }
 0x841   : > { %v3368_v30 = vpop.permute.xlu0 %3367 }
 0x842   : > { %5882 = vmatpush.xpose.msk.msra.mxu2 %vm894_vm11, %v3364_v20  ;;  %v7965_v61 = vpop.permute.xlu1 %3405  ;;  %v6082_v18 = vpack.i.bf16 %v3368_v30, %v7885_v13  ;;  %5855 = vmatmul.msk.f32.vlgmr.msrb.gmra.mxu0 %vm894_vm11, %v3368_v30 }
 0x843   : > { %5864 = vmatpush.xpose.msk.msra.mxu1 %vm894_vm11, %v7965_v61 }
 0x844   : > { %6118 = vrot.lane.b32.xlu2 %v6117_v51, %s6531_s17  ;;  %6083 = vrot.lane.b32.xlu0 %v6082_v18, %s6531_s17 }
 0x845   : > { %5875 = vmatmul.msk.f32.vlgmr.msrb.gmra.mxu2 %vm894_vm11, %v7835_v9  ;;  %v8047_v9 = vmul.f32 0.1, %v3436_v45 }
 0x846   : > { %5890 = vmatpush.xpose.msk.msrb.mxu2 %vm894_vm11, %v3372_v29 }
 0x847   : > { %v4151_v47 = vsel %vm894_vm11, %v8047_v9, -inf }
 0x849   : > { %v3370_v44 = vpop.permute.xlu0 %3369 }
 0x84a   : > { %v6087_v41 = vpack.i.bf16 %v3370_v44, %v7920_v52  ;;  %5857 = vmatmul.msk.f32.vlgmr.msrb.gmra.mxu1 %vm894_vm11, %v3370_v44  ;;  %5863 = vmatmul.msk.f32.vlgmr.msra.gmra.mxu0 %vm894_vm11, %v7924_v49  ;;  %v6064_v12 = vpop.permute.xlu1 %6063 }
 0x84b   : > { %v6065_v40 = vunpack.i.l.bf16 %v6064_v12  ;;  %v6066_v23 = vunpack.i.h.bf16 %v6064_v12 }
 0x84c   : > { %6093 = vrot.lane.b32.xlu0 %v6092_v54, %s6531_s17  ;;  %6088 = vrot.lane.b32.xlu1 %v6087_v41, %s6531_s17  ;;  %v3508_v31 = vpop.f32.mrf.mxu1 }
 0x84d   : > { %5883 = vmatmul.msk.f32.vlgmr.msra.gmra.mxu2 %vm894_vm11, %v3392_v17 }
 0x84e   : > { %5898 = vmatpush.xpose.msk.msra.mxu2 %vm894_vm11, %v3380_v28 }
 0x851   : > { %v3410_v27 = vpop.permute.xlu0 %3409 }
 0x852   : > { %v6107_v46 = vpack.i.bf16 %v7824_v50, %v3410_v27  ;;  %5865 = vmatmul.msk.f32.vlgmr.msra.gmra.mxu1 %vm894_vm11, %v7944_v5  ;;  %5868 = vmatpush.xpose.msk.msra.mxu3 %vm894_vm11, %v3410_v27  ;;  %v8016_v50 = vpop.permute.xlu2 %3385 }
 0x854   : > { %6113 = vrot.lane.b32.xlu1 %v6112_v37, %s6531_s17  ;;  %6108 = vrot.lane.b32.xlu0 %v6107_v46, %s6531_s17 }
 0x855   : > { %5869 = vmatmul.msk.f32.vlgmr.msra.gmra.mxu3 %vm894_vm11, %v7920_v52  ;;  %5891 = vmatmul.msk.f32.vlgmr.msrb.gmra.mxu2 %vm894_vm11, %v3400_v24 }
 0x856   : > { %5876 = vmatpush.xpose.msk.msrb.mxu3 %vm894_vm11, %v7843_v60  ;;  %4524 = vmatpush.msrb.mxu2 %v6065_v40  ;;  %v3484_v60 = vpop.f32.mrf.mxu0 }
 0x857   : > { %v8059_v4 = vmul.f32 0.1, %v3484_v60 }
 0x859   : > { %v3412_v62 = vpop.permute.xlu0 %3411 }
 0x85a   : > { %5884 = vmatpush.xpose.msk.msra.mxu3 %vm894_vm11, %v3366_v48  ;;  %v6122_v15 = vpack.i.bf16 %v3412_v62, %v7965_v61  ;;  %5870 = vmatpush.xpose.msk.msrb.mxu0 %vm894_vm11, %v3412_v62 }
 0x85c   : > { %6123 = vrot.lane.b32.xlu0 %v6122_v15, %s6531_s17 }
 0x85d   : > { %5871 = vmatmul.msk.f32.vlgmr.msrb.gmra.mxu0 %vm894_vm11, %v7954_v34  ;;  %5877 = vmatmul.msk.f32.vlgmr.msrb.gmra.mxu3 %vm894_vm11, %v7841_v36  ;;  %v3460_v36 = vpop.f32.mrf.mxu3 }
 0x85e   : > { %5878 = vmatpush.xpose.msk.msra.mxu0 %vm894_vm11, %v7865_v7  ;;  %5892 = vmatpush.xpose.msk.msrb.mxu3 %vm894_vm11, %v7916_v0  ;;  %v8054_v57 = vmul.f32 0.1, %v3460_v36 }
 0x85f   : > { %5899 = vmatmul.msk.f32.vlgmr.msra.gmra.mxu2 %vm894_vm11, %v3408_v1 }
 0x860   : > { %v4154_v26 = vsel %vm894_vm11, %v8054_v57, -inf }
 0x861   : > { %v3414_v59 = vpop.permute.xlu0 %3413 }
 0x862   : > { %5886 = vmatpush.xpose.msk.msrb.mxu0 %vm894_vm11, %v3368_v30  ;;  %v6127_v53 = vpack.i.bf16 %v7865_v7, %v3414_v59  ;;  %5872 = vmatpush.xpose.msk.msrb.mxu1 %vm894_vm11, %v3414_v59 }
 0x864   : > { %6128 = vrot.lane.b32.xlu2 %v6127_v53, %s6531_s17 }
 0x865   : > { %5873 = vmatmul.msk.f32.vlgmr.msrb.gmra.mxu1 %vm894_vm11, %v8016_v50  ;;  %5879 = vmatmul.msk.f32.vlgmr.msra.gmra.mxu0 %vm894_vm11, %v7855_v22 }
 0x866   : > { %5880 = vmatpush.xpose.msk.msra.mxu1 %vm894_vm11, %v7885_v13  ;;  %5885 = vmatmul.msk.f32.vlgmr.msra.gmra.mxu3 %vm894_vm11, %v7912_v43  ;;  %v8063_v13 = vmul.f32 0.1, %v3508_v31  ;;  %v8071_v43 = vpop.permute.xlu1 %6068 }
 0x867   : > { %5894 = vmatpush.xpose.msk.msra.mxu0 %vm894_vm11, %v7924_v49  ;;  %5900 = vmatpush.xpose.msk.msra.mxu3 %vm894_vm11, %v7920_v52 }
 0x868   : > { %v4160_v32 = vsel %vm894_vm11, %v8063_v13, -inf }
 0x86a   : > { %5888 = vmatpush.xpose.msk.msrb.mxu1 %vm894_vm11, %v3370_v44 }
 0x86d   : > { %5881 = vmatmul.msk.f32.vlgmr.msra.gmra.mxu1 %vm894_vm11, %v7875_v8  ;;  %5887 = vmatmul.msk.f32.vlgmr.msrb.gmra.mxu0 %vm894_vm11, %v7934_v3  ;;  %v4157_v8 = vsel %vm894_vm11, %v8059_v4, -inf }
 0x86e   : > { %5893 = vmatmul.msk.f32.vlgmr.msrb.gmra.mxu3 %vm894_vm11, %v7922_v14  ;;  %5896 = vmatpush.xpose.msk.msra.mxu1 %vm894_vm11, %v7944_v5 }
 0x86f   : > { %5902 = vmatpush.xpose.msk.msrb.mxu0 %vm894_vm11, %v7954_v34  ;;  %4550 = vmatpush.msrb.mxu3 %v6066_v23 }
 0x875   : > { %5889 = vmatmul.msk.f32.vlgmr.msrb.gmra.mxu1 %vm894_vm11, %v7930_v11  ;;  %5895 = vmatmul.msk.f32.vlgmr.msra.gmra.mxu0 %vm894_vm11, %v7948_v10 }
 0x876   : > { %5901 = vmatmul.msk.f32.vlgmr.msra.gmra.mxu3 %vm894_vm11, %v3410_v27  ;;  %5904 = vmatpush.xpose.msk.msrb.mxu1 %vm894_vm11, %v8016_v50 }
 0x87d   : > { %5897 = vmatmul.msk.f32.vlgmr.msra.gmra.mxu1 %vm894_vm11, %v7965_v61  ;;  %5903 = vmatmul.msk.f32.vlgmr.msrb.gmra.mxu0 %vm894_vm11, %v3412_v62 }
 0x87e   : > { %4152 = vmax.xlane.f32.xlu1 %v4151_v47 }
 0x884   : > { %v8079_v14 = vpop.permute.xlu1 %6078 }
 0x885   : > { %5905 = vmatmul.msk.f32.vlgmr.msrb.gmra.mxu1 %vm894_vm11, %v3414_v59 }
 0x886   : > { %v6099_v22 = vpop.permute.xlu2 %6098  ;;  %4155 = vmax.xlane.f32.xlu0 %v4154_v26 }
 0x887   : > { %v6101_v38 = vunpack.i.h.bf16 %v6099_v22  ;;  %v6100_v7 = vunpack.i.l.bf16 %v6099_v22 }
 0x889   : > { %4628 = vmatpush.msra.mxu2 %v6100_v7  ;;  %4654 = vmatpush.msra.mxu3 %v6101_v38 }
 0x88d   : > { %4158 = vmax.xlane.f32.xlu2 %v4157_v8 }
 0x895   : > { %4161 = vmax.xlane.f32.xlu2 %v4160_v32 }
 0x896   : > { %v8073_v28 = vpop.permute.xlu0 %6073  ;;  %v8085_v17 = vpop.permute.xlu2 %6103 }
 0x897   : > { %v6105_v35 = vunpack.i.l.bf16 %v8085_v17 }
 0x89e   : > { %v8102_v54 = vpop.permute.xlu2 %6118 }
 0x89f   : > { %v6120_v46 = vunpack.i.l.bf16 %v8102_v54 }
 0x8a5   : > { %v3556_v20 = vpop.f32.mrf.mxu3 }
 0x8a6   : > { %v8067_v63 = vmul.f32 0.1, %v3556_v20 }
 0x8a8   : > { %v4166_v29 = vsel %vm894_vm11, %v8067_v63, -inf }
 0x8a9   : > { %4167 = vmax.xlane.f32.xlu1 %v4166_v29 }
 0x8ad   : > { %v3652_v18 = vpop.f32.mrf.mxu3 }
 0x8ae   : > { %v8104_v41 = vmul.f32 0.1, %v3652_v18 }
 0x8b0   : > { %v3532_v0 = vpop.f32.mrf.mxu2  ;;  %v4178_v15 = vsel %vm894_vm11, %v8104_v41, -inf }
 0x8b1   : > { %v8075_v19 = vmul.f32 0.1, %v3532_v0 }
 0x8b3   : > { %v4163_v52 = vsel %vm894_vm11, %v8075_v19, -inf }
 0x8b4   : > { %4164 = vmax.xlane.f32.xlu2 %v4163_v52 }
 0x8b6   : > { %v8081_v48 = vpop.permute.xlu0 %6083 }
 0x8b8   : > { %v3628_v2 = vpop.f32.mrf.mxu2 }
 0x8b9   : > { %v8083_v11 = vmul.f32 0.1, %v3628_v2 }
 0x8bb   : > { %v4175_v3 = vsel %vm894_vm11, %v8083_v11, -inf }
 0x8bc   : > { %4176 = vmax.xlane.f32.xlu0 %v4175_v3 }
 0x8be   : > { %v8089_v25 = vpop.permute.xlu1 %6088  ;;  %v8091_v24 = vpop.permute.xlu0 %6093 }
 0x8bf   : > { %v3580_v10 = vpop.f32.mrf.mxu0  ;;  %v6096_v1 = vunpack.i.h.bf16 %v8091_v24  ;;  %v8122_v38 = vpop.permute.xlu2 %6128 }
 0x8c0   : > { %v8094_v58 = vmul.f32 0.1, %v3580_v10  ;;  %v3724_v30 = vpop.f32.mrf.mxu2 }
 0x8c1   : > { %v8096_v51 = vmul.f32 0.1, %v3724_v30  ;;  %4576 = vmatpush.msra.mxu0 %v6096_v1 }
 0x8c2   : > { %v4169_v61 = vsel %vm894_vm11, %v8094_v58, -inf }
 0x8c3   : > { %4170 = vmax.xlane.f32.xlu1 %v4169_v61  ;;  %v4187_v44 = vsel %vm894_vm11, %v8096_v51, -inf }
 0x8c4   : > { %4188 = vmax.xlane.f32.xlu0 %v4187_v44 }
 0x8c6   : > { %v6114_v12 = vpop.permute.xlu1 %6113  ;;  %v8117_v47 = vpop.permute.xlu0 %6108 }
 0x8c7   : > { %v6116_v27 = vunpack.i.h.bf16 %v6114_v12  ;;  %v6115_v37 = vunpack.i.l.bf16 %v6114_v12  ;;  %v3676_v40 = vpop.f32.mrf.mxu0  ;;  %v3604_v59 = vpop.f32.mrf.mxu1 }
 0x8c8   : > { %v8107_v62 = vmul.f32 0.1, %v3676_v40  ;;  %v8113_v23 = vmul.f32 0.1, %v3604_v59  ;;  %v3832_v29 = vpop.f32.mrf.mxu2 }
 0x8c9   : > { %4602 = vmatpush.msra.mxu1 %v6115_v37  ;;  %4680 = vmatpush.msrb.mxu0 %v6116_v27  ;;  %v8129_v2 = vmul.f32 0.1, %v3832_v29 }
 0x8ca   : > { %v4181_v53 = vsel %vm894_vm11, %v8107_v62, -inf  ;;  %v4172_v45 = vsel %vm894_vm11, %v8113_v23, -inf }
 0x8cb   : > { %4706 = vmatpush.msrb.mxu1 %v6120_v46  ;;  %4179 = vmax.xlane.f32.xlu1 %v4178_v15 }
 0x8cc   : > { %4182 = vmax.xlane.f32.xlu0 %v4181_v53 }
 0x8ce   : > { %v8119_v36 = vpop.permute.xlu0 %6123 }
 0x8d3   : > { %4173 = vmax.xlane.f32.xlu1 %v4172_v45 }
 0x8d8   : > { %v3748_v0 = vpop.f32.mrf.mxu3 }
 0x8d9   : > { %v8147_v15 = vmul.f32 0.1, %v3748_v0 }
 0x8da   : > { %v3772_v3 = vpop.f32.mrf.mxu0 }
 0x8db   : > { %v8138_v18 = vmul.f32 0.1, %v3772_v3 }
 0x8dd   : > { %v4193_v40 = vsel %vm894_vm11, %v8138_v18, -inf }
 0x8e0   : > { %v3852_v12 = vpop.f32.mrf.mxu3 }
 0x8e1   : > { %v8149_v59 = vmul.f32 0.1, %v3852_v12 }
 0x8e2   : > { %v3872_v37 = vpop.f32.mrf.mxu0 }
 0x8e9   : > { %v3932_v45 = vpop.f32.mrf.mxu3 }
 0x8f1   : > { %v4153_v60 = vpop.xlane.xlu1 %4152 }
 0x8f2   : > { %v4199_v26 = vsub.f32 %v8047_v9, %v4153_v60 }
 0x8f4   : > { %v4215_v22 = vmul.f32 1.442695, %v4199_v26  ;;  %v3912_v26 = vpop.f32.mrf.mxu2 }
 0x8f6   : > { %6311 = vpow2.f32 %v4215_v22  ;;  %v4330_v22 = vsel %vm894_vm11, %v8149_v59, -inf }
 0x8f9   : > { %v4156_v7 = vpop.xlane.xlu0 %4155 }
 0x8fa   : > { %v4200_v8 = vsub.f32 %v8054_v57, %v4156_v7  ;;  %v4327_v57 = vsel %vm894_vm11, %v8129_v2, -inf  ;;  %v4190_v7 = vsel %vm894_vm11, %v8147_v15, -inf }
 0x8fc   : > { %v8125_v31 = vpop.eup %6311  ;;  %v4217_v32 = vmul.f32 1.442695, %v4200_v8  ;;  %v3952_v8 = vpop.f32.mrf.mxu0 }
 0x8fd   : > { %v4247_v20 = vsel %vm894_vm11, %v8125_v31, 0.0  ;;  %v8163_v29 = vmul.f32 0.1, %v3952_v8 }
 0x8fe   : > { %6313 = vpow2.f32 %v4217_v32  ;;  %4248 = vadd.xlane.f32.xlu2 %v4247_v20  ;;  %v8159_v32 = vmul.f32 0.1, %v3912_v26 }
 0x900   : > { %v4159_v52 = vpop.xlane.xlu2 %4158 }
 0x901   : > { %v4201_v9 = vsub.f32 %v8059_v4, %v4159_v52  ;;  %v4339_v52 = vsel %vm894_vm11, %v8159_v32, -inf }
 0x903   : > { %v4219_v10 = vmul.f32 1.442695, %v4201_v9  ;;  %v4345_v9 = vsel %vm894_vm11, %v8163_v29, -inf }
 0x904   : > { %v8132_v1 = vpop.eup %6313 }
 0x905   : > { %6315 = vpow2.f32 %v4219_v10  ;;  %v4250_v30 = vsel %vm894_vm11, %v8132_v1, 0.0  ;;  %v4012_v10 = vpop.f32.mrf.mxu3 }
 0x906   : > { %4328 = vmax.xlane.f32.xlu2 %v4327_v57  ;;  %4251 = vadd.xlane.f32.xlu0 %v4250_v30  ;;  %v8173_v30 = vmul.f32 0.1, %v3872_v37  ;;  %v8183_v37 = vmul.f32 0.1, %v3932_v45 }
 0x908   : > { %v4162_v61 = vpop.xlane.xlu2 %4161 }
 0x909   : > { %v4202_v44 = vsub.f32 %v8063_v13, %v4162_v61  ;;  %v3700_v13 = vpop.f32.mrf.mxu1  ;;  %v8175_v61 = vmul.f32 0.1, %v4012_v10 }
 0x90a   : > { %v8161_v20 = vmul.f32 0.1, %v3700_v13 }
 0x90b   : > { %v8141_v4 = vpop.eup %6315  ;;  %v4221_v27 = vmul.f32 1.442695, %v4202_v44  ;;  %v3992_v44 = vpop.f32.mrf.mxu2 }
 0x90c   : > { %v4253_v46 = vsel %vm894_vm11, %v8141_v4, 0.0  ;;  %v4184_v3 = vsel %vm894_vm11, %v8161_v20, -inf }
 0x90d   : > { %6317 = vpow2.f32 %v4221_v27  ;;  %v4354_v27 = vsel %vm894_vm11, %v8175_v61, -inf }
 0x90e   : > { %4194 = vmax.xlane.f32.xlu2 %v4193_v40  ;;  %4254 = vadd.xlane.f32.xlu0 %v4253_v46  ;;  %v4333_v46 = vsel %vm894_vm11, %v8173_v30, -inf }
 0x911   : > { %v3796_v0 = vpop.f32.mrf.mxu1 }
 0x912   : > { %v8171_v57 = vmul.f32 0.1, %v3796_v0  ;;  %v4342_v0 = vsel %vm894_vm11, %v8183_v37, -inf }
 0x913   : > { %v8151_v53 = vpop.eup %6317 }
 0x914   : > { %v4256_v60 = vsel %vm894_vm11, %v8151_v53, 0.0  ;;  %v4196_v12 = vsel %vm894_vm11, %v8171_v57, -inf }
 0x915   : > { %4257 = vadd.xlane.f32.xlu1 %v4256_v60 }
 0x916   : > { %4331 = vmax.xlane.f32.xlu2 %v4330_v22  ;;  %4191 = vmax.xlane.f32.xlu0 %v4190_v7  ;;  %v8186_v22 = vmul.f32 0.1, %v3992_v44 }
 0x919   : > { %v3892_v40 = vpop.f32.mrf.mxu1 }
 0x91c   : > { %v4168_v13 = vpop.xlane.xlu1 %4167 }
 0x91d   : > { %4340 = vmax.xlane.f32.xlu1 %v4339_v52  ;;  %v4204_v7 = vsub.f32 %v8067_v63, %v4168_v13  ;;  %v4072_v52 = vpop.f32.mrf.mxu2  ;;  %v4032_v13 = vpop.f32.mrf.mxu0 }
 0x91e   : > { %4346 = vmax.xlane.f32.xlu2 %v4345_v9  ;;  %4185 = vmax.xlane.f32.xlu0 %v4184_v3  ;;  %v4351_v9 = vsel %vm894_vm11, %v8186_v22, -inf  ;;  %v8193_v10 = vmul.f32 0.1, %v4072_v52 }
 0x91f   : > { %v4225_v3 = vmul.f32 1.442695, %v4204_v7 }
 0x921   : > { %v3972_v44 = vpop.f32.mrf.mxu1 }
 0x922   : > { %v8207_v7 = vmul.f32 0.1, %v3972_v44  ;;  %v4092_v44 = vpop.f32.mrf.mxu3 }
 0x925   : > { %4197 = vmax.xlane.f32.xlu1 %v4196_v12 }
 0x926   : > { %4355 = vmax.xlane.f32.xlu2 %v4354_v27  ;;  %4334 = vmax.xlane.f32.xlu0 %v4333_v46  ;;  %v4363_v27 = vsel %vm894_vm11, %v8193_v10, -inf }
 0x927   : > { %v4165_v60 = vpop.xlane.xlu2 %4164 }
 0x928   : > { %v4203_v26 = vsub.f32 %v8075_v19, %v4165_v60  ;;  %v8195_v19 = vmul.f32 0.1, %v3892_v40 }
 0x92a   : > { %v4223_v8 = vmul.f32 1.442695, %v4203_v26  ;;  %v4336_v46 = vsel %vm894_vm11, %v8195_v19, -inf }
 0x92c   : > { %6319 = vpow2.f32 %v4223_v8 }
 0x92d   : > { %4343 = vmax.xlane.f32.xlu1 %v4342_v0  ;;  %6321 = vpow2.f32 %v4225_v3  ;;  %v8210_v0 = vmul.f32 0.1, %v4032_v13  ;;  %v8220_v13 = vmul.f32 0.1, %v4092_v44 }
 0x92e   : > { %4352 = vmax.xlane.f32.xlu0 %v4351_v9  ;;  %v4052_v9 = vpop.f32.mrf.mxu1 }
 0x92f   : > { %v4177_v45 = vpop.xlane.xlu0 %4176 }
 0x932   : > { %v8197_v12 = vpop.eup %6319 }
 0x933   : > { %v4259_v63 = vsel %vm894_vm11, %v8197_v12, 0.0  ;;  %v8205_v26 = vpop.eup %6321 }
 0x934   : > { %4260 = vadd.xlane.f32.xlu2 %v4259_v63  ;;  %v4262_v3 = vsel %vm894_vm11, %v8205_v26, 0.0  ;;  %v4348_v63 = vsel %vm894_vm11, %v8207_v7, -inf }
 0x935   : > { %4364 = vmax.xlane.f32.xlu1 %v4363_v27  ;;  %v4357_v27 = vsel %vm894_vm11, %v8210_v0, -inf }
 0x936   : > { %v4171_v60 = vpop.xlane.xlu1 %4170  ;;  %4337 = vmax.xlane.f32.xlu0 %v4336_v46  ;;  %v4132_v16 = vpop.f32.mrf.mxu1 }
 0x937   : > { %v4189_v40 = vpop.xlane.xlu0 %4188  ;;  %v8232_v56 = vmul.f32 0.1, %v4132_v16 }
 0x938   : > { %v4211_v8 = vsub.f32 %v8096_v51, %v4189_v40  ;;  %v8218_v51 = vmul.f32 0.1, %v4052_v9  ;;  %v4366_v9 = vsel %vm894_vm11, %v8220_v13, -inf }
 0x93a   : > { %v4239_v52 = vmul.f32 1.442695, %v4211_v8  ;;  %v4205_v8 = vsub.f32 %v8094_v58, %v4171_v60 }
 0x93c   : > { %6323 = vpow2.f32 %v4239_v52  ;;  %4263 = vadd.xlane.f32.xlu2 %v4262_v3  ;;  %v4207_v3 = vsub.f32 %v8083_v11, %v4177_v45  ;;  %v4227_v44 = vmul.f32 1.442695, %v4205_v8 }
 0x93d   : > { %4349 = vmax.xlane.f32.xlu1 %v4348_v63  ;;  %v4360_v63 = vsel %vm894_vm11, %v8218_v51, -inf }
 0x93e   : > { %v4180_v46 = vpop.xlane.xlu1 %4179  ;;  %4358 = vmax.xlane.f32.xlu0 %v4357_v27  ;;  %v4112_v27 = vpop.f32.mrf.mxu0  ;;  %v4231_v58 = vmul.f32 1.442695, %v4207_v3  ;;  %6325 = vpow2.f32 %v4227_v44 }
 0x93f   : > { %v8234_v55 = vmul.f32 0.1, %v4112_v27  ;;  %v4208_v45 = vsub.f32 %v8104_v41, %v4180_v46 }
 0x940   : > { %6327 = vpow2.f32 %v4231_v58 }
 0x941   : > { %v4233_v8 = vmul.f32 1.442695, %v4208_v45 }
 0x942   : > { %v8222_v40 = vpop.eup %6323 }
 0x943   : > { %v4283_v52 = vsel %vm894_vm11, %v8222_v40, 0.0 }
 0x944   : > { %4284 = vadd.xlane.f32.xlu2 %v4283_v52  ;;  %v4372_v52 = vsel %vm894_vm11, %v8232_v56, -inf  ;;  %v8242_v3 = vpop.eup %6325 }
 0x945   : > { %4361 = vmax.xlane.f32.xlu1 %v4360_v63  ;;  %v4369_v63 = vsel %vm894_vm11, %v8234_v55, -inf  ;;  %v4265_v41 = vsel %vm894_vm11, %v8242_v3, 0.0 }
 0x946   : > { %4367 = vmax.xlane.f32.xlu0 %v4366_v9  ;;  %v4174_v60 = vpop.xlane.xlu1 %4173  ;;  %v4183_v9 = vpop.xlane.xlu0 %4182 }
 0x947   : > { %v4206_v11 = vsub.f32 %v8113_v23, %v4174_v60  ;;  %v8244_v27 = vpop.eup %6327  ;;  %v4209_v23 = vsub.f32 %v8107_v62, %v4183_v9 }
 0x948   : > { %v4271_v46 = vsel %vm894_vm11, %v8244_v27, 0.0 }
 0x949   : > { %v4229_v16 = vmul.f32 1.442695, %v4206_v11  ;;  %v4235_v44 = vmul.f32 1.442695, %v4209_v23 }
 0x94b   : > { %6329 = vpow2.f32 %v4229_v16 }
 0x94c   : > { %6331 = vpow2.f32 %v4233_v8 }
 0x94d   : > { %4373 = vmax.xlane.f32.xlu1 %v4372_v52  ;;  %6333 = vpow2.f32 %v4235_v44 }
 0x94e   : > { %4370 = vmax.xlane.f32.xlu0 %v4369_v63 }
 0x951   : > { %v8251_v58 = vpop.eup %6329 }
 0x952   : > { %v8253_v60 = vpop.eup %6331  ;;  %v4268_v11 = vsel %vm894_vm11, %v8251_v58, 0.0 }
 0x953   : > { %v4274_v62 = vsel %vm894_vm11, %v8253_v60, 0.0  ;;  %v8259_v45 = vpop.eup %6333 }
 0x954   : > { %v4277_v52 = vsel %vm894_vm11, %v8259_v45, 0.0 }
 0x955   : > { %4266 = vadd.xlane.f32.xlu1 %v4265_v41  ;;  %v6095_v41 = vunpack.i.l.bf16 %v8091_v24 }
 0x956   : > { %4272 = vadd.xlane.f32.xlu0 %v4271_v46 }
 0x95d   : > { %4269 = vadd.xlane.f32.xlu1 %v4268_v11 }
 0x95e   : > { %4275 = vadd.xlane.f32.xlu0 %v4274_v62 }
 0x966   : > { %4278 = vadd.xlane.f32.xlu0 %v4277_v52 }
 0x971   : > { %v4249_v63 = vpop.xlane.xlu2 %4248 }
 0x972   : > { %6335 = vrcp.f32 %v4249_v63 }
 0x978   : > { %v6336_v16 = vpop.eup %6335 }
 0x979   : > { %v4311_v8 = vmul.f32 %v6336_v16, %v8125_v31  ;;  %v4329_v9 = vpop.xlane.xlu2 %4328  ;;  %v4252_v23 = vpop.xlane.xlu0 %4251 }
 0x97a   : > { %v4375_v46 = vsub.f32 %v8129_v2, %v4329_v9  ;;  %6337 = vrcp.f32 %v4252_v23 }
 0x97b   : > { %5906 = vmatmul.msk.f32.vlgmr.msrb.gmra.mxu2 %vm894_vm11, %v4311_v8 }
 0x97c   : > { %v4391_v44 = vmul.f32 1.442695, %v4375_v46  ;;  %4732 = vmatpush.msrb.mxu2 %v6095_v41 }
 0x97e   : > { %6339 = vpow2.f32 %v4391_v44 }
 0x980   : > { %v6338_v11 = vpop.eup %6337 }
 0x981   : > { %v4312_v62 = vmul.f32 %v6338_v11, %v8132_v1  ;;  %v4195_v52 = vpop.xlane.xlu2 %4194  ;;  %v4255_v63 = vpop.xlane.xlu0 %4254 }
 0x982   : > { %v4213_v31 = vsub.f32 %v8138_v18, %v4195_v52  ;;  %6341 = vrcp.f32 %v4255_v63  ;;  %v6121_v18 = vunpack.i.h.bf16 %v8102_v54 }
 0x983   : > { %5907 = vmatmul.msk.f32.vlgmr.msrb.gmra.mxu3 %vm894_vm11, %v4312_v62 }
 0x984   : > { %v8271_v24 = vpop.eup %6339  ;;  %v4243_v2 = vmul.f32 1.442695, %v4213_v31  ;;  %4758 = vmatpush.msrb.mxu3 %v6105_v35 }
 0x985   : > { %v4423_v16 = vsel %vm894_vm11, %v8271_v24, 0.0 }
 0x986   : > { %6343 = vpow2.f32 %v4243_v2  ;;  %4424 = vadd.xlane.f32.xlu1 %v4423_v16 }
 0x988   : > { %v6342_v8 = vpop.eup %6341  ;;  %v4258_v1 = vpop.xlane.xlu1 %4257 }
 0x989   : > { %v4313_v9 = vmul.f32 %v6342_v8, %v8141_v4  ;;  %6345 = vrcp.f32 %v4258_v1  ;;  %v4332_v23 = vpop.xlane.xlu2 %4331  ;;  %v4192_v41 = vpop.xlane.xlu0 %4191 }
 0x98a   : > { %v4212_v46 = vsub.f32 %v8147_v15, %v4192_v41  ;;  %v4376_v35 = vsub.f32 %v8149_v59, %v4332_v23  ;;  %v6125_v15 = vunpack.i.l.bf16 %v8119_v36 }
 0x98b   : > { %5908 = vmatmul.msk.f32.vlgmr.msra.gmra.mxu0 %vm894_vm11, %v4313_v9 }
 0x98c   : > { %v8279_v44 = vpop.eup %6343  ;;  %v4241_v11 = vmul.f32 1.442695, %v4212_v46  ;;  %4784 = vmatpush.msra.mxu0 %v6121_v18  ;;  %v4393_v63 = vmul.f32 1.442695, %v4376_v35 }
 0x98d   : > { %v4289_v62 = vsel %vm894_vm11, %v8279_v44, 0.0 }
 0x98e   : > { %4290 = vadd.xlane.f32.xlu0 %v4289_v62  ;;  %6347 = vpow2.f32 %v4241_v11 }
 0x98f   : > { %v6346_v4 = vpop.eup %6345  ;;  %6349 = vpow2.f32 %v4393_v63 }
 0x990   : > { %v4314_v52 = vmul.f32 %v6346_v4, %v8151_v53  ;;  %v4341_v54 = vpop.xlane.xlu1 %4340 }
 0x991   : > { %v4379_v31 = vsub.f32 %v8159_v32, %v4341_v54  ;;  %v4186_v2 = vpop.xlane.xlu0 %4185  ;;  %v4347_v9 = vpop.xlane.xlu2 %4346 }
 0x992   : > { %v4210_v16 = vsub.f32 %v8161_v20, %v4186_v2  ;;  %5909 = vmatmul.msk.f32.vlgmr.msra.gmra.mxu1 %vm894_vm11, %v4314_v52 }
 0x993   : > { %v4399_v59 = vmul.f32 1.442695, %v4379_v31  ;;  %4810 = vmatpush.msra.mxu1 %v6125_v15  ;;  %v4381_v31 = vsub.f32 %v8163_v29, %v4347_v9 }
 0x994   : > { %v4237_v8 = vmul.f32 1.442695, %v4210_v16  ;;  %v8289_v1 = vpop.eup %6347 }
 0x995   : > { %6351 = vpow2.f32 %v4399_v59  ;;  %v4286_v53 = vsel %vm894_vm11, %v8289_v1, 0.0  ;;  %v8294_v20 = vpop.eup %6349 }
 0x996   : > { %6353 = vpow2.f32 %v4237_v8  ;;  %4287 = vadd.xlane.f32.xlu2 %v4286_v53  ;;  %v4426_v4 = vsel %vm894_vm11, %v8294_v20, 0.0 }
 0x998   : > { %v4198_v23 = vpop.xlane.xlu1 %4197 }
 0x999   : > { %v4214_v32 = vsub.f32 %v8171_v57, %v4198_v23  ;;  %v4335_v41 = vpop.xlane.xlu0 %4334  ;;  %v4356_v52 = vpop.xlane.xlu2 %4355 }
 0x99a   : > { %v4377_v35 = vsub.f32 %v8173_v30, %v4335_v41  ;;  %v4384_v59 = vsub.f32 %v8175_v61, %v4356_v52 }
 0x99b   : > { %v8296_v18 = vpop.eup %6351  ;;  %v4245_v46 = vmul.f32 1.442695, %v4214_v32  ;;  %v4403_v32 = vmul.f32 1.442695, %v4381_v31 }
 0x99c   : > { %v4435_v11 = vsel %vm894_vm11, %v8296_v18, 0.0  ;;  %v8301_v62 = vpop.eup %6353  ;;  %v4395_v63 = vmul.f32 1.442695, %v4377_v35 }
 0x99d   : > { %6355 = vpow2.f32 %v4245_v46  ;;  %4436 = vadd.xlane.f32.xlu0 %v4435_v11  ;;  %v4280_v57 = vsel %vm894_vm11, %v8301_v62, 0.0 }
 0x99e   : > { %4427 = vadd.xlane.f32.xlu2 %v4426_v4  ;;  %4281 = vadd.xlane.f32.xlu1 %v4280_v57  ;;  %6357 = vpow2.f32 %v4395_v63 }
 0x9a0   : > { %v4344_v54 = vpop.xlane.xlu1 %4343 }
 0x9a1   : > { %v4380_v30 = vsub.f32 %v8183_v37, %v4344_v54  ;;  %v4353_v15 = vpop.xlane.xlu0 %4352  ;;  %v4409_v37 = vmul.f32 1.442695, %v4384_v59 }
 0x9a2   : > { %v4383_v2 = vsub.f32 %v8186_v22, %v4353_v15 }
 0x9a3   : > { %v8310_v16 = vpop.eup %6355  ;;  %v4401_v8 = vmul.f32 1.442695, %v4380_v30 }
 0x9a4   : > { %v4407_v53 = vmul.f32 1.442695, %v4383_v2  ;;  %v4292_v23 = vsel %vm894_vm11, %v8310_v16, 0.0  ;;  %v8315_v9 = vpop.eup %6357 }
 0x9a5   : > { %6359 = vpow2.f32 %v4401_v8  ;;  %4293 = vadd.xlane.f32.xlu0 %v4292_v23  ;;  %v4429_v52 = vsel %vm894_vm11, %v8315_v9, 0.0 }
 0x9a6   : > { %6361 = vpow2.f32 %v4407_v53 }
 0x9a7   : > { %v4261_v41 = vpop.xlane.xlu2 %4260 }
 0x9a8   : > { %6363 = vrcp.f32 %v4261_v41  ;;  %v4365_v29 = vpop.xlane.xlu1 %4364 }
 0x9a9   : > { %v4338_v22 = vpop.xlane.xlu0 %4337  ;;  %6365 = vpow2.f32 %v4403_v32  ;;  %v4387_v11 = vsub.f32 %v8193_v10, %v4365_v29  ;;  %v6106_v10 = vunpack.i.h.bf16 %v8085_v17 }
 0x9aa   : > { %v4378_v61 = vsub.f32 %v8195_v19, %v4338_v22  ;;  %6367 = vpow2.f32 %v4409_v37  ;;  %v6110_v22 = vunpack.i.l.bf16 %v8117_v47 }
 0x9ab   : > { %v8318_v46 = vpop.eup %6359  ;;  %v4415_v31 = vmul.f32 1.442695, %v4387_v11 }
 0x9ac   : > { %v8320_v35 = vpop.eup %6361  ;;  %v4397_v4 = vmul.f32 1.442695, %v4378_v61  ;;  %v4438_v57 = vsel %vm894_vm11, %v8318_v46, 0.0 }
 0x9ad   : > { %4439 = vadd.xlane.f32.xlu1 %v4438_v57  ;;  %4430 = vadd.xlane.f32.xlu0 %v4429_v52  ;;  %v4447_v63 = vsel %vm894_vm11, %v8320_v35, 0.0 }
 0x9ae   : > { %v6364_v19 = vpop.eup %6363  ;;  %6369 = vpow2.f32 %v4397_v4  ;;  %4448 = vadd.xlane.f32.xlu2 %v4447_v63 }
 0x9af   : > { %v4315_v54 = vmul.f32 %v6364_v19, %v8197_v12  ;;  %v4264_v30 = vpop.xlane.xlu2 %4263  ;;  %v8330_v15 = vpop.eup %6365 }
 0x9b0   : > { %6371 = vrcp.f32 %v4264_v30  ;;  %v4350_v2 = vpop.xlane.xlu1 %4349  ;;  %v8333_v59 = vpop.eup %6367  ;;  %v4441_v23 = vsel %vm894_vm11, %v8330_v15, 0.0 }
 0x9b1   : > { %5910 = vmatmul.msk.f32.vlgmr.msra.gmra.mxu2 %vm894_vm11, %v4315_v54  ;;  %v4359_v8 = vpop.xlane.xlu0 %4358  ;;  %6373 = vpow2.f32 %v4415_v31  ;;  %v4382_v32 = vsub.f32 %v8207_v7, %v4350_v2  ;;  %v4450_v37 = vsel %vm894_vm11, %v8333_v59, 0.0 }
 0x9b2   : > { %v4385_v53 = vsub.f32 %v8210_v0, %v4359_v8  ;;  %4836 = vmatpush.msra.mxu2 %v6106_v10 }
 0x9b3   : > { %v4405_v61 = vmul.f32 1.442695, %v4382_v32 }
 0x9b4   : > { %v8339_v12 = vpop.eup %6369  ;;  %v4411_v17 = vmul.f32 1.442695, %v4385_v53 }
 0x9b5   : > { %4451 = vadd.xlane.f32.xlu1 %v4450_v37  ;;  %4442 = vadd.xlane.f32.xlu0 %v4441_v23  ;;  %v4432_v41 = vsel %vm894_vm11, %v8339_v12, 0.0 }
 0x9b6   : > { %v6372_v29 = vpop.eup %6371  ;;  %6375 = vpow2.f32 %v4411_v17  ;;  %4433 = vadd.xlane.f32.xlu2 %v4432_v41 }
 0x9b7   : > { %v4316_v0 = vmul.f32 %v6372_v29, %v8205_v26  ;;  %v8349_v4 = vpop.eup %6373  ;;  %6377 = vpow2.f32 %v4405_v61  ;;  %v4285_v41 = vpop.xlane.xlu2 %4284 }
 0x9b8   : > { %v4362_v11 = vpop.xlane.xlu1 %4361  ;;  %v4459_v26 = vsel %vm894_vm11, %v8349_v4, 0.0 }
 0x9b9   : > { %5911 = vmatmul.msk.f32.vlgmr.msra.gmra.mxu3 %vm894_vm11, %v4316_v0  ;;  %v4368_v7 = vpop.xlane.xlu0 %4367  ;;  %v4386_v63 = vsub.f32 %v8218_v51, %v4362_v11 }
 0x9ba   : > { %v4388_v57 = vsub.f32 %v8220_v13, %v4368_v7  ;;  %4862 = vmatpush.msra.mxu3 %v6110_v22 }
 0x9bb   : > { %v4413_v30 = vmul.f32 1.442695, %v4386_v63 }
 0x9bc   : > { %v8352_v52 = vpop.eup %6375  ;;  %v4417_v19 = vmul.f32 1.442695, %v4388_v57  ;;  %v6126_v57 = vunpack.i.h.bf16 %v8119_v36  ;;  %v6130_v36 = vunpack.i.l.bf16 %v8122_v38 }
 0x9bd   : > { %v4453_v54 = vsel %vm894_vm11, %v8352_v52, 0.0  ;;  %v8361_v31 = vpop.eup %6377 }
 0x9be   : > { %6379 = vpow2.f32 %v4417_v19  ;;  %4460 = vadd.xlane.f32.xlu2 %v4459_v26  ;;  %4454 = vadd.xlane.f32.xlu0 %v4453_v54  ;;  %v4444_v53 = vsel %vm894_vm11, %v8361_v31, 0.0  ;;  %v6111_v26 = vunpack.i.h.bf16 %v8117_v47 }
 0x9bf   : > { %6381 = vpow2.f32 %v4413_v30 }
 0x9c0   : > { %v8359_v10 = vpop.xlane.xlu1 %4373 }
 0x9c1   : > { %v4371_v13 = vpop.xlane.xlu0 %4370 }
 0x9c2   : > { %v4389_v2 = vsub.f32 %v8234_v55, %v4371_v13 }
 0x9c4   : > { %v8364_v8 = vpop.eup %6379  ;;  %v4419_v51 = vmul.f32 1.442695, %v4389_v2 }
 0x9c5   : > { %v4462_v23 = vsel %vm894_vm11, %v8364_v8, 0.0  ;;  %v8370_v37 = vpop.eup %6381 }
 0x9c6   : > { %6383 = vpow2.f32 %v4419_v51  ;;  %4445 = vadd.xlane.f32.xlu2 %v4444_v53  ;;  %4463 = vadd.xlane.f32.xlu1 %v4462_v23  ;;  %v4456_v29 = vsel %vm894_vm11, %v8370_v37, 0.0  ;;  %v6070_v51 = vunpack.i.l.bf16 %v8071_v43  ;;  %v6071_v53 = vunpack.i.h.bf16 %v8071_v43 }
 0x9c7   : > { %v6131_v23 = vunpack.i.h.bf16 %v8122_v38  ;;  %v4390_v43 = vsub.f32 %v8232_v56, %v8359_v10 }
 0x9c8   : > { %v4267_v32 = vpop.xlane.xlu1 %4266 }
 0x9c9   : > { %6385 = vrcp.f32 %v4267_v32  ;;  %v4273_v17 = vpop.xlane.xlu0 %4272  ;;  %v4421_v32 = vmul.f32 1.442695, %v4390_v43 }
 0x9ca   : > { %6387 = vrcp.f32 %v4273_v17  ;;  %v6076_v17 = vunpack.i.h.bf16 %v8073_v28 }
 0x9cb   : > { %6389 = vrcp.f32 %v4285_v41  ;;  %v6086_v41 = vunpack.i.h.bf16 %v8081_v48 }
 0x9cc   : > { %v8372_v55 = vpop.eup %6383 }
 0x9cd   : > { %v4465_v0 = vsel %vm894_vm11, %v8372_v55, 0.0 }
 0x9ce   : > { %4457 = vadd.xlane.f32.xlu1 %v4456_v29  ;;  %4466 = vadd.xlane.f32.xlu0 %v4465_v0 }
 0x9cf   : > { %v6386_v22 = vpop.eup %6385 }
 0x9d0   : > { %v6388_v61 = vpop.eup %6387  ;;  %v4317_v11 = vmul.f32 %v6386_v22, %v8242_v3  ;;  %v4270_v7 = vpop.xlane.xlu1 %4269 }
 0x9d1   : > { %v4319_v63 = vmul.f32 %v6388_v61, %v8244_v27  ;;  %6391 = vrcp.f32 %v4270_v7  ;;  %v4276_v19 = vpop.xlane.xlu0 %4275  ;;  %v6390_v54 = vpop.eup %6389  ;;  %v6075_v7 = vunpack.i.l.bf16 %v8073_v28  ;;  %v6080_v28 = vunpack.i.l.bf16 %v8079_v14 }
 0x9d2   : > { %6393 = vrcp.f32 %v4276_v19  ;;  %5912 = vmatmul.msk.f32.vlgmr.msrb.gmra.mxu0 %vm894_vm11, %v4317_v11  ;;  %v4323_v47 = vmul.f32 %v6390_v54, %v8222_v40 }
 0x9d3   : > { %4888 = vmatpush.msrb.mxu0 %v6126_v57  ;;  %5914 = vmatmul.msk.f32.vlgmr.msrb.gmra.mxu2 %vm894_vm11, %v4319_v63 }
 0x9d4   : > { %4940 = vmatpush.msrb.mxu2 %v6111_v26  ;;  %v6081_v26 = vunpack.i.h.bf16 %v8079_v14  ;;  %v6091_v14 = vunpack.i.h.bf16 %v8089_v25 }
 0x9d7   : > { %v6392_v30 = vpop.eup %6391 }
 0x9d8   : > { %v6394_v13 = vpop.eup %6393  ;;  %v4318_v3 = vmul.f32 %v6392_v30, %v8251_v58  ;;  %v8613_v58 = vpack.i.bf16 %v7944_v5, %v7924_v49 }
 0x9d9   : > { %v4320_v27 = vmul.f32 %v6394_v13, %v8253_v60  ;;  %v4279_v2 = vpop.xlane.xlu0 %4278  ;;  %v6085_v13 = vunpack.i.l.bf16 %v8081_v48 }
 0x9da   : > { %6395 = vrcp.f32 %v4279_v2  ;;  %5913 = vmatmul.msk.f32.vlgmr.msrb.gmra.mxu1 %vm894_vm11, %v4318_v3 }
 0x9db   : > { %4914 = vmatpush.msrb.mxu1 %v6130_v36  ;;  %5915 = vmatmul.msk.f32.vlgmr.msrb.gmra.mxu3 %vm894_vm11, %v4320_v27 }
 0x9dc   : > { %5918 = vmatmul.msk.f32.vlgmr.msra.gmra.mxu2 %vm894_vm11, %v4323_v47  ;;  %4966 = vmatpush.msrb.mxu3 %v6070_v51 }
 0x9dd   : > { %5044 = vmatpush.msra.mxu2 %v6071_v53 }
 0x9de   : > { %6133 = vrot.lane.b32.xlu2 %v8613_v58, %s6531_s17  ;;  %v6090_v58 = vunpack.i.l.bf16 %v8089_v25 }
 0x9e0   : > { %v6396_v60 = vpop.eup %6395 }
 0x9e1   : > { %v4321_v40 = vmul.f32 %v6396_v60, %v8259_v45 }
 0x9e2   : > { %5309 = vrot.lane.b32.xlu0 %v8016_v50, %s6531_s17 }
 0x9e3   : > { %5916 = vmatmul.msk.f32.vlgmr.msra.gmra.mxu0 %vm894_vm11, %v4321_v40 }
 0x9e4   : > { %4992 = vmatpush.msra.mxu0 %v6131_v23 }
 0x9e7   : > { %5283 = vrot.lane.b32.xlu1 %v7954_v34, %s6531_s17 }
 0x9f9   : > { %v4425_v49 = vpop.xlane.xlu1 %4424 }
 0x9fa   : > { %6397 = vrcp.f32 %v4425_v49 }
 0x9fb   : > { %6399 = vpow2.f32 %v4421_v32 }
 0x9fe   : > { %v8437_v23 = vpop.f32.mrf.mxu2 }
 0xa00   : > { %v6398_v5 = vpop.eup %6397 }
 0xa01   : > { %v4487_v45 = vmul.f32 %v6398_v5, %v8271_v24  ;;  %v4291_v38 = vpop.xlane.xlu0 %4290  ;;  %v8408_v50 = vpop.eup %6399 }
 0xa02   : > { %6401 = vrcp.f32 %v4291_v38  ;;  %v4468_v34 = vsel %vm894_vm11, %v8408_v50, 0.0 }
 0xa03   : > { %5922 = vmatmul.msk.f32.vlgmr.msrb.gmra.mxu2 %vm894_vm11, %v4487_v45 }
 0xa04   : > { %5148 = vmatpush.msrb.mxu2 %v6076_v17 }
 0xa06   : > { %v8445_v5 = vpop.f32.mrf.mxu3 }
 0xa07   : > { %4469 = vadd.xlane.f32.xlu2 %v4468_v34 }
 0xa08   : > { %v6402_v56 = vpop.eup %6401 }
 0xa09   : > { %v4325_v10 = vmul.f32 %v6402_v56, %v8279_v44  ;;  %v4288_v29 = vpop.xlane.xlu2 %4287 }
 0xa0a   : > { %6403 = vrcp.f32 %v4288_v29 }
 0xa0b   : > { %5920 = vmatmul.msk.f32.vlgmr.msrb.gmra.mxu0 %vm894_vm11, %v4325_v10 }
 0xa0c   : > { %5096 = vmatpush.msrb.mxu0 %v6086_v41 }
 0xa10   : > { %v4437_v24 = vpop.xlane.xlu0 %4436  ;;  %v6404_v0 = vpop.eup %6403 }
 0xa11   : > { %6405 = vrcp.f32 %v4437_v24  ;;  %v4324_v22 = vmul.f32 %v6404_v0, %v8289_v1  ;;  %v4428_v61 = vpop.xlane.xlu2 %4427  ;;  %v4282_v11 = vpop.xlane.xlu1 %4281 }
 0xa12   : > { %6407 = vrcp.f32 %v4428_v61 }
 0xa13   : > { %6409 = vrcp.f32 %v4282_v11  ;;  %5919 = vmatmul.msk.f32.vlgmr.msra.gmra.mxu3 %vm894_vm11, %v4324_v22 }
 0xa14   : > { %5070 = vmatpush.msra.mxu3 %v6075_v7  ;;  %v8458_v7 = vpop.f32.mrf.mxu0 }
 0xa17   : > { %v6406_v44 = vpop.eup %6405 }
 0xa18   : > { %v4491_v57 = vmul.f32 %v6406_v44, %v8296_v18  ;;  %v4294_v63 = vpop.xlane.xlu0 %4293  ;;  %v6408_v19 = vpop.eup %6407 }
 0xa19   : > { %6411 = vrcp.f32 %v4294_v63  ;;  %v6410_v54 = vpop.eup %6409  ;;  %v4488_v1 = vmul.f32 %v6408_v19, %v8294_v20 }
 0xa1a   : > { %5926 = vmatmul.msk.f32.vlgmr.msra.gmra.mxu2 %vm894_vm11, %v4491_v57  ;;  %v4322_v30 = vmul.f32 %v6410_v54, %v8301_v62 }
 0xa1b   : > { %5252 = vmatpush.msra.mxu2 %v6081_v26  ;;  %5923 = vmatmul.msk.f32.vlgmr.msrb.gmra.mxu3 %vm894_vm11, %v4488_v1 }
 0xa1c   : > { %5917 = vmatmul.msk.f32.vlgmr.msra.gmra.mxu1 %vm894_vm11, %v4322_v30  ;;  %5174 = vmatpush.msrb.mxu3 %v6080_v28 }
 0xa1d   : > { %5018 = vmatpush.msra.mxu1 %v6085_v13 }
 0xa1f   : > { %v6412_v18 = vpop.eup %6411 }
 0xa20   : > { %v4440_v3 = vpop.xlane.xlu1 %4439  ;;  %v4431_v36 = vpop.xlane.xlu0 %4430  ;;  %v4326_v20 = vmul.f32 %v6412_v18, %v8310_v16 }
 0xa21   : > { %6413 = vrcp.f32 %v4440_v3  ;;  %v4449_v27 = vpop.xlane.xlu2 %4448 }
 0xa22   : > { %6415 = vrcp.f32 %v4431_v36 }
 0xa23   : > { %6417 = vrcp.f32 %v4449_v27  ;;  %v8475_v27 = vpop.f32.mrf.mxu1 }
 0xa24   : > { %5921 = vmatmul.msk.f32.vlgmr.msrb.gmra.mxu1 %vm894_vm11, %v4326_v20 }
 0xa25   : > { %5122 = vmatpush.msrb.mxu1 %v6091_v14 }
 0xa27   : > { %v6414_v48 = vpop.eup %6413 }
 0xa28   : > { %v6416_v62 = vpop.eup %6415  ;;  %v4492_v2 = vmul.f32 %v6414_v48, %v8318_v46  ;;  %v4452_v51 = vpop.xlane.xlu1 %4451 }
 0xa29   : > { %v4443_v47 = vpop.xlane.xlu0 %4442  ;;  %v6418_v53 = vpop.eup %6417  ;;  %v4489_v16 = vmul.f32 %v6416_v62, %v8315_v9  ;;  %6419 = vrcp.f32 %v4452_v51 }
 0xa2a   : > { %v4434_v60 = vpop.xlane.xlu2 %4433  ;;  %v4495_v40 = vmul.f32 %v6418_v53, %v8320_v35  ;;  %6421 = vrcp.f32 %v4443_v47  ;;  %5927 = vmatmul.msk.f32.vlgmr.msra.gmra.mxu3 %vm894_vm11, %v4492_v2  ;;  %v3062_v53 = vld [vmem:[#allocation2 + $0x30] sm:$0xff] }
 0xa2b   : > { %6423 = vrcp.f32 %v4434_v60  ;;  %5924 = vmatmul.msk.f32.vlgmr.msra.gmra.mxu0 %vm894_vm11, %v4489_v16  ;;  %5278 = vmatpush.msra.mxu3 %v6090_v58  ;;  %v3061_v58 = vld [vmem:[#allocation2 + $0x28] sm:$0xff]  ;;  %v3060_v16 = vld [vmem:[#allocation2 + $0x20] sm:$0xff] }
 0xa2c   : > { %5930 = vmatmul.msk.f32.vlgmr.msrb.gmra.mxu2 %vm894_vm11, %v4495_v40 }
 0xa2f   : > { %v6420_v46 = vpop.eup %6419 }
 0xa30   : > { %v6422_v43 = vpop.eup %6421  ;;  %v4496_v25 = vmul.f32 %v6420_v46, %v8333_v59 }
 0xa31   : > { %v6424_v9 = vpop.eup %6423  ;;  %v4493_v32 = vmul.f32 %v6422_v43, %v8330_v15  ;;  %v4455_v38 = vpop.xlane.xlu0 %4454 }
 0xa32   : > { %v4461_v49 = vpop.xlane.xlu2 %4460  ;;  %v4490_v35 = vmul.f32 %v6424_v9, %v8339_v12  ;;  %5931 = vmatmul.msk.f32.vlgmr.msrb.gmra.mxu3 %vm894_vm11, %v4496_v25 }
 0xa33   : > { %6425 = vrcp.f32 %v4461_v49  ;;  %5928 = vmatmul.msk.f32.vlgmr.msrb.gmra.mxu0 %vm894_vm11, %v4493_v32 }
 0xa34   : > { %5925 = vmatmul.msk.f32.vlgmr.msra.gmra.mxu1 %vm894_vm11, %v4490_v35  ;;  %v4630_v45 = vpop.f32.mrf.mxu2  ;;  %6427 = vrcp.f32 %v4455_v38 }
 0xa35   : > { %5339 = vrot.lane.b32.xlu1 %v4630_v45, %s6532_s18 }
 0xa39   : > { %v6426_v59 = vpop.eup %6425  ;;  %v4464_v34 = vpop.xlane.xlu1 %4463 }
 0xa3a   : > { %v4499_v17 = vmul.f32 %v6426_v59, %v8349_v4  ;;  %v4446_v15 = vpop.xlane.xlu2 %4445  ;;  %v6428_v56 = vpop.eup %6427 }
 0xa3b   : > { %6429 = vrcp.f32 %v4446_v15  ;;  %v4497_v11 = vmul.f32 %v6428_v56, %v8352_v52 }
 0xa3c   : > { %6431 = vrcp.f32 %v4464_v34  ;;  %5934 = vmatmul.msk.f32.vlgmr.msra.gmra.mxu2 %vm894_vm11, %v4499_v17  ;;  %v4656_v12 = vpop.f32.mrf.mxu3 }
 0xa3d   : > { %5341 = vrot.lane.b32.xlu0 %v4656_v12, %s6532_s18 }
 0xa41   : > { %v6430_v10 = vpop.eup %6429  ;;  %v4458_v0 = vpop.xlane.xlu1 %4457 }
 0xa42   : > { %v6432_v41 = vpop.eup %6431  ;;  %v4494_v29 = vmul.f32 %v6430_v10, %v8361_v31  ;;  %v6134_v24 = vpop.permute.xlu2 %6133  ;;  %6433 = vrcp.f32 %v4458_v0 }
 0xa43   : > { %v4500_v22 = vmul.f32 %v6432_v41, %v8364_v8  ;;  %v6136_v4 = vunpack.i.h.bf16 %v6134_v24  ;;  %v6135_v61 = vunpack.i.l.bf16 %v6134_v24  ;;  %v4467_v8 = vpop.xlane.xlu0 %4466 }
 0xa44   : > { %5929 = vmatmul.msk.f32.vlgmr.msrb.gmra.mxu1 %vm894_vm11, %v4494_v29  ;;  %6435 = vrcp.f32 %v4467_v8  ;;  %v3067_v8 = vld [vmem:[#allocation4 + $0x20] sm:$0xff] }
 0xa45   : > { %5935 = vmatmul.msk.f32.vlgmr.msra.gmra.mxu3 %vm894_vm11, %v4500_v22  ;;  %5200 = vmatpush.msra.mxu0 %v6135_v61 }
 0xa46   : > { %5226 = vmatpush.msra.mxu1 %v6136_v4  ;;  %5932 = vmatmul.msk.f32.vlgmr.msra.gmra.mxu0 %vm894_vm11, %v4497_v11 }
 0xa48   : > { %v6434_v31 = vpop.eup %6433 }
 0xa49   : > { %v4498_v44 = vmul.f32 %v6434_v31, %v8370_v37  ;;  %v3069_v31 = vld [vmem:[#allocation4 + $0x30] sm:$0xff] }
 0xa4a   : > { %v6436_v63 = vpop.eup %6435 }
 0xa4b   : > { %v4501_v26 = vmul.f32 %v6436_v63, %v8372_v55 }
 0xa4c   : > { %5933 = vmatmul.msk.f32.vlgmr.msra.gmra.mxu1 %vm894_vm11, %v4498_v44  ;;  %v3068_v44 = vld [vmem:[#allocation4 + $0x28] sm:$0xff] }
 0xa4f   : > { %v4682_v57 = vpop.f32.mrf.mxu0 }
 0xa50   : > { %5343 = vrot.lane.b32.xlu2 %v4682_v57, %s6532_s18 }
 0xa54   : > { %v5310_v52 = vpop.permute.xlu0 %5309 }
 0xa55   : > { %5330 = vmatpush.msrb.mxu1 %v5310_v52 }
 0xa56   : > { %v4734_v19 = vpop.f32.mrf.mxu2 }
 0xa57   : > { %v4708_v48 = vpop.f32.mrf.mxu1 }
 0xa58   : > { %5355 = vrot.lane.b32.xlu2 %v4734_v19, %s6533_s19 }
 0xa59   : > { %v5284_v54 = vpop.permute.xlu1 %5283 }
 0xa5a   : > { %5304 = vmatpush.msrb.mxu0 %v5284_v54 }
 0xa5b   : > { %5936 = vmatmul.msk.f32.vlgmr.msrb.gmra.mxu0 %vm894_vm11, %v4501_v26 }
 0xa5e   : > { %v4760_v28 = vpop.f32.mrf.mxu3 }
 0xa5f   : > { %v4838_v1 = vpop.f32.mrf.mxu2 }
 0xa60   : > { %v4786_v37 = vpop.f32.mrf.mxu0 }
 0xa61   : > { %5359 = vrot.lane.b32.xlu0 %v4786_v37, %s6533_s19 }
 0xa69   : > { %5371 = vrot.lane.b32.xlu0 %v4838_v1, %s6534_s20 }
 0xa71   : > { %5357 = vrot.lane.b32.xlu0 %v4760_v28, %s6533_s19 }
 0xa7a   : > { %v4470_v30 = vpop.xlane.xlu2 %4469 }
 0xa7b   : > { %6437 = vrcp.f32 %v4470_v30 }
 0xa81   : > { %v6438_v13 = vpop.eup %6437 }
 0xa82   : > { %v4502_v18 = vmul.f32 %v6438_v13, %v8408_v50  ;;  %v3063_v50 = vld [vmem:[#allocation2 + $0x38] sm:$0xff] }
 0xa83   : > { %5479 = vmatpush.msrb.mxu2 %v3063_v50 }
 0xa84   : > { %5937 = vmatmul.msk.f32.vlgmr.msrb.gmra.mxu1 %vm894_vm11, %v4502_v18 }
 0xa85   : > { %5480 = vmatpush.msrb.mxu2 %v3062_v53 }
 0xa86   : > { %v8471_v55 = vpop.f32.mrf.mxu2 }
 0xa87   : > { %5481 = vmatpush.msrb.mxu2 %v3061_v58 }
 0xa88   : > { %v4890_v20 = vpop.f32.mrf.mxu0 }
 0xa89   : > { %5482 = vmatpush.msrb.mxu2 %v3060_v16 }
 0xa96   : > { %v4864_v3 = vpop.f32.mrf.mxu3 }
 0xa97   : > { %5373 = vrot.lane.b32.xlu1 %v4864_v3, %s6534_s20 }
 0xa99   : > { %v4812_v2 = vpop.f32.mrf.mxu1 }
 0xa9d   : > { %v5046_v36 = vpop.f32.mrf.mxu2 }
 0xa9e   : > { %5399 = vrot.lane.b32.xlu0 %v5046_v36, %s6532_s18  ;;  %v8480_v51 = vpop.f32.mrf.mxu3 }
 0xaa1   : > { %v4916_v60 = vpop.f32.mrf.mxu1 }
 0xaa7   : > { %v5340_v17 = vpop.permute.xlu1 %5339 }
 0xaa8   : > { %v8477_v14 = vpop.f32.mrf.mxu0  ;;  %v5383_v12 = vsel %vm894_vm11, %v8437_v23, %v5340_v17 }
 0xaaa   : > { %v5344_v49 = vpop.permute.xlu2 %5343 }
 0xaab   : > { %v5385_v45 = vsel %vm894_vm11, %v8458_v7, %v5344_v49  ;;  %v3070_v7 = vld [vmem:[#allocation4 + $0x38] sm:$0xff] }
 0xaac   : > { %5531 = vmatpush.msrb.mxu3 %v3070_v7 }
 0xaad   : > { %v5072_v40 = vpop.f32.mrf.mxu3 }
 0xaae   : > { %5532 = vmatpush.msrb.mxu3 %v3069_v31 }
 0xaaf   : > { %v5150_v47 = vpop.f32.mrf.mxu2  ;;  %v5342_v32 = vpop.permute.xlu0 %5341 }
 0xab0   : > { %v5098_v62 = vpop.f32.mrf.mxu0  ;;  %v5384_v22 = vsel %vm894_vm11, %v8445_v5, %v5342_v32  ;;  %5533 = vmatpush.msrb.mxu3 %v3068_v44 }
 0xab1   : > { %5403 = vrot.lane.b32.xlu1 %v5098_v62, %s6532_s18  ;;  %v8485_v43 = vpop.f32.mrf.mxu1 }
 0xab2   : > { %v5356_v15 = vpop.permute.xlu2 %5355  ;;  %5534 = vmatpush.msrb.mxu3 %v3067_v8 }
 0xab3   : > { %v5387_v10 = vsel %vm2867_vm12, %v5383_v12, %v5356_v15 }
 0xab5   : > { %v5176_v9 = vpop.f32.mrf.mxu3 }
 0xab9   : > { %5415 = vrot.lane.b32.xlu1 %v5150_v47, %s6533_s19 }
 0xabf   : > { %v5254_v25 = vpop.f32.mrf.mxu2 }
 0xac1   : > { %5401 = vrot.lane.b32.xlu1 %v5072_v40, %s6532_s18  ;;  %v5124_v35 = vpop.f32.mrf.mxu1 }
 0xac3   : > { %v5202_v46 = vpop.f32.mrf.mxu0 }
 0xac4   : > { %5419 = vrot.lane.b32.xlu2 %v5202_v46, %s6533_s19 }
 0xac8   : > { %v5280_v24 = vpop.f32.mrf.mxu3 }
 0xac9   : > { %5431 = vrot.lane.b32.xlu1 %v5254_v25, %s6534_s20  ;;  %v5228_v56 = vpop.f32.mrf.mxu1 }
 0xacc   : > { %5417 = vrot.lane.b32.xlu2 %v5176_v9, %s6533_s19 }
 0xad1   : > { %5375 = vrot.lane.b32.xlu1 %v4890_v20, %s6534_s20 }
 0xad3   : > { %v5360_v38 = vpop.permute.xlu0 %5359 }
 0xad4   : > { %5345 = vrot.lane.b32.xlu2 %v4708_v48, %s6532_s18  ;;  %v5389_v59 = vsel %vm2867_vm12, %v5385_v45, %v5360_v38 }
 0xad8   : > { %v5306_v34 = vpop.f32.mrf.mxu0 }
 0xad9   : > { %5405 = vrot.lane.b32.xlu1 %v5124_v35, %s6532_s18  ;;  %5435 = vrot.lane.b32.xlu0 %v5306_v34, %s6534_s20  ;;  %s8541_s18 = scalar_lea.vmem %s8589_s12, %s6641_s26 }
 0xadb   : > { %v5372_v41 = vpop.permute.xlu0 %5371 }
 0xadc   : > { %5421 = vrot.lane.b32.xlu2 %v5228_v56, %s6533_s19  ;;  %v5391_v29 = vsel %vm2872_vm13, %v5387_v10, %v5372_v41 }
 0xadd   : > { %5938 = vmatmul.msk.f32.vlgmr.msrb.gmra.mxu2 %vm544_vm0, %v5391_v29  ;;  %v8614_v29 = vld [vmem:[#allocation9_spill] sm:$0xff] }
 0xae1   : > { %5377 = vrot.lane.b32.xlu1 %v4916_v60, %s6534_s20  ;;  %5433 = vrot.lane.b32.xlu0 %v5280_v24, %s6534_s20 }
 0xae3   : > { %v5358_v23 = vpop.permute.xlu0 %5357 }
 0xae4   : > { %v5388_v4 = vsel %vm2867_vm12, %v5384_v22, %v5358_v23  ;;  %v8615_v23 = vld [vmem:[#allocation10_spill] sm:$0xff] }
 0xae9   : > { %5361 = vrot.lane.b32.xlu0 %v4812_v2, %s6533_s19 }
 0xb01   : > { %v5332_v0 = vpop.f32.mrf.mxu1 }
 0xb02   : > { %5437 = vrot.lane.b32.xlu0 %v5332_v0, %s6534_s20 }
 0xb09   : > { %v5374_v61 = vpop.permute.xlu1 %5373 }
 0xb0a   : > { %v5392_v11 = vsel %vm2872_vm13, %v5388_v4, %v5374_v61 }
 0xb0b   : > { %5939 = vmatmul.msk.f32.gmra.mxu2 %vm544_vm0, %v5392_v11  ;;  %v8616_v11 = vld [vmem:[#allocation8_spill] sm:$0xff] }
 0xb10   : > { %v5400_v19 = vpop.permute.xlu0 %5399 }
 0xb11   : > { %v5443_v5 = vsel %vm894_vm11, %v8471_v55, %v5400_v19 }
 0xb1e   : > { %v5420_v28 = vpop.permute.xlu2 %5419 }
 0xb23   : > { %v5404_v57 = vpop.permute.xlu1 %5403 }
 0xb24   : > { %v5445_v62 = vsel %vm894_vm11, %v8477_v14, %v5404_v57  ;;  %v6147_v14 = vld [vmem:[%s8584_s7 + $0x1] ss:$0 sm:$0xff] }
 0xb25   : > { %v5449_v47 = vsel %vm2867_vm12, %v5445_v62, %v5420_v28 }
 0xb26   : > { %v5418_v18 = vpop.permute.xlu2 %5417 }
 0xb2b   : > { %v5416_v52 = vpop.permute.xlu1 %5415 }
 0xb2c   : > { %v5447_v26 = vsel %vm2867_vm12, %v5443_v5, %v5416_v52 }
 0xb2e   : > { %v5346_v50 = vpop.permute.xlu2 %5345 }
 0xb2f   : > { %v5386_v2 = vsel %vm894_vm11, %v8475_v27, %v5346_v50 }
 0xb33   : > { %v5402_v63 = vpop.permute.xlu1 %5401 }
 0xb34   : > { %v5444_v3 = vsel %vm894_vm11, %v8480_v51, %v5402_v63 }
 0xb35   : > { %v5448_v55 = vsel %vm2867_vm12, %v5444_v3, %v5418_v18 }
 0xb36   : > { %v5422_v9 = vpop.permute.xlu2 %5421 }
 0xb3b   : > { %v5432_v54 = vpop.permute.xlu1 %5431 }
 0xb3c   : > { %v5451_v37 = vsel %vm2872_vm13, %v5447_v26, %v5432_v54 }
 0xb3d   : > { %5942 = vmatmul.msk.f32.vlgmr.msrb.gmra.mxu3 %vm544_vm0, %v5451_v37 }
 0xb43   : > { %v5376_v1 = vpop.permute.xlu1 %5375 }
 0xb44   : > { %v5393_v30 = vsel %vm2872_vm13, %v5389_v59, %v5376_v1  ;;  %v6148_v59 = vld [vmem:[%s8586_s9 + $0x1] ss:$0 sm:$0xff] }
 0xb45   : > { %5940 = vmatmul.msk.f32.gmra.mxu2 %vm544_vm0, %v5393_v30 }
 0xb4b   : > { %v5436_v13 = vpop.permute.xlu0 %5435  ;;  %v5406_v36 = vpop.permute.xlu1 %5405 }
 0xb4c   : > { %v5453_v51 = vsel %vm2872_vm13, %v5449_v47, %v5436_v13  ;;  %v5446_v25 = vsel %vm894_vm11, %v8485_v43, %v5406_v36 }
 0xb4d   : > { %v5450_v32 = vsel %vm2867_vm12, %v5446_v25, %v5422_v9 }
 0xb53   : > { %v5434_v20 = vpop.permute.xlu0 %5433  ;;  %v5378_v58 = vpop.permute.xlu1 %5377 }
 0xb54   : > { %v5452_v48 = vsel %vm2872_vm13, %v5448_v55, %v5434_v20 }
 0xb55   : > { %5943 = vmatmul.msk.f32.gmra.mxu3 %vm544_vm0, %v5452_v48 }
 0xb5b   : > { %v5362_v53 = vpop.permute.xlu0 %5361 }
 0xb5c   : > { %v5390_v16 = vsel %vm2867_vm12, %v5386_v2, %v5362_v53 }
 0xb5d   : > { %5944 = vmatmul.msk.f32.gmra.mxu3 %vm544_vm0, %v5453_v51  ;;  %v5394_v60 = vsel %vm2872_vm13, %v5390_v16, %v5378_v58 }
 0xb5e   : > { %5941 = vmatmul.msk.f32.gmra.mxu2 %vm544_vm0, %v5394_v60 }
 0xb60   : > { %v5484_v40 = vpop.f32.mrf.mxu2 }
 0xb61   : > { %v5496_v27 = vadd.f32 %v5484_v40, %v7649_v42 }
 0xb63   : > { %v5503_v46 = vadd.f32 %v6147_v14, %v5496_v27 }
 0xb65   : > { %5559 = vst.msk [vmem:[%s8541_s18] sm:$0xff] %vm544_vm0, %v5503_v46 }
 0xb74   : > { %v5438_v49 = vpop.permute.xlu0 %5437 }
 0xb75   : > { %v5454_v42 = vsel %vm2872_vm13, %v5450_v32, %v5438_v49 }
 0xb76   : > { %5945 = vmatmul.msk.f32.gmra.mxu3 %vm544_vm0, %v5454_v42 }
 0xb8e   : > { %v5487_v35 = vpop.f32.mrf.mxu2 }
 0xb8f   : > { %v5497_v45 = vadd.f32 %v5487_v35, %v7665_v39 }
 0xb91   : > { %v5504_v38 = vadd.f32 %v6147_v14, %v5497_v45 }
 0xb93   : > { %5560 = vst.msk [vmem:[%s8541_s18 + $0x8] sm:$0xff] %vm544_vm0, %v5504_v38 }
 0xbc0   : > { %v5536_v43 = vpop.f32.mrf.mxu3 }
 0xbc1   : > { %v5548_v17 = vadd.f32 %v5536_v43, %v7657_v6 }
 0xbc3   : > { %v5555_v15 = vadd.f32 %v6148_v59, %v5548_v17 }
 0xbc5   : > { %5563 = vst.msk [vmem:[%s512_s30] sm:$0xff] %vm544_vm0, %v5555_v15 }
 0xbc8   : > { %v5490_v34 = vpop.f32.mrf.mxu2 }
 0xbc9   : > { %v5498_v39 = vadd.f32 %v5490_v34, %v7677_v21 }
 0xbcb   : > { %v5505_v12 = vadd.f32 %v6147_v14, %v5498_v39 }
 0xbcd   : > { %5561 = vst.msk [vmem:[%s8541_s18 + $0x10] sm:$0xff] %vm544_vm0, %v5505_v12 }
 0xbd8   : > { %v5539_v56 = vpop.f32.mrf.mxu3 }
 0xbd9   : > { %v5549_v10 = vadd.f32 %v5539_v56, %v7662_v33 }
 0xbdb   : > { %v5556_v41 = vadd.f32 %v6148_v59, %v5549_v10 }
 0xbdd   : > { %5564 = vst.msk [vmem:[%s512_s30 + $0x8] sm:$0xff] %vm544_vm0, %v5556_v41 }
 0xbe0   : > { %v5542_v6 = vpop.f32.mrf.mxu3 }
 0xbe1   : > { %v5550_v24 = vadd.f32 %v5542_v6, %v8614_v29  ;;  %v5493_v0 = vpop.f32.mrf.mxu2 }
 0xbe2   : > { %v5499_v22 = vadd.f32 %v5493_v0, %v8615_v23 }
 0xbe3   : > { %v5557_v4 = vadd.f32 %v6148_v59, %v5550_v24 }
 0xbe4   : > { %v5506_v61 = vadd.f32 %v6147_v14, %v5499_v22 }
 0xbe5   : > { %5565 = vst.msk [vmem:[%s512_s30 + $0x10] sm:$0xff] %vm544_vm0, %v5557_v4 }
 0xbe6   : > { %5562 = vst.msk [vmem:[%s8541_s18 + $0x18] sm:$0xff] %vm544_vm0, %v5506_v61 }
 0xbf9   : > { %v5545_v21 = vpop.f32.mrf.mxu3 }
 0xbfa   : > { %v5551_v7 = vadd.f32 %v5545_v21, %v8616_v11 }
 0xbfc   : > { %v5558_v31 = vadd.f32 %v6148_v59, %v5551_v7 }
 0xbfe   : > { %5566 = vst.msk [vmem:[%s512_s30 + $0x18] sm:$0xff] %vm544_vm0, %v5558_v31 }
 0xbff PF: > { %s26_s25 = sadd.s32 1, %s6521_s25  }
 0xc00   : > { %p23_p7 = scmp.ge.s32.totalorder %s26_s25, 4  }
 0xc02   :  { %25 = sbr.rel (!%p23_p7) target bundleno = 2 (0x2), region = 132 }
 0xc07   :  { %5606 = vsyncpa [#allocation3], 1 }
 0xc08   :  { %5608 = vsyncpa [#allocation3 + $0x1], 1 }
 0xc09   :  { %5609 = vsyncpa [#allocation5], 1 }

</bundles_post_ra>
